<compile_context>
chip_gen: v5e
topology: v5e:2x2
jax: 0.10.0
libtpu: 0.0.40
codegen_flags: <defaults>
</compile_context>

<pallas_src>
import functools

import jax
import jax.numpy as jnp
from jax.experimental import pallas as pl
from jax.experimental.pallas import tpu as pltpu

NUM_CLASSES = 10
TOP_DIMS = [32]          # cfg = (num_classes, top_dims)
NUM_FTRS = 64            # scaled-down stand-in for b5's _fc.in_features (2048)
C_PAD = 128              # every channel/feature dim is zero-padded to 128 lanes
STEM_K_PAD = 32          # im2col K = 27 padded to 32 (was 128)
VMEM_LIMIT = 32 * 1024 * 1024


def _round_up(x, m):
    return ((x + m - 1) // m) * m


# --------------------------- in-kernel helpers ------------------------------ #

def _sigmoid_f32(x):
    # 1/(1+exp(-x)); the reciprocal goes to the EUP slot (nearly free). f32, v5e-safe.
    return pl.reciprocal(1.0 + jnp.exp(-x), approx=True)


def _shift_w(x, d):
    """y[..., j, :] = x[..., j+d, :], zero at the boundary.  W = sublane axis."""
    if d == 0:
        return x
    zero = jnp.zeros_like(x[:, :, :1, :])
    if d > 0:
        return jnp.concatenate([x[:, :, d:, :], zero], axis=2)
    return jnp.concatenate([zero, x[:, :, :d, :]], axis=2)


def _shift_h(x, d):
    """y[:, i, ...] = x[:, i+d, ...], zero at the boundary.  H = leading axis (free)."""
    if d == 0:
        return x
    zero = jnp.zeros_like(x[:, :1, :, :])
    if d > 0:
        return jnp.concatenate([x[:, d:, :, :], zero], axis=1)
    return jnp.concatenate([zero, x[:, :d, :, :]], axis=1)


# ------------------------------ Pallas kernels ------------------------------ #

def _matmul_bias_act_kernel(x_ref, w_ref, b_ref, o_ref, *, act):
    y = jnp.dot(x_ref[...], w_ref[...], preferred_element_type=jnp.float32)
    y = y + b_ref[...]                       # (1, N) f32 broadcast
    if act == "relu":
        y = jnp.maximum(y, 0.0)
    elif act == "swish":
        y = y * _sigmoid_f32(y)
    o_ref[...] = y.astype(o_ref.dtype)


def matmul_bias_act(x, w, b, act="none", tile_m=256, out_dtype=jnp.bfloat16):
    """Fused (X @ W + b) + activation; bf16 operands, f32 accumulate.

    tile_m defaults to 256 (v6e/v7x MXU rows) but is clamped so small problems run as a
    single block (M=128 stem here => grid=(1,), no half-empty MXU pushes).
    """
    M, K = x.shape
    Kw, N = w.shape
    assert K == Kw
    tm = min(tile_m, _round_up(M, 8))
    Mp = _round_up(M, tm)
    if Mp != M:
        x = jnp.pad(x, ((0, Mp - M), (0, 0)))
    out = pl.pallas_call(
        functools.partial(_matmul_bias_act_kernel, act=act),
        out_shape=jax.ShapeDtypeStruct((Mp, N), out_dtype),
        grid=(Mp // tm,),
        in_specs=[
            pl.BlockSpec((tm, K), lambda i: (i, 0)),
            pl.BlockSpec((K, N), lambda i: (0, 0)),
            pl.BlockSpec((1, N), lambda i: (0, 0)),
        ],
        out_specs=pl.BlockSpec((tm, N), lambda i: (i, 0)),
        compiler_params=pltpu.CompilerParams(
            dimension_semantics=("parallel",), vmem_limit_bytes=VMEM_LIMIT),
    )(x, w, b)
    return out[:M]


def _mbconv_kernel(x_ref, *refs, has_expand, has_skip, NB, H, W):
    """One full MBConv block for NB batch elements, fully VMEM-resident."""
    if has_expand:
        (exp_w, exp_b, dw_w, dw_s, dw_b, se_w1, se_b1, se_w2, se_b2,
         proj_w, proj_b, o_ref) = refs
    else:
        (dw_w, dw_s, dw_b, se_w1, se_b1, se_w2, se_b2,
         proj_w, proj_b, o_ref) = refs

    C = x_ref.shape[-1]
    x_in = x_ref[...]                                         # (NB, H, W, C) bf16

    # expand 1x1 conv (folded BN) + swish; M = NB*H*W rows on the MXU
    if has_expand:
        h = jnp.dot(x_in.reshape(NB * H * W, C), exp_w[...],
                    preferred_element_type=jnp.float32) + exp_b[...]
        h = h * _sigmoid_f32(h)
        h = h.reshape(NB, H, W, C)
    else:
        h = x_in.astype(jnp.float32)

    # depthwise 3x3 SAME conv + folded BN + swish, no padded scratch:
    # zero boundaries come from value-level shifted slabs.  The W (sublane) shift is
    # hoisted out of the dh loop -> 3 cross-sublane shifts total (not 9); dh shifts are
    # leading-dim re-selection (free).
    w_dw = dw_w[...]                                          # (3, 3, C) f32
    acc = jnp.zeros((NB, H, W, C), jnp.float32)
    for dw_off in (-1, 0, 1):
        hs = _shift_w(h, dw_off)
        for dh_off in (-1, 0, 1):
            acc = acc + _shift_h(hs, dh_off) * w_dw[dh_off + 1, dw_off + 1]
    y = acc * dw_s[...] + dw_b[...]
    y = y * _sigmoid_f32(y)

    # squeeze-and-excite (GAP -> fc -> swish -> fc -> sigmoid gate), batched over NB
    s = jnp.mean(y, axis=(1, 2))                              # (NB, C)
    s = jnp.dot(s.astype(jnp.bfloat16), se_w1[...],
                preferred_element_type=jnp.float32) + se_b1[...]
    s = s * _sigmoid_f32(s)
    s = jnp.dot(s.astype(jnp.bfloat16), se_w2[...],
                preferred_element_type=jnp.float32) + se_b2[...]
    gate = _sigmoid_f32(s)                                    # (NB, C)
    y = y * gate[:, None, None, :]

    # project 1x1 conv (folded BN, linear) + optional residual, fused epilogue
    p = jnp.dot(y.reshape(NB * H * W, C).astype(jnp.bfloat16), proj_w[...],
                preferred_element_type=jnp.float32) + proj_b[...]
    p = p.reshape(NB, H, W, C)
    if has_skip:
        p = p + x_in.astype(jnp.float32)
    o_ref[...] = p.astype(o_ref.dtype)


def mbconv_block(x, blk):
    N, H, W, C = x.shape
    has_expand = blk["has_expand"]
    has_skip = blk["skip"]

    # Fold as many batch elements per grid step as keeps M = NB*H*W near the MXU native
    # row count (fills the MXU and minimizes ~0.35us/step pipeline overhead).
    NB = 1
    for cand in range(N, 0, -1):
        if N % cand == 0 and cand * H * W <= 512:
            NB = cand
            break

    args = [x]
    in_specs = [pl.BlockSpec((NB, H, W, C), lambda n: (n, 0, 0, 0))]

    def add_param(a):
        args.append(a)
        nd = a.ndim
        in_specs.append(pl.BlockSpec(a.shape, lambda n, _nd=nd: (0,) * _nd))

    if has_expand:
        add_param(blk["expand_w"]); add_param(blk["expand_b"])
    add_param(blk["dw_w"]); add_param(blk["dw_scale"]); add_param(blk["dw_bias"])
    add_param(blk["se_w1"]); add_param(blk["se_b1"])
    add_param(blk["se_w2"]); add_param(blk["se_b2"])
    add_param(blk["proj_w"]); add_param(blk["proj_b"])

    return pl.pallas_call(
        functools.partial(_mbconv_kernel, has_expand=has_expand,
                          has_skip=has_skip, NB=NB, H=H, W=W),
        out_shape=jax.ShapeDtypeStruct((N, H, W, C), jnp.bfloat16),
        grid=(N // NB,),
        in_specs=in_specs,
        out_specs=pl.BlockSpec((NB, H, W, C), lambda n: (n, 0, 0, 0)),
        compiler_params=pltpu.CompilerParams(
            dimension_semantics=("parallel",), vmem_limit_bytes=VMEM_LIMIT),
    )(*args)


def _head_kernel(x_ref, hw_ref, hb_ref, f1w_ref, f1b_ref, f2w_ref, f2b_ref,
                 o_ref, *, H, W):
    """Fused per-batch-element head: 1x1 conv + swish -> GAP -> fc1(+BN)+ReLU -> fc2."""
    C = x_ref.shape[-1]
    x = x_ref[0].reshape(H * W, C)                            # bf16
    y = jnp.dot(x, hw_ref[...], preferred_element_type=jnp.float32) + hb_ref[...]
    y = y * _sigmoid_f32(y)                                   # swish, f32
    feat = jnp.mean(y, axis=0, keepdims=True)                 # global avg pool (1, C)
    z = jnp.dot(feat.astype(jnp.bfloat16), f1w_ref[...],
                preferred_element_type=jnp.float32) + f1b_ref[...]
    z = jnp.maximum(z, 0.0)                                   # ReLU
    logits = jnp.dot(z.astype(jnp.bfloat16), f2w_ref[...],
                     preferred_element_type=jnp.float32) + f2b_ref[...]
    # Replicate over 8 sublanes so the store is a full, aligned (8,128) tile.
    o_ref[0] = jnp.broadcast_to(logits, (8, C)).astype(o_ref.dtype)


def head_forward(x, p):
    N, H, W, C = x.shape
    out = pl.pallas_call(
        functools.partial(_head_kernel, H=H, W=W),
        out_shape=jax.ShapeDtypeStruct((N, 8, C), jnp.float32),
        grid=(N,),                                            # >=2 parallel steps (v7x 2 TCs)
        in_specs=[
            pl.BlockSpec((1, H, W, C), lambda n: (n, 0, 0, 0)),
            pl.BlockSpec((C, C), lambda n: (0, 0)),
            pl.BlockSpec((1, C), lambda n: (0, 0)),
            pl.BlockSpec((C, C), lambda n: (0, 0)),
            pl.BlockSpec((1, C), lambda n: (0, 0)),
            pl.BlockSpec((C, C), lambda n: (0, 0)),
            pl.BlockSpec((1, C), lambda n: (0, 0)),
        ],
        out_specs=pl.BlockSpec((1, 8, C), lambda n: (n, 0, 0)),
        compiler_params=pltpu.CompilerParams(
            dimension_semantics=("parallel",), vmem_limit_bytes=VMEM_LIMIT),
    )(x, p["head_w"], p["head_b"], p["fc1_w"], p["fc1_b"], p["fc2_w"], p["fc2_b"])
    return out[:, 0, :]                                       # (N, C) f32


# -------------------------------- JAX glue ---------------------------------- #

def pad_to(a, shape):
    return jnp.pad(a, [(0, t - s) for s, t in zip(a.shape, shape)])


def tf_same_pad(x, k, s):
    # TF/EfficientNet-style "same" (possibly asymmetric) padding for stride-s conv.
    N, H, W, C = x.shape
    out_h, out_w = -(-H // s), -(-W // s)
    pad_h = max((out_h - 1) * s + k - H, 0)
    pad_w = max((out_w - 1) * s + k - W, 0)
    return jnp.pad(x, ((0, 0), (pad_h // 2, pad_h - pad_h // 2),
                       (pad_w // 2, pad_w - pad_w // 2), (0, 0)))


def extract_patches(x, k, s):
    # TODO(synk): at full b5 shapes this im2col should be formed inside the stem kernel;
    # at toy sizes it is cheap data-movement glue (the matmul itself runs in Pallas).
    N, H, W, C = x.shape
    Ho = (H - k) // s + 1
    Wo = (W - k) // s + 1
    cols = []
    for kh in range(k):
        for kw in range(k):
            cols.append(x[:, kh:kh + (Ho - 1) * s + 1:s,
                          kw:kw + (Wo - 1) * s + 1:s, :])
    return jnp.concatenate(cols, axis=-1), Ho, Wo              # (N, Ho, Wo, k*k*C)


def fold_bn(gamma, beta, mean, var, eps):
    scale = gamma / jnp.sqrt(var + eps)
    shift = beta - mean * scale
    return scale, shift


# ---------------------------- parameter creation ---------------------------- #

def init_params(key):
    keys = iter(jax.random.split(key, 128))

    def nrm(shape, s=0.1):
        return s * jax.random.normal(next(keys), shape, jnp.float32)

    def bn(c, eps=1e-3):
        gamma = 1.0 + nrm((c,), 0.05)
        beta = nrm((c,), 0.05)
        mean = nrm((c,), 0.05)
        var = 1.0 + 0.1 * jax.random.uniform(next(keys), (c,), jnp.float32)
        return fold_bn(gamma, beta, mean, var, eps)

    def w_pad(a):                       # matmul weights: zero-pad to 128x128, bf16
        return pad_to(a, (C_PAD, C_PAD)).astype(jnp.bfloat16)

    def b_pad(a):                       # bias/scale rows: zero-pad to (1,128), f32
        return pad_to(a.reshape(1, -1), (1, C_PAD)).astype(jnp.float32)

    p = {}
    # stem: 3x3 stride-2 conv 3->16, folded BN, swish (im2col K=27 padded to 32)
    w = nrm((3, 3, 3, 16))
    scale, shift = bn(16)
    p["stem_w"] = pad_to(w.reshape(27, 16) * scale[None, :],
                         (STEM_K_PAD, C_PAD)).astype(jnp.bfloat16)
    p["stem_b"] = b_pad(shift)

    blocks = []
    # MBConv block 1: 16 -> 16, expand ratio 1, SE reduce 4, residual skip
    b = {"has_expand": False, "skip": True}
    b["dw_w"] = pad_to(nrm((3, 3, 16)), (3, 3, C_PAD)).astype(jnp.float32)
    s_, sh_ = bn(16)
    b["dw_scale"], b["dw_bias"] = b_pad(s_), b_pad(sh_)
    b["se_w1"], b["se_b1"] = w_pad(nrm((16, 4))), b_pad(nrm((4,)))
    b["se_w2"], b["se_b2"] = w_pad(nrm((4, 16))), b_pad(nrm((16,)))
    s_, sh_ = bn(16)
    b["proj_w"] = w_pad(nrm((16, 16)) * s_[None, :])
    b["proj_b"] = b_pad(sh_)
    blocks.append(b)

    # MBConv block 2: 16 -> 24, expand ratio 6 (96), SE reduce 4, no skip
    b = {"has_expand": True, "skip": False}
    s_, sh_ = bn(96)
    b["expand_w"] = w_pad(nrm((16, 96)) * s_[None, :])
    b["expand_b"] = b_pad(sh_)
    b["dw_w"] = pad_to(nrm((3, 3, 96)), (3, 3, C_PAD)).astype(jnp.float32)
    s_, sh_ = bn(96)
    b["dw_scale"], b["dw_bias"] = b_pad(s_), b_pad(sh_)
    b["se_w1"], b["se_b1"] = w_pad(nrm((96, 4))), b_pad(nrm((4,)))
    b["se_w2"], b["se_b2"] = w_pad(nrm((4, 96))), b_pad(nrm((96,)))
    s_, sh_ = bn(24)
    b["proj_w"] = w_pad(nrm((96, 24)) * s_[None, :])
    b["proj_b"] = b_pad(sh_)
    blocks.append(b)
    p["blocks"] = blocks

    # head 1x1 conv: 24 -> NUM_FTRS, folded BN, swish
    s_, sh_ = bn(NUM_FTRS)
    p["head_w"] = w_pad(nrm((24, NUM_FTRS)) * s_[None, :])
    p["head_b"] = b_pad(sh_)

    # custom fc head: top = [NUM_FTRS] + TOP_DIMS + [NUM_CLASSES]
    top = [NUM_FTRS] + list(TOP_DIMS) + [NUM_CLASSES]
    s_, sh_ = bn(top[0], eps=1e-5)      # PyTorch BatchNorm1d default eps
    w1, b1 = nrm((top[0], top[1])), nrm((top[1],))
    p["fc1_w"] = w_pad(s_[:, None] * w1)
    p["fc1_b"] = b_pad(sh_ @ w1 + b1)
    p["fc2_w"] = w_pad(nrm((top[1], top[2])))
    p["fc2_b"] = b_pad(nrm((top[2],)))
    return p


# ---------------------------------- forward --------------------------------- #

def efficientnet_classifier_forward(x_nchw, p):
    # NCHW (PyTorch) -> NHWC (kernel layout)
    x = jnp.transpose(x_nchw, (0, 2, 3, 1)).astype(jnp.float32)
    N = x.shape[0]

    # stem: im2col (JAX glue) + fused Pallas matmul + folded BN + swish, 128-lane out
    xp = tf_same_pad(x, 3, 2)
    patches, Ho, Wo = extract_patches(xp, 3, 2)
    x2d = patches.reshape(N * Ho * Wo, -1)
    x2d = pad_to(x2d, (x2d.shape[0], STEM_K_PAD)).astype(jnp.bfloat16)
    y = matmul_bias_act(x2d, p["stem_w"], p["stem_b"], act="swish")
    x = y.reshape(N, Ho, Wo, C_PAD)                           # bf16, lane-dense

    # fused MBConv blocks (one pallas_call each, batch folded into the block)
    for blk in p["blocks"]:
        x = mbconv_block(x, blk)

    # fused head: 1x1 conv + swish -> GAP -> fc1(+BN)+ReLU -> fc2
    logits_p = head_forward(x, p)                             # (N, 128) f32
    return logits_p[:, :NUM_CLASSES]                          # (N, NUM_CLASSES)


# ----------------------------------- main ----------------------------------- #

if __name__ == "__main__":
    key = jax.random.PRNGKey(0)
    pkey, xkey = jax.random.split(key)
    params = init_params(pkey)

    # small image batch, NCHW like the PyTorch module expects
    x = jax.random.normal(xkey, (2, 3, 16, 16), jnp.float32)

    fwd = jax.jit(lambda xin: efficientnet_classifier_forward(xin, params))
    out = jax.block_until_ready(fwd(x))

    assert out.shape == (2, NUM_CLASSES), out.shape
    assert out.dtype == jnp.float32
    print("KERNEL_OK")
</pallas_src>

<mosaic_0001>
module attributes {stable_mosaic.version = 11 : i64} {
  func.func @_matmul_bias_act_kernel(%arg0: i32, %arg1: memref<128x32xbf16, #tpu.memory_space<vmem>>, %arg2: memref<32x128xbf16, #tpu.memory_space<vmem>>, %arg3: memref<1x128xf32, #tpu.memory_space<vmem>>, %arg4: memref<128x128xbf16, #tpu.memory_space<vmem>>) attributes {dimension_semantics = [#tpu.dimension_semantics<parallel>], iteration_bounds = array<i64: 1>, scalar_prefetch = 0 : i64, scratch_operands = 0 : i64, tpu.core_type = #tpu.core_type<tc>, window_params = [{transform_indices = @transform_0, window_bounds = array<i64: 128, 32>}, {pipeline_mode = #tpu.pipeline_mode<synchronous>, transform_indices = @transform_1, window_bounds = array<i64: 32, 128>}, {pipeline_mode = #tpu.pipeline_mode<synchronous>, transform_indices = @transform_2, window_bounds = array<i64: 1, 128>}, {transform_indices = @transform_3, window_bounds = array<i64: 128, 128>}]} {
    %c0 = arith.constant 0 : index
    %c0_0 = arith.constant 0 : index
    %0 = vector.load %arg1[%c0, %c0_0] : memref<128x32xbf16, #tpu.memory_space<vmem>>, vector<128x32xbf16>
    %c0_1 = arith.constant 0 : index
    %c0_2 = arith.constant 0 : index
    %1 = vector.load %arg2[%c0_1, %c0_2] : memref<32x128xbf16, #tpu.memory_space<vmem>>, vector<32x128xbf16>
    %cst = arith.constant dense<0.000000e+00> : vector<128x128xf32>
    %2 = tpu.matmul %0, %1, %cst {dimension_numbers = #tpu.dot_dimension_numbers<[1], [0], [0], [1], [0, 0, 1, 1], [], []>} : vector<128x32xbf16>, vector<32x128xbf16>, vector<128x128xf32> -> vector<128x128xf32>
    %c0_3 = arith.constant 0 : index
    %c0_4 = arith.constant 0 : index
    %3 = vector.load %arg3[%c0_3, %c0_4] : memref<1x128xf32, #tpu.memory_space<vmem>>, vector<1x128xf32>
    %4 = vector.broadcast %3 : vector<1x128xf32> to vector<128x128xf32>
    %5 = arith.addf %2, %4 : vector<128x128xf32>
    %cst_5 = arith.constant 0.000000e+00 : f32
    %6 = vector.broadcast %cst_5 : f32 to vector<128x128xf32>
    %7 = arith.subf %6, %5 : vector<128x128xf32>
    %8 = math.exp %7 : vector<128x128xf32>
    %cst_6 = arith.constant 1.000000e+00 : f32
    %9 = vector.broadcast %cst_6 : f32 to vector<128x128xf32>
    %10 = arith.addf %9, %8 : vector<128x128xf32>
    %11 = tpu.reciprocal %10 {approx = true} : vector<128x128xf32> -> vector<128x128xf32>
    %12 = arith.mulf %5, %11 : vector<128x128xf32>
    %13 = arith.truncf %12 : vector<128x128xf32> to vector<128x128xbf16>
    %c0_7 = arith.constant 0 : index
    %c0_8 = arith.constant 0 : index
    %14 = vector.load %arg4[%c0_7, %c0_8] : memref<128x128xbf16, #tpu.memory_space<vmem>>, vector<128x128xbf16>
    tpu.vector_store %arg4[%c0_7, %c0_8], %13 {strides = array<i32>} : memref<128x128xbf16, #tpu.memory_space<vmem>>, vector<128x128xbf16>,
    return
  }
  func.func @transform_0(%arg0: i32) -> (i32, i32) {
    %c0_i32 = arith.constant 0 : i32
    %c0_i32_0 = arith.constant 0 : i32
    return %arg0, %c0_i32 : i32, i32
  }
  func.func @transform_1(%arg0: i32) -> (i32, i32) {
    %c0_i32 = arith.constant 0 : i32
    %c0_i32_0 = arith.constant 0 : i32
    %c0_i32_1 = arith.constant 0 : i32
    return %c0_i32, %c0_i32_0 : i32, i32
  }
  func.func @transform_2(%arg0: i32) -> (i32, i32) {
    %c0_i32 = arith.constant 0 : i32
    %c0_i32_0 = arith.constant 0 : i32
    %c0_i32_1 = arith.constant 0 : i32
    return %c0_i32, %c0_i32_0 : i32, i32
  }
  func.func @transform_3(%arg0: i32) -> (i32, i32) {
    %c0_i32 = arith.constant 0 : i32
    %c0_i32_0 = arith.constant 0 : i32
    return %arg0, %c0_i32 : i32, i32
  }
}

module attributes {stable_mosaic.version = 11 : i64} {
  func.func @_mbconv_kernel(%arg0: i32, %arg1: memref<2x8x8x128xbf16, #tpu.memory_space<vmem>>, %arg2: memref<128x128xbf16, #tpu.memory_space<vmem>>, %arg3: memref<1x128xf32, #tpu.memory_space<vmem>>, %arg4: memref<3x3x128xf32, #tpu.memory_space<vmem>>, %arg5: memref<1x128xf32, #tpu.memory_space<vmem>>, %arg6: memref<1x128xf32, #tpu.memory_space<vmem>>, %arg7: memref<128x128xbf16, #tpu.memory_space<vmem>>, %arg8: memref<1x128xf32, #tpu.memory_space<vmem>>, %arg9: memref<128x128xbf16, #tpu.memory_space<vmem>>, %arg10: memref<1x128xf32, #tpu.memory_space<vmem>>, %arg11: memref<128x128xbf16, #tpu.memory_space<vmem>>, %arg12: memref<1x128xf32, #tpu.memory_space<vmem>>, %arg13: memref<2x8x8x128xbf16, #tpu.memory_space<vmem>>) attributes {dimension_semantics = [#tpu.dimension_semantics<parallel>], iteration_bounds = array<i64: 1>, scalar_prefetch = 0 : i64, scratch_operands = 0 : i64, tpu.core_type = #tpu.core_type<tc>, window_params = [{transform_indices = @transform_0, window_bounds = array<i64: 2, 8, 8, 128>}, {pipeline_mode = #tpu.pipeline_mode<synchronous>, transform_indices = @transform_1, window_bounds = array<i64: 128, 128>}, {pipeline_mode = #tpu.pipeline_mode<synchronous>, transform_indices = @transform_2, window_bounds = array<i64: 1, 128>}, {pipeline_mode = #tpu.pipeline_mode<synchronous>, transform_indices = @transform_3, window_bounds = array<i64: 3, 3, 128>}, {pipeline_mode = #tpu.pipeline_mode<synchronous>, transform_indices = @transform_4, window_bounds = array<i64: 1, 128>}, {pipeline_mode = #tpu.pipeline_mode<synchronous>, transform_indices = @transform_5, window_bounds = array<i64: 1, 128>}, {pipeline_mode = #tpu.pipeline_mode<synchronous>, transform_indices = @transform_6, window_bounds = array<i64: 128, 128>}, {pipeline_mode = #tpu.pipeline_mode<synchronous>, transform_indices = @transform_7, window_bounds = array<i64: 1, 128>}, {pipeline_mode = #tpu.pipeline_mode<synchronous>, transform_indices = @transform_8, window_bounds = array<i64: 128, 128>}, {pipeline_mode = #tpu.pipeline_mode<synchronous>, transform_indices = @transform_9, window_bounds = array<i64: 1, 128>}, {pipeline_mode = #tpu.pipeline_mode<synchronous>, transform_indices = @transform_10, window_bounds = array<i64: 128, 128>}, {pipeline_mode = #tpu.pipeline_mode<synchronous>, transform_indices = @transform_11, window_bounds = array<i64: 1, 128>}, {transform_indices = @transform_12, window_bounds = array<i64: 2, 8, 8, 128>}]} {
    %c0 = arith.constant 0 : index
    %c0_0 = arith.constant 0 : index
    %c0_1 = arith.constant 0 : index
    %c0_2 = arith.constant 0 : index
    %0 = vector.load %arg1[%c0, %c0_0, %c0_1, %c0_2] : memref<2x8x8x128xbf16, #tpu.memory_space<vmem>>, vector<2x8x8x128xbf16>
    %1 = vector.shape_cast %0 : vector<2x8x8x128xbf16> to vector<128x128xbf16>
    %c0_3 = arith.constant 0 : index
    %c0_4 = arith.constant 0 : index
    %2 = vector.load %arg2[%c0_3, %c0_4] : memref<128x128xbf16, #tpu.memory_space<vmem>>, vector<128x128xbf16>
    %cst = arith.constant dense<0.000000e+00> : vector<128x128xf32>
    %3 = tpu.matmul %1, %2, %cst {dimension_numbers = #tpu.dot_dimension_numbers<[1], [0], [0], [1], [0, 0, 1, 1], [], []>} : vector<128x128xbf16>, vector<128x128xbf16>, vector<128x128xf32> -> vector<128x128xf32>
    %c0_5 = arith.constant 0 : index
    %c0_6 = arith.constant 0 : index
    %4 = vector.load %arg3[%c0_5, %c0_6] : memref<1x128xf32, #tpu.memory_space<vmem>>, vector<1x128xf32>
    %5 = vector.broadcast %4 : vector<1x128xf32> to vector<128x128xf32>
    %6 = arith.addf %3, %5 : vector<128x128xf32>
    %cst_7 = arith.constant 0.000000e+00 : f32
    %7 = vector.broadcast %cst_7 : f32 to vector<128x128xf32>
    %8 = arith.subf %7, %6 : vector<128x128xf32>
    %9 = math.exp %8 : vector<128x128xf32>
    %cst_8 = arith.constant 1.000000e+00 : f32
    %10 = vector.broadcast %cst_8 : f32 to vector<128x128xf32>
    %11 = arith.addf %10, %9 : vector<128x128xf32>
    %12 = tpu.reciprocal %11 {approx = true} : vector<128x128xf32> -> vector<128x128xf32>
    %13 = arith.mulf %6, %12 : vector<128x128xf32>
    %14 = vector.shape_cast %13 : vector<128x128xf32> to vector<2x8x8x128xf32>
    %c0_9 = arith.constant 0 : index
    %c0_10 = arith.constant 0 : index
    %c0_11 = arith.constant 0 : index
    %15 = vector.load %arg4[%c0_9, %c0_10, %c0_11] : memref<3x3x128xf32, #tpu.memory_space<vmem>>, vector<3x3x128xf32>
    %cst_12 = arith.constant 0.000000e+00 : f32
    %16 = vector.broadcast %cst_12 : f32 to vector<2x8x8x128xf32>
    %cst_13 = arith.constant 0.000000e+00 : f32
    %17 = vector.broadcast %cst_13 : f32 to vector<2x8x1x128xf32>
    %18 = vector.extract_strided_slice %14 {offsets = [0, 0, 0, 0], sizes = [2, 8, 7, 128], strides = [1, 1, 1, 1]} : vector<2x8x8x128xf32> to vector<2x8x7x128xf32>
    %19 = tpu.concatenate %17, %18 in 2 : vector<2x8x1x128xf32>, vector<2x8x7x128xf32> -> vector<2x8x8x128xf32>
    %cst_14 = arith.constant 0.000000e+00 : f32
    %20 = vector.broadcast %cst_14 : f32 to vector<2x1x8x128xf32>
    %21 = vector.extract_strided_slice %19 {offsets = [0, 0, 0, 0], sizes = [2, 7, 8, 128], strides = [1, 1, 1, 1]} : vector<2x8x8x128xf32> to vector<2x7x8x128xf32>
    %22 = tpu.concatenate %20, %21 in 1 : vector<2x1x8x128xf32>, vector<2x7x8x128xf32> -> vector<2x8x8x128xf32>
    %23 = vector.extract_strided_slice %15 {offsets = [0, 0, 0], sizes = [1, 1, 128], strides = [1, 1, 1]} : vector<3x3x128xf32> to vector<1x1x128xf32>
    %24 = vector.shape_cast %23 : vector<1x1x128xf32> to vector<128xf32>
    %25 = vector.shape_cast %24 : vector<128xf32> to vector<1x1x1x128xf32>
    %26 = vector.broadcast %25 : vector<1x1x1x128xf32> to vector<2x8x8x128xf32>
    %27 = arith.mulf %22, %26 : vector<2x8x8x128xf32>
    %28 = arith.addf %16, %27 : vector<2x8x8x128xf32>
    %29 = vector.extract_strided_slice %15 {offsets = [1, 0, 0], sizes = [1, 1, 128], strides = [1, 1, 1]} : vector<3x3x128xf32> to vector<1x1x128xf32>
    %30 = vector.shape_cast %29 : vector<1x1x128xf32> to vector<128xf32>
    %31 = vector.shape_cast %30 : vector<128xf32> to vector<1x1x1x128xf32>
    %32 = vector.broadcast %31 : vector<1x1x1x128xf32> to vector<2x8x8x128xf32>
    %33 = arith.mulf %19, %32 : vector<2x8x8x128xf32>
    %34 = arith.addf %28, %33 : vector<2x8x8x128xf32>
    %cst_15 = arith.constant 0.000000e+00 : f32
    %35 = vector.broadcast %cst_15 : f32 to vector<2x1x8x128xf32>
    %36 = vector.extract_strided_slice %19 {offsets = [0, 1, 0, 0], sizes = [2, 7, 8, 128], strides = [1, 1, 1, 1]} : vector<2x8x8x128xf32> to vector<2x7x8x128xf32>
    %37 = tpu.concatenate %36, %35 in 1 : vector<2x7x8x128xf32>, vector<2x1x8x128xf32> -> vector<2x8x8x128xf32>
    %38 = vector.extract_strided_slice %15 {offsets = [2, 0, 0], sizes = [1, 1, 128], strides = [1, 1, 1]} : vector<3x3x128xf32> to vector<1x1x128xf32>
    %39 = vector.shape_cast %38 : vector<1x1x128xf32> to vector<128xf32>
    %40 = vector.shape_cast %39 : vector<128xf32> to vector<1x1x1x128xf32>
    %41 = vector.broadcast %40 : vector<1x1x1x128xf32> to vector<2x8x8x128xf32>
    %42 = arith.mulf %37, %41 : vector<2x8x8x128xf32>
    %43 = arith.addf %34, %42 : vector<2x8x8x128xf32>
    %cst_16 = arith.constant 0.000000e+00 : f32
    %44 = vector.broadcast %cst_16 : f32 to vector<2x1x8x128xf32>
    %45 = vector.extract_strided_slice %14 {offsets = [0, 0, 0, 0], sizes = [2, 7, 8, 128], strides = [1, 1, 1, 1]} : vector<2x8x8x128xf32> to vector<2x7x8x128xf32>
    %46 = tpu.concatenate %44, %45 in 1 : vector<2x1x8x128xf32>, vector<2x7x8x128xf32> -> vector<2x8x8x128xf32>
    %47 = vector.extract_strided_slice %15 {offsets = [0, 1, 0], sizes = [1, 1, 128], strides = [1, 1, 1]} : vector<3x3x128xf32> to vector<1x1x128xf32>
    %48 = vector.shape_cast %47 : vector<1x1x128xf32> to vector<128xf32>
    %49 = vector.shape_cast %48 : vector<128xf32> to vector<1x1x1x128xf32>
    %50 = vector.broadcast %49 : vector<1x1x1x128xf32> to vector<2x8x8x128xf32>
    %51 = arith.mulf %46, %50 : vector<2x8x8x128xf32>
    %52 = arith.addf %43, %51 : vector<2x8x8x128xf32>
    %53 = vector.extract_strided_slice %15 {offsets = [1, 1, 0], sizes = [1, 1, 128], strides = [1, 1, 1]} : vector<3x3x128xf32> to vector<1x1x128xf32>
    %54 = vector.shape_cast %53 : vector<1x1x128xf32> to vector<128xf32>
    %55 = vector.shape_cast %54 : vector<128xf32> to vector<1x1x1x128xf32>
    %56 = vector.broadcast %55 : vector<1x1x1x128xf32> to vector<2x8x8x128xf32>
    %57 = arith.mulf %14, %56 : vector<2x8x8x128xf32>
    %58 = arith.addf %52, %57 : vector<2x8x8x128xf32>
    %cst_17 = arith.constant 0.000000e+00 : f32
    %59 = vector.broadcast %cst_17 : f32 to vector<2x1x8x128xf32>
    %60 = vector.extract_strided_slice %14 {offsets = [0, 1, 0, 0], sizes = [2, 7, 8, 128], strides = [1, 1, 1, 1]} : vector<2x8x8x128xf32> to vector<2x7x8x128xf32>
    %61 = tpu.concatenate %60, %59 in 1 : vector<2x7x8x128xf32>, vector<2x1x8x128xf32> -> vector<2x8x8x128xf32>
    %62 = vector.extract_strided_slice %15 {offsets = [2, 1, 0], sizes = [1, 1, 128], strides = [1, 1, 1]} : vector<3x3x128xf32> to vector<1x1x128xf32>
    %63 = vector.shape_cast %62 : vector<1x1x128xf32> to vector<128xf32>
    %64 = vector.shape_cast %63 : vector<128xf32> to vector<1x1x1x128xf32>
    %65 = vector.broadcast %64 : vector<1x1x1x128xf32> to vector<2x8x8x128xf32>
    %66 = arith.mulf %61, %65 : vector<2x8x8x128xf32>
    %67 = arith.addf %58, %66 : vector<2x8x8x128xf32>
    %cst_18 = arith.constant 0.000000e+00 : f32
    %68 = vector.broadcast %cst_18 : f32 to vector<2x8x1x128xf32>
    %69 = vector.extract_strided_slice %14 {offsets = [0, 0, 1, 0], sizes = [2, 8, 7, 128], strides = [1, 1, 1, 1]} : vector<2x8x8x128xf32> to vector<2x8x7x128xf32>
    %70 = tpu.concatenate %69, %68 in 2 : vector<2x8x7x128xf32>, vector<2x8x1x128xf32> -> vector<2x8x8x128xf32>
    %cst_19 = arith.constant 0.000000e+00 : f32
    %71 = vector.broadcast %cst_19 : f32 to vector<2x1x8x128xf32>
    %72 = vector.extract_strided_slice %70 {offsets = [0, 0, 0, 0], sizes = [2, 7, 8, 128], strides = [1, 1, 1, 1]} : vector<2x8x8x128xf32> to vector<2x7x8x128xf32>
    %73 = tpu.concatenate %71, %72 in 1 : vector<2x1x8x128xf32>, vector<2x7x8x128xf32> -> vector<2x8x8x128xf32>
    %74 = vector.extract_strided_slice %15 {offsets = [0, 2, 0], sizes = [1, 1, 128], strides = [1, 1, 1]} : vector<3x3x128xf32> to vector<1x1x128xf32>
    %75 = vector.shape_cast %74 : vector<1x1x128xf32> to vector<128xf32>
    %76 = vector.shape_cast %75 : vector<128xf32> to vector<1x1x1x128xf32>
    %77 = vector.broadcast %76 : vector<1x1x1x128xf32> to vector<2x8x8x128xf32>
    %78 = arith.mulf %73, %77 : vector<2x8x8x128xf32>
    %79 = arith.addf %67, %78 : vector<2x8x8x128xf32>
    %80 = vector.extract_strided_slice %15 {offsets = [1, 2, 0], sizes = [1, 1, 128], strides = [1, 1, 1]} : vector<3x3x128xf32> to vector<1x1x128xf32>
    %81 = vector.shape_cast %80 : vector<1x1x128xf32> to vector<128xf32>
    %82 = vector.shape_cast %81 : vector<128xf32> to vector<1x1x1x128xf32>
    %83 = vector.broadcast %82 : vector<1x1x1x128xf32> to vector<2x8x8x128xf32>
    %84 = arith.mulf %70, %83 : vector<2x8x8x128xf32>
    %85 = arith.addf %79, %84 : vector<2x8x8x128xf32>
    %cst_20 = arith.constant 0.000000e+00 : f32
    %86 = vector.broadcast %cst_20 : f32 to vector<2x1x8x128xf32>
    %87 = vector.extract_strided_slice %70 {offsets = [0, 1, 0, 0], sizes = [2, 7, 8, 128], strides = [1, 1, 1, 1]} : vector<2x8x8x128xf32> to vector<2x7x8x128xf32>
    %88 = tpu.concatenate %87, %86 in 1 : vector<2x7x8x128xf32>, vector<2x1x8x128xf32> -> vector<2x8x8x128xf32>
    %89 = vector.extract_strided_slice %15 {offsets = [2, 2, 0], sizes = [1, 1, 128], strides = [1, 1, 1]} : vector<3x3x128xf32> to vector<1x1x128xf32>
    %90 = vector.shape_cast %89 : vector<1x1x128xf32> to vector<128xf32>
    %91 = vector.shape_cast %90 : vector<128xf32> to vector<1x1x1x128xf32>
    %92 = vector.broadcast %91 : vector<1x1x1x128xf32> to vector<2x8x8x128xf32>
    %93 = arith.mulf %88, %92 : vector<2x8x8x128xf32>
    %94 = arith.addf %85, %93 : vector<2x8x8x128xf32>
    %c0_21 = arith.constant 0 : index
    %c0_22 = arith.constant 0 : index
    %95 = vector.load %arg5[%c0_21, %c0_22] : memref<1x128xf32, #tpu.memory_space<vmem>>, vector<1x128xf32>
    %96 = vector.shape_cast %95 : vector<1x128xf32> to vector<1x1x1x128xf32>
    %97 = vector.broadcast %96 : vector<1x1x1x128xf32> to vector<2x8x8x128xf32>
    %98 = arith.mulf %94, %97 : vector<2x8x8x128xf32>
    %c0_23 = arith.constant 0 : index
    %c0_24 = arith.constant 0 : index
    %99 = vector.load %arg6[%c0_23, %c0_24] : memref<1x128xf32, #tpu.memory_space<vmem>>, vector<1x128xf32>
    %100 = vector.shape_cast %99 : vector<1x128xf32> to vector<1x1x1x128xf32>
    %101 = vector.broadcast %100 : vector<1x1x1x128xf32> to vector<2x8x8x128xf32>
    %102 = arith.addf %98, %101 : vector<2x8x8x128xf32>
    %cst_25 = arith.constant 0.000000e+00 : f32
    %103 = vector.broadcast %cst_25 : f32 to vector<2x8x8x128xf32>
    %104 = arith.subf %103, %102 : vector<2x8x8x128xf32>
    %105 = math.exp %104 : vector<2x8x8x128xf32>
    %cst_26 = arith.constant 1.000000e+00 : f32
    %106 = vector.broadcast %cst_26 : f32 to vector<2x8x8x128xf32>
    %107 = arith.addf %106, %105 : vector<2x8x8x128xf32>
    %108 = tpu.reciprocal %107 {approx = true} : vector<2x8x8x128xf32> -> vector<2x8x8x128xf32>
    %109 = arith.mulf %102, %108 : vector<2x8x8x128xf32>
    %cst_27 = arith.constant dense<0.000000e+00> : vector<2x128xf32>
    %110 = vector.multi_reduction <add>, %109, %cst_27 [1, 2] : vector<2x8x8x128xf32> to vector<2x128xf32>
    %cst_28 = arith.constant 6.400000e+01 : f32
    %111 = vector.broadcast %cst_28 : f32 to vector<2x128xf32>
    %112 = arith.divf %110, %111 : vector<2x128xf32>
    %113 = arith.truncf %112 : vector<2x128xf32> to vector<2x128xbf16>
    %c0_29 = arith.constant 0 : index
    %c0_30 = arith.constant 0 : index
    %114 = vector.load %arg7[%c0_29, %c0_30] : memref<128x128xbf16, #tpu.memory_space<vmem>>, vector<128x128xbf16>
    %cst_31 = arith.constant dense<0.000000e+00> : vector<2x128xf32>
    %115 = tpu.matmul %113, %114, %cst_31 {dimension_numbers = #tpu.dot_dimension_numbers<[1], [0], [0], [1], [0, 0, 1, 1], [], []>} : vector<2x128xbf16>, vector<128x128xbf16>, vector<2x128xf32> -> vector<2x128xf32>
    %c0_32 = arith.constant 0 : index
    %c0_33 = arith.constant 0 : index
    %116 = vector.load %arg8[%c0_32, %c0_33] : memref<1x128xf32, #tpu.memory_space<vmem>>, vector<1x128xf32>
    %117 = vector.broadcast %116 : vector<1x128xf32> to vector<2x128xf32>
    %118 = arith.addf %115, %117 : vector<2x128xf32>
    %cst_34 = arith.constant 0.000000e+00 : f32
    %119 = vector.broadcast %cst_34 : f32 to vector<2x128xf32>
    %120 = arith.subf %119, %118 : vector<2x128xf32>
    %121 = math.exp %120 : vector<2x128xf32>
    %cst_35 = arith.constant 1.000000e+00 : f32
    %122 = vector.broadcast %cst_35 : f32 to vector<2x128xf32>
    %123 = arith.addf %122, %121 : vector<2x128xf32>
    %124 = tpu.reciprocal %123 {approx = true} : vector<2x128xf32> -> vector<2x128xf32>
    %125 = arith.mulf %118, %124 : vector<2x128xf32>
    %126 = arith.truncf %125 : vector<2x128xf32> to vector<2x128xbf16>
    %c0_36 = arith.constant 0 : index
    %c0_37 = arith.constant 0 : index
    %127 = vector.load %arg9[%c0_36, %c0_37] : memref<128x128xbf16, #tpu.memory_space<vmem>>, vector<128x128xbf16>
    %cst_38 = arith.constant dense<0.000000e+00> : vector<2x128xf32>
    %128 = tpu.matmul %126, %127, %cst_38 {dimension_numbers = #tpu.dot_dimension_numbers<[1], [0], [0], [1], [0, 0, 1, 1], [], []>} : vector<2x128xbf16>, vector<128x128xbf16>, vector<2x128xf32> -> vector<2x128xf32>
    %c0_39 = arith.constant 0 : index
    %c0_40 = arith.constant 0 : index
    %129 = vector.load %arg10[%c0_39, %c0_40] : memref<1x128xf32, #tpu.memory_space<vmem>>, vector<1x128xf32>
    %130 = vector.broadcast %129 : vector<1x128xf32> to vector<2x128xf32>
    %131 = arith.addf %128, %130 : vector<2x128xf32>
    %cst_41 = arith.constant 0.000000e+00 : f32
    %132 = vector.broadcast %cst_41 : f32 to vector<2x128xf32>
    %133 = arith.subf %132, %131 : vector<2x128xf32>
    %134 = math.exp %133 : vector<2x128xf32>
    %cst_42 = arith.constant 1.000000e+00 : f32
    %135 = vector.broadcast %cst_42 : f32 to vector<2x128xf32>
    %136 = arith.addf %135, %134 : vector<2x128xf32>
    %137 = tpu.reciprocal %136 {approx = true} : vector<2x128xf32> -> vector<2x128xf32>
    %138 = vector.shape_cast %137 : vector<2x128xf32> to vector<2x1x1x128xf32>
    %139 = vector.broadcast %138 : vector<2x1x1x128xf32> to vector<2x8x8x128xf32>
    %140 = arith.mulf %109, %139 : vector<2x8x8x128xf32>
    %141 = vector.shape_cast %140 : vector<2x8x8x128xf32> to vector<128x128xf32>
    %142 = arith.truncf %141 : vector<128x128xf32> to vector<128x128xbf16>
    %c0_43 = arith.constant 0 : index
    %c0_44 = arith.constant 0 : index
    %143 = vector.load %arg11[%c0_43, %c0_44] : memref<128x128xbf16, #tpu.memory_space<vmem>>, vector<128x128xbf16>
    %cst_45 = arith.constant dense<0.000000e+00> : vector<128x128xf32>
    %144 = tpu.matmul %142, %143, %cst_45 {dimension_numbers = #tpu.dot_dimension_numbers<[1], [0], [0], [1], [0, 0, 1, 1], [], []>} : vector<128x128xbf16>, vector<128x128xbf16>, vector<128x128xf32> -> vector<128x128xf32>
    %c0_46 = arith.constant 0 : index
    %c0_47 = arith.constant 0 : index
    %145 = vector.load %arg12[%c0_46, %c0_47] : memref<1x128xf32, #tpu.memory_space<vmem>>, vector<1x128xf32>
    %146 = vector.broadcast %145 : vector<1x128xf32> to vector<128x128xf32>
    %147 = arith.addf %144, %146 : vector<128x128xf32>
    %148 = vector.shape_cast %147 : vector<128x128xf32> to vector<2x8x8x128xf32>
    %149 = arith.truncf %148 : vector<2x8x8x128xf32> to vector<2x8x8x128xbf16>
    %c0_48 = arith.constant 0 : index
    %c0_49 = arith.constant 0 : index
    %c0_50 = arith.constant 0 : index
    %c0_51 = arith.constant 0 : index
    %150 = vector.load %arg13[%c0_48, %c0_49, %c0_50, %c0_51] : memref<2x8x8x128xbf16, #tpu.memory_space<vmem>>, vector<2x8x8x128xbf16>
    tpu.vector_store %arg13[%c0_48, %c0_49, %c0_50, %c0_51], %149 {strides = array<i32>} : memref<2x8x8x128xbf16, #tpu.memory_space<vmem>>, vector<2x8x8x128xbf16>,
    return
  }
  func.func @transform_0(%arg0: i32) -> (i32, i32, i32, i32) {
    %c0_i32 = arith.constant 0 : i32
    %c0_i32_0 = arith.constant 0 : i32
    %c0_i32_1 = arith.constant 0 : i32
    %c0_i32_2 = arith.constant 0 : i32
    return %arg0, %c0_i32, %c0_i32_0, %c0_i32_1 : i32, i32, i32, i32
  }
  func.func @transform_1(%arg0: i32) -> (i32, i32) {
    %c0_i32 = arith.constant 0 : i32
    %c0_i32_0 = arith.constant 0 : i32
    %c0_i32_1 = arith.constant 0 : i32
    return %c0_i32, %c0_i32_0 : i32, i32
  }
  func.func @transform_2(%arg0: i32) -> (i32, i32) {
    %c0_i32 = arith.constant 0 : i32
    %c0_i32_0 = arith.constant 0 : i32
    %c0_i32_1 = arith.constant 0 : i32
    return %c0_i32, %c0_i32_0 : i32, i32
  }
  func.func @transform_3(%arg0: i32) -> (i32, i32, i32) {
    %c0_i32 = arith.constant 0 : i32
    %c0_i32_0 = arith.constant 0 : i32
    %c0_i32_1 = arith.constant 0 : i32
    %c0_i32_2 = arith.constant 0 : i32
    return %c0_i32, %c0_i32_0, %c0_i32_1 : i32, i32, i32
  }
  func.func @transform_4(%arg0: i32) -> (i32, i32) {
    %c0_i32 = arith.constant 0 : i32
    %c0_i32_0 = arith.constant 0 : i32
    %c0_i32_1 = arith.constant 0 : i32
    return %c0_i32, %c0_i32_0 : i32, i32
  }
  func.func @transform_5(%arg0: i32) -> (i32, i32) {
    %c0_i32 = arith.constant 0 : i32
    %c0_i32_0 = arith.constant 0 : i32
    %c0_i32_1 = arith.constant 0 : i32
    return %c0_i32, %c0_i32_0 : i32, i32
  }
  func.func @transform_6(%arg0: i32) -> (i32, i32) {
    %c0_i32 = arith.constant 0 : i32
    %c0_i32_0 = arith.constant 0 : i32
    %c0_i32_1 = arith.constant 0 : i32
    return %c0_i32, %c0_i32_0 : i32, i32
  }
  func.func @transform_7(%arg0: i32) -> (i32, i32) {
    %c0_i32 = arith.constant 0 : i32
    %c0_i32_0 = arith.constant 0 : i32
    %c0_i32_1 = arith.constant 0 : i32
    return %c0_i32, %c0_i32_0 : i32, i32
  }
  func.func @transform_8(%arg0: i32) -> (i32, i32) {
    %c0_i32 = arith.constant 0 : i32
    %c0_i32_0 = arith.constant 0 : i32
    %c0_i32_1 = arith.constant 0 : i32
    return %c0_i32, %c0_i32_0 : i32, i32
  }
  func.func @transform_9(%arg0: i32) -> (i32, i32) {
    %c0_i32 = arith.constant 0 : i32
    %c0_i32_0 = arith.constant 0 : i32
    %c0_i32_1 = arith.constant 0 : i32
    return %c0_i32, %c0_i32_0 : i32, i32
  }
  func.func @transform_10(%arg0: i32) -> (i32, i32) {
    %c0_i32 = arith.constant 0 : i32
    %c0_i32_0 = arith.constant 0 : i32
    %c0_i32_1 = arith.constant 0 : i32
    return %c0_i32, %c0_i32_0 : i32, i32
  }
  func.func @transform_11(%arg0: i32) -> (i32, i32) {
    %c0_i32 = arith.constant 0 : i32
    %c0_i32_0 = arith.constant 0 : i32
    %c0_i32_1 = arith.constant 0 : i32
    return %c0_i32, %c0_i32_0 : i32, i32
  }
  func.func @transform_12(%arg0: i32) -> (i32, i32, i32, i32) {
    %c0_i32 = arith.constant 0 : i32
    %c0_i32_0 = arith.constant 0 : i32
    %c0_i32_1 = arith.constant 0 : i32
    %c0_i32_2 = arith.constant 0 : i32
    return %arg0, %c0_i32, %c0_i32_0, %c0_i32_1 : i32, i32, i32, i32
  }
}

module attributes {stable_mosaic.version = 11 : i64} {
  func.func @_mbconv_kernel(%arg0: i32, %arg1: memref<2x8x8x128xbf16, #tpu.memory_space<vmem>>, %arg2: memref<3x3x128xf32, #tpu.memory_space<vmem>>, %arg3: memref<1x128xf32, #tpu.memory_space<vmem>>, %arg4: memref<1x128xf32, #tpu.memory_space<vmem>>, %arg5: memref<128x128xbf16, #tpu.memory_space<vmem>>, %arg6: memref<1x128xf32, #tpu.memory_space<vmem>>, %arg7: memref<128x128xbf16, #tpu.memory_space<vmem>>, %arg8: memref<1x128xf32, #tpu.memory_space<vmem>>, %arg9: memref<128x128xbf16, #tpu.memory_space<vmem>>, %arg10: memref<1x128xf32, #tpu.memory_space<vmem>>, %arg11: memref<2x8x8x128xbf16, #tpu.memory_space<vmem>>) attributes {dimension_semantics = [#tpu.dimension_semantics<parallel>], iteration_bounds = array<i64: 1>, scalar_prefetch = 0 : i64, scratch_operands = 0 : i64, tpu.core_type = #tpu.core_type<tc>, window_params = [{transform_indices = @transform_0, window_bounds = array<i64: 2, 8, 8, 128>}, {pipeline_mode = #tpu.pipeline_mode<synchronous>, transform_indices = @transform_1, window_bounds = array<i64: 3, 3, 128>}, {pipeline_mode = #tpu.pipeline_mode<synchronous>, transform_indices = @transform_2, window_bounds = array<i64: 1, 128>}, {pipeline_mode = #tpu.pipeline_mode<synchronous>, transform_indices = @transform_3, window_bounds = array<i64: 1, 128>}, {pipeline_mode = #tpu.pipeline_mode<synchronous>, transform_indices = @transform_4, window_bounds = array<i64: 128, 128>}, {pipeline_mode = #tpu.pipeline_mode<synchronous>, transform_indices = @transform_5, window_bounds = array<i64: 1, 128>}, {pipeline_mode = #tpu.pipeline_mode<synchronous>, transform_indices = @transform_6, window_bounds = array<i64: 128, 128>}, {pipeline_mode = #tpu.pipeline_mode<synchronous>, transform_indices = @transform_7, window_bounds = array<i64: 1, 128>}, {pipeline_mode = #tpu.pipeline_mode<synchronous>, transform_indices = @transform_8, window_bounds = array<i64: 128, 128>}, {pipeline_mode = #tpu.pipeline_mode<synchronous>, transform_indices = @transform_9, window_bounds = array<i64: 1, 128>}, {transform_indices = @transform_10, window_bounds = array<i64: 2, 8, 8, 128>}]} {
    %c0 = arith.constant 0 : index
    %c0_0 = arith.constant 0 : index
    %c0_1 = arith.constant 0 : index
    %c0_2 = arith.constant 0 : index
    %0 = vector.load %arg1[%c0, %c0_0, %c0_1, %c0_2] : memref<2x8x8x128xbf16, #tpu.memory_space<vmem>>, vector<2x8x8x128xbf16>
    %1 = arith.extf %0 : vector<2x8x8x128xbf16> to vector<2x8x8x128xf32>
    %c0_3 = arith.constant 0 : index
    %c0_4 = arith.constant 0 : index
    %c0_5 = arith.constant 0 : index
    %2 = vector.load %arg2[%c0_3, %c0_4, %c0_5] : memref<3x3x128xf32, #tpu.memory_space<vmem>>, vector<3x3x128xf32>
    %cst = arith.constant 0.000000e+00 : f32
    %3 = vector.broadcast %cst : f32 to vector<2x8x8x128xf32>
    %cst_6 = arith.constant 0.000000e+00 : f32
    %4 = vector.broadcast %cst_6 : f32 to vector<2x8x1x128xf32>
    %5 = vector.extract_strided_slice %1 {offsets = [0, 0, 0, 0], sizes = [2, 8, 7, 128], strides = [1, 1, 1, 1]} : vector<2x8x8x128xf32> to vector<2x8x7x128xf32>
    %6 = tpu.concatenate %4, %5 in 2 : vector<2x8x1x128xf32>, vector<2x8x7x128xf32> -> vector<2x8x8x128xf32>
    %cst_7 = arith.constant 0.000000e+00 : f32
    %7 = vector.broadcast %cst_7 : f32 to vector<2x1x8x128xf32>
    %8 = vector.extract_strided_slice %6 {offsets = [0, 0, 0, 0], sizes = [2, 7, 8, 128], strides = [1, 1, 1, 1]} : vector<2x8x8x128xf32> to vector<2x7x8x128xf32>
    %9 = tpu.concatenate %7, %8 in 1 : vector<2x1x8x128xf32>, vector<2x7x8x128xf32> -> vector<2x8x8x128xf32>
    %10 = vector.extract_strided_slice %2 {offsets = [0, 0, 0], sizes = [1, 1, 128], strides = [1, 1, 1]} : vector<3x3x128xf32> to vector<1x1x128xf32>
    %11 = vector.shape_cast %10 : vector<1x1x128xf32> to vector<128xf32>
    %12 = vector.shape_cast %11 : vector<128xf32> to vector<1x1x1x128xf32>
    %13 = vector.broadcast %12 : vector<1x1x1x128xf32> to vector<2x8x8x128xf32>
    %14 = arith.mulf %9, %13 : vector<2x8x8x128xf32>
    %15 = arith.addf %3, %14 : vector<2x8x8x128xf32>
    %16 = vector.extract_strided_slice %2 {offsets = [1, 0, 0], sizes = [1, 1, 128], strides = [1, 1, 1]} : vector<3x3x128xf32> to vector<1x1x128xf32>
    %17 = vector.shape_cast %16 : vector<1x1x128xf32> to vector<128xf32>
    %18 = vector.shape_cast %17 : vector<128xf32> to vector<1x1x1x128xf32>
    %19 = vector.broadcast %18 : vector<1x1x1x128xf32> to vector<2x8x8x128xf32>
    %20 = arith.mulf %6, %19 : vector<2x8x8x128xf32>
    %21 = arith.addf %15, %20 : vector<2x8x8x128xf32>
    %cst_8 = arith.constant 0.000000e+00 : f32
    %22 = vector.broadcast %cst_8 : f32 to vector<2x1x8x128xf32>
    %23 = vector.extract_strided_slice %6 {offsets = [0, 1, 0, 0], sizes = [2, 7, 8, 128], strides = [1, 1, 1, 1]} : vector<2x8x8x128xf32> to vector<2x7x8x128xf32>
    %24 = tpu.concatenate %23, %22 in 1 : vector<2x7x8x128xf32>, vector<2x1x8x128xf32> -> vector<2x8x8x128xf32>
    %25 = vector.extract_strided_slice %2 {offsets = [2, 0, 0], sizes = [1, 1, 128], strides = [1, 1, 1]} : vector<3x3x128xf32> to vector<1x1x128xf32>
    %26 = vector.shape_cast %25 : vector<1x1x128xf32> to vector<128xf32>
    %27 = vector.shape_cast %26 : vector<128xf32> to vector<1x1x1x128xf32>
    %28 = vector.broadcast %27 : vector<1x1x1x128xf32> to vector<2x8x8x128xf32>
    %29 = arith.mulf %24, %28 : vector<2x8x8x128xf32>
    %30 = arith.addf %21, %29 : vector<2x8x8x128xf32>
    %cst_9 = arith.constant 0.000000e+00 : f32
    %31 = vector.broadcast %cst_9 : f32 to vector<2x1x8x128xf32>
    %32 = vector.extract_strided_slice %1 {offsets = [0, 0, 0, 0], sizes = [2, 7, 8, 128], strides = [1, 1, 1, 1]} : vector<2x8x8x128xf32> to vector<2x7x8x128xf32>
    %33 = tpu.concatenate %31, %32 in 1 : vector<2x1x8x128xf32>, vector<2x7x8x128xf32> -> vector<2x8x8x128xf32>
    %34 = vector.extract_strided_slice %2 {offsets = [0, 1, 0], sizes = [1, 1, 128], strides = [1, 1, 1]} : vector<3x3x128xf32> to vector<1x1x128xf32>
    %35 = vector.shape_cast %34 : vector<1x1x128xf32> to vector<128xf32>
    %36 = vector.shape_cast %35 : vector<128xf32> to vector<1x1x1x128xf32>
    %37 = vector.broadcast %36 : vector<1x1x1x128xf32> to vector<2x8x8x128xf32>
    %38 = arith.mulf %33, %37 : vector<2x8x8x128xf32>
    %39 = arith.addf %30, %38 : vector<2x8x8x128xf32>
    %40 = vector.extract_strided_slice %2 {offsets = [1, 1, 0], sizes = [1, 1, 128], strides = [1, 1, 1]} : vector<3x3x128xf32> to vector<1x1x128xf32>
    %41 = vector.shape_cast %40 : vector<1x1x128xf32> to vector<128xf32>
    %42 = vector.shape_cast %41 : vector<128xf32> to vector<1x1x1x128xf32>
    %43 = vector.broadcast %42 : vector<1x1x1x128xf32> to vector<2x8x8x128xf32>
    %44 = arith.mulf %1, %43 : vector<2x8x8x128xf32>
    %45 = arith.addf %39, %44 : vector<2x8x8x128xf32>
    %cst_10 = arith.constant 0.000000e+00 : f32
    %46 = vector.broadcast %cst_10 : f32 to vector<2x1x8x128xf32>
    %47 = vector.extract_strided_slice %1 {offsets = [0, 1, 0, 0], sizes = [2, 7, 8, 128], strides = [1, 1, 1, 1]} : vector<2x8x8x128xf32> to vector<2x7x8x128xf32>
    %48 = tpu.concatenate %47, %46 in 1 : vector<2x7x8x128xf32>, vector<2x1x8x128xf32> -> vector<2x8x8x128xf32>
    %49 = vector.extract_strided_slice %2 {offsets = [2, 1, 0], sizes = [1, 1, 128], strides = [1, 1, 1]} : vector<3x3x128xf32> to vector<1x1x128xf32>
    %50 = vector.shape_cast %49 : vector<1x1x128xf32> to vector<128xf32>
    %51 = vector.shape_cast %50 : vector<128xf32> to vector<1x1x1x128xf32>
    %52 = vector.broadcast %51 : vector<1x1x1x128xf32> to vector<2x8x8x128xf32>
    %53 = arith.mulf %48, %52 : vector<2x8x8x128xf32>
    %54 = arith.addf %45, %53 : vector<2x8x8x128xf32>
    %cst_11 = arith.constant 0.000000e+00 : f32
    %55 = vector.broadcast %cst_11 : f32 to vector<2x8x1x128xf32>
    %56 = vector.extract_strided_slice %1 {offsets = [0, 0, 1, 0], sizes = [2, 8, 7, 128], strides = [1, 1, 1, 1]} : vector<2x8x8x128xf32> to vector<2x8x7x128xf32>
    %57 = tpu.concatenate %56, %55 in 2 : vector<2x8x7x128xf32>, vector<2x8x1x128xf32> -> vector<2x8x8x128xf32>
    %cst_12 = arith.constant 0.000000e+00 : f32
    %58 = vector.broadcast %cst_12 : f32 to vector<2x1x8x128xf32>
    %59 = vector.extract_strided_slice %57 {offsets = [0, 0, 0, 0], sizes = [2, 7, 8, 128], strides = [1, 1, 1, 1]} : vector<2x8x8x128xf32> to vector<2x7x8x128xf32>
    %60 = tpu.concatenate %58, %59 in 1 : vector<2x1x8x128xf32>, vector<2x7x8x128xf32> -> vector<2x8x8x128xf32>
    %61 = vector.extract_strided_slice %2 {offsets = [0, 2, 0], sizes = [1, 1, 128], strides = [1, 1, 1]} : vector<3x3x128xf32> to vector<1x1x128xf32>
    %62 = vector.shape_cast %61 : vector<1x1x128xf32> to vector<128xf32>
    %63 = vector.shape_cast %62 : vector<128xf32> to vector<1x1x1x128xf32>
    %64 = vector.broadcast %63 : vector<1x1x1x128xf32> to vector<2x8x8x128xf32>
    %65 = arith.mulf %60, %64 : vector<2x8x8x128xf32>
    %66 = arith.addf %54, %65 : vector<2x8x8x128xf32>
    %67 = vector.extract_strided_slice %2 {offsets = [1, 2, 0], sizes = [1, 1, 128], strides = [1, 1, 1]} : vector<3x3x128xf32> to vector<1x1x128xf32>
    %68 = vector.shape_cast %67 : vector<1x1x128xf32> to vector<128xf32>
    %69 = vector.shape_cast %68 : vector<128xf32> to vector<1x1x1x128xf32>
    %70 = vector.broadcast %69 : vector<1x1x1x128xf32> to vector<2x8x8x128xf32>
    %71 = arith.mulf %57, %70 : vector<2x8x8x128xf32>
    %72 = arith.addf %66, %71 : vector<2x8x8x128xf32>
    %cst_13 = arith.constant 0.000000e+00 : f32
    %73 = vector.broadcast %cst_13 : f32 to vector<2x1x8x128xf32>
    %74 = vector.extract_strided_slice %57 {offsets = [0, 1, 0, 0], sizes = [2, 7, 8, 128], strides = [1, 1, 1, 1]} : vector<2x8x8x128xf32> to vector<2x7x8x128xf32>
    %75 = tpu.concatenate %74, %73 in 1 : vector<2x7x8x128xf32>, vector<2x1x8x128xf32> -> vector<2x8x8x128xf32>
    %76 = vector.extract_strided_slice %2 {offsets = [2, 2, 0], sizes = [1, 1, 128], strides = [1, 1, 1]} : vector<3x3x128xf32> to vector<1x1x128xf32>
    %77 = vector.shape_cast %76 : vector<1x1x128xf32> to vector<128xf32>
    %78 = vector.shape_cast %77 : vector<128xf32> to vector<1x1x1x128xf32>
    %79 = vector.broadcast %78 : vector<1x1x1x128xf32> to vector<2x8x8x128xf32>
    %80 = arith.mulf %75, %79 : vector<2x8x8x128xf32>
    %81 = arith.addf %72, %80 : vector<2x8x8x128xf32>
    %c0_14 = arith.constant 0 : index
    %c0_15 = arith.constant 0 : index
    %82 = vector.load %arg3[%c0_14, %c0_15] : memref<1x128xf32, #tpu.memory_space<vmem>>, vector<1x128xf32>
    %83 = vector.shape_cast %82 : vector<1x128xf32> to vector<1x1x1x128xf32>
    %84 = vector.broadcast %83 : vector<1x1x1x128xf32> to vector<2x8x8x128xf32>
    %85 = arith.mulf %81, %84 : vector<2x8x8x128xf32>
    %c0_16 = arith.constant 0 : index
    %c0_17 = arith.constant 0 : index
    %86 = vector.load %arg4[%c0_16, %c0_17] : memref<1x128xf32, #tpu.memory_space<vmem>>, vector<1x128xf32>
    %87 = vector.shape_cast %86 : vector<1x128xf32> to vector<1x1x1x128xf32>
    %88 = vector.broadcast %87 : vector<1x1x1x128xf32> to vector<2x8x8x128xf32>
    %89 = arith.addf %85, %88 : vector<2x8x8x128xf32>
    %cst_18 = arith.constant 0.000000e+00 : f32
    %90 = vector.broadcast %cst_18 : f32 to vector<2x8x8x128xf32>
    %91 = arith.subf %90, %89 : vector<2x8x8x128xf32>
    %92 = math.exp %91 : vector<2x8x8x128xf32>
    %cst_19 = arith.constant 1.000000e+00 : f32
    %93 = vector.broadcast %cst_19 : f32 to vector<2x8x8x128xf32>
    %94 = arith.addf %93, %92 : vector<2x8x8x128xf32>
    %95 = tpu.reciprocal %94 {approx = true} : vector<2x8x8x128xf32> -> vector<2x8x8x128xf32>
    %96 = arith.mulf %89, %95 : vector<2x8x8x128xf32>
    %cst_20 = arith.constant dense<0.000000e+00> : vector<2x128xf32>
    %97 = vector.multi_reduction <add>, %96, %cst_20 [1, 2] : vector<2x8x8x128xf32> to vector<2x128xf32>
    %cst_21 = arith.constant 6.400000e+01 : f32
    %98 = vector.broadcast %cst_21 : f32 to vector<2x128xf32>
    %99 = arith.divf %97, %98 : vector<2x128xf32>
    %100 = arith.truncf %99 : vector<2x128xf32> to vector<2x128xbf16>
    %c0_22 = arith.constant 0 : index
    %c0_23 = arith.constant 0 : index
    %101 = vector.load %arg5[%c0_22, %c0_23] : memref<128x128xbf16, #tpu.memory_space<vmem>>, vector<128x128xbf16>
    %cst_24 = arith.constant dense<0.000000e+00> : vector<2x128xf32>
    %102 = tpu.matmul %100, %101, %cst_24 {dimension_numbers = #tpu.dot_dimension_numbers<[1], [0], [0], [1], [0, 0, 1, 1], [], []>} : vector<2x128xbf16>, vector<128x128xbf16>, vector<2x128xf32> -> vector<2x128xf32>
    %c0_25 = arith.constant 0 : index
    %c0_26 = arith.constant 0 : index
    %103 = vector.load %arg6[%c0_25, %c0_26] : memref<1x128xf32, #tpu.memory_space<vmem>>, vector<1x128xf32>
    %104 = vector.broadcast %103 : vector<1x128xf32> to vector<2x128xf32>
    %105 = arith.addf %102, %104 : vector<2x128xf32>
    %cst_27 = arith.constant 0.000000e+00 : f32
    %106 = vector.broadcast %cst_27 : f32 to vector<2x128xf32>
    %107 = arith.subf %106, %105 : vector<2x128xf32>
    %108 = math.exp %107 : vector<2x128xf32>
    %cst_28 = arith.constant 1.000000e+00 : f32
    %109 = vector.broadcast %cst_28 : f32 to vector<2x128xf32>
    %110 = arith.addf %109, %108 : vector<2x128xf32>
    %111 = tpu.reciprocal %110 {approx = true} : vector<2x128xf32> -> vector<2x128xf32>
    %112 = arith.mulf %105, %111 : vector<2x128xf32>
    %113 = arith.truncf %112 : vector<2x128xf32> to vector<2x128xbf16>
    %c0_29 = arith.constant 0 : index
    %c0_30 = arith.constant 0 : index
    %114 = vector.load %arg7[%c0_29, %c0_30] : memref<128x128xbf16, #tpu.memory_space<vmem>>, vector<128x128xbf16>
    %cst_31 = arith.constant dense<0.000000e+00> : vector<2x128xf32>
    %115 = tpu.matmul %113, %114, %cst_31 {dimension_numbers = #tpu.dot_dimension_numbers<[1], [0], [0], [1], [0, 0, 1, 1], [], []>} : vector<2x128xbf16>, vector<128x128xbf16>, vector<2x128xf32> -> vector<2x128xf32>
    %c0_32 = arith.constant 0 : index
    %c0_33 = arith.constant 0 : index
    %116 = vector.load %arg8[%c0_32, %c0_33] : memref<1x128xf32, #tpu.memory_space<vmem>>, vector<1x128xf32>
    %117 = vector.broadcast %116 : vector<1x128xf32> to vector<2x128xf32>
    %118 = arith.addf %115, %117 : vector<2x128xf32>
    %cst_34 = arith.constant 0.000000e+00 : f32
    %119 = vector.broadcast %cst_34 : f32 to vector<2x128xf32>
    %120 = arith.subf %119, %118 : vector<2x128xf32>
    %121 = math.exp %120 : vector<2x128xf32>
    %cst_35 = arith.constant 1.000000e+00 : f32
    %122 = vector.broadcast %cst_35 : f32 to vector<2x128xf32>
    %123 = arith.addf %122, %121 : vector<2x128xf32>
    %124 = tpu.reciprocal %123 {approx = true} : vector<2x128xf32> -> vector<2x128xf32>
    %125 = vector.shape_cast %124 : vector<2x128xf32> to vector<2x1x1x128xf32>
    %126 = vector.broadcast %125 : vector<2x1x1x128xf32> to vector<2x8x8x128xf32>
    %127 = arith.mulf %96, %126 : vector<2x8x8x128xf32>
    %128 = vector.shape_cast %127 : vector<2x8x8x128xf32> to vector<128x128xf32>
    %129 = arith.truncf %128 : vector<128x128xf32> to vector<128x128xbf16>
    %c0_36 = arith.constant 0 : index
    %c0_37 = arith.constant 0 : index
    %130 = vector.load %arg9[%c0_36, %c0_37] : memref<128x128xbf16, #tpu.memory_space<vmem>>, vector<128x128xbf16>
    %cst_38 = arith.constant dense<0.000000e+00> : vector<128x128xf32>
    %131 = tpu.matmul %129, %130, %cst_38 {dimension_numbers = #tpu.dot_dimension_numbers<[1], [0], [0], [1], [0, 0, 1, 1], [], []>} : vector<128x128xbf16>, vector<128x128xbf16>, vector<128x128xf32> -> vector<128x128xf32>
    %c0_39 = arith.constant 0 : index
    %c0_40 = arith.constant 0 : index
    %132 = vector.load %arg10[%c0_39, %c0_40] : memref<1x128xf32, #tpu.memory_space<vmem>>, vector<1x128xf32>
    %133 = vector.broadcast %132 : vector<1x128xf32> to vector<128x128xf32>
    %134 = arith.addf %131, %133 : vector<128x128xf32>
    %135 = vector.shape_cast %134 : vector<128x128xf32> to vector<2x8x8x128xf32>
    %136 = arith.extf %0 : vector<2x8x8x128xbf16> to vector<2x8x8x128xf32>
    %137 = arith.addf %135, %136 : vector<2x8x8x128xf32>
    %138 = arith.truncf %137 : vector<2x8x8x128xf32> to vector<2x8x8x128xbf16>
    %c0_41 = arith.constant 0 : index
    %c0_42 = arith.constant 0 : index
    %c0_43 = arith.constant 0 : index
    %c0_44 = arith.constant 0 : index
    %139 = vector.load %arg11[%c0_41, %c0_42, %c0_43, %c0_44] : memref<2x8x8x128xbf16, #tpu.memory_space<vmem>>, vector<2x8x8x128xbf16>
    tpu.vector_store %arg11[%c0_41, %c0_42, %c0_43, %c0_44], %138 {strides = array<i32>} : memref<2x8x8x128xbf16, #tpu.memory_space<vmem>>, vector<2x8x8x128xbf16>,
    return
  }
  func.func @transform_0(%arg0: i32) -> (i32, i32, i32, i32) {
    %c0_i32 = arith.constant 0 : i32
    %c0_i32_0 = arith.constant 0 : i32
    %c0_i32_1 = arith.constant 0 : i32
    %c0_i32_2 = arith.constant 0 : i32
    return %arg0, %c0_i32, %c0_i32_0, %c0_i32_1 : i32, i32, i32, i32
  }
  func.func @transform_1(%arg0: i32) -> (i32, i32, i32) {
    %c0_i32 = arith.constant 0 : i32
    %c0_i32_0 = arith.constant 0 : i32
    %c0_i32_1 = arith.constant 0 : i32
    %c0_i32_2 = arith.constant 0 : i32
    return %c0_i32, %c0_i32_0, %c0_i32_1 : i32, i32, i32
  }
  func.func @transform_2(%arg0: i32) -> (i32, i32) {
    %c0_i32 = arith.constant 0 : i32
    %c0_i32_0 = arith.constant 0 : i32
    %c0_i32_1 = arith.constant 0 : i32
    return %c0_i32, %c0_i32_0 : i32, i32
  }
  func.func @transform_3(%arg0: i32) -> (i32, i32) {
    %c0_i32 = arith.constant 0 : i32
    %c0_i32_0 = arith.constant 0 : i32
    %c0_i32_1 = arith.constant 0 : i32
    return %c0_i32, %c0_i32_0 : i32, i32
  }
  func.func @transform_4(%arg0: i32) -> (i32, i32) {
    %c0_i32 = arith.constant 0 : i32
    %c0_i32_0 = arith.constant 0 : i32
    %c0_i32_1 = arith.constant 0 : i32
    return %c0_i32, %c0_i32_0 : i32, i32
  }
  func.func @transform_5(%arg0: i32) -> (i32, i32) {
    %c0_i32 = arith.constant 0 : i32
    %c0_i32_0 = arith.constant 0 : i32
    %c0_i32_1 = arith.constant 0 : i32
    return %c0_i32, %c0_i32_0 : i32, i32
  }
  func.func @transform_6(%arg0: i32) -> (i32, i32) {
    %c0_i32 = arith.constant 0 : i32
    %c0_i32_0 = arith.constant 0 : i32
    %c0_i32_1 = arith.constant 0 : i32
    return %c0_i32, %c0_i32_0 : i32, i32
  }
  func.func @transform_7(%arg0: i32) -> (i32, i32) {
    %c0_i32 = arith.constant 0 : i32
    %c0_i32_0 = arith.constant 0 : i32
    %c0_i32_1 = arith.constant 0 : i32
    return %c0_i32, %c0_i32_0 : i32, i32
  }
  func.func @transform_8(%arg0: i32) -> (i32, i32) {
    %c0_i32 = arith.constant 0 : i32
    %c0_i32_0 = arith.constant 0 : i32
    %c0_i32_1 = arith.constant 0 : i32
    return %c0_i32, %c0_i32_0 : i32, i32
  }
  func.func @transform_9(%arg0: i32) -> (i32, i32) {
    %c0_i32 = arith.constant 0 : i32
    %c0_i32_0 = arith.constant 0 : i32
    %c0_i32_1 = arith.constant 0 : i32
    return %c0_i32, %c0_i32_0 : i32, i32
  }
  func.func @transform_10(%arg0: i32) -> (i32, i32, i32, i32) {
    %c0_i32 = arith.constant 0 : i32
    %c0_i32_0 = arith.constant 0 : i32
    %c0_i32_1 = arith.constant 0 : i32
    %c0_i32_2 = arith.constant 0 : i32
    return %arg0, %c0_i32, %c0_i32_0, %c0_i32_1 : i32, i32, i32, i32
  }
}

module attributes {stable_mosaic.version = 11 : i64} {
  func.func @_head_kernel(%arg0: i32, %arg1: memref<1x8x8x128xbf16, #tpu.memory_space<vmem>>, %arg2: memref<128x128xbf16, #tpu.memory_space<vmem>>, %arg3: memref<1x128xf32, #tpu.memory_space<vmem>>, %arg4: memref<128x128xbf16, #tpu.memory_space<vmem>>, %arg5: memref<1x128xf32, #tpu.memory_space<vmem>>, %arg6: memref<128x128xbf16, #tpu.memory_space<vmem>>, %arg7: memref<1x128xf32, #tpu.memory_space<vmem>>, %arg8: memref<1x8x128xf32, #tpu.memory_space<vmem>>) attributes {dimension_semantics = [#tpu.dimension_semantics<parallel>], iteration_bounds = array<i64: 2>, scalar_prefetch = 0 : i64, scratch_operands = 0 : i64, tpu.core_type = #tpu.core_type<tc>, window_params = [{transform_indices = @transform_0, window_bounds = array<i64: 1, 8, 8, 128>}, {pipeline_mode = #tpu.pipeline_mode<synchronous>, transform_indices = @transform_1, window_bounds = array<i64: 128, 128>}, {pipeline_mode = #tpu.pipeline_mode<synchronous>, transform_indices = @transform_2, window_bounds = array<i64: 1, 128>}, {pipeline_mode = #tpu.pipeline_mode<synchronous>, transform_indices = @transform_3, window_bounds = array<i64: 128, 128>}, {pipeline_mode = #tpu.pipeline_mode<synchronous>, transform_indices = @transform_4, window_bounds = array<i64: 1, 128>}, {pipeline_mode = #tpu.pipeline_mode<synchronous>, transform_indices = @transform_5, window_bounds = array<i64: 128, 128>}, {pipeline_mode = #tpu.pipeline_mode<synchronous>, transform_indices = @transform_6, window_bounds = array<i64: 1, 128>}, {transform_indices = @transform_7, window_bounds = array<i64: 1, 8, 128>}]} {
    %c0 = arith.constant 0 : index
    %c0_0 = arith.constant 0 : index
    %c0_1 = arith.constant 0 : index
    %c0_2 = arith.constant 0 : index
    %0 = vector.load %arg1[%c0, %c0_0, %c0_1, %c0_2] : memref<1x8x8x128xbf16, #tpu.memory_space<vmem>>, vector<1x8x8x128xbf16>
    %1 = vector.shape_cast %0 : vector<1x8x8x128xbf16> to vector<8x8x128xbf16>
    %2 = vector.shape_cast %1 : vector<8x8x128xbf16> to vector<64x128xbf16>
    %c0_3 = arith.constant 0 : index
    %c0_4 = arith.constant 0 : index
    %3 = vector.load %arg2[%c0_3, %c0_4] : memref<128x128xbf16, #tpu.memory_space<vmem>>, vector<128x128xbf16>
    %cst = arith.constant dense<0.000000e+00> : vector<64x128xf32>
    %4 = tpu.matmul %2, %3, %cst {dimension_numbers = #tpu.dot_dimension_numbers<[1], [0], [0], [1], [0, 0, 1, 1], [], []>} : vector<64x128xbf16>, vector<128x128xbf16>, vector<64x128xf32> -> vector<64x128xf32>
    %c0_5 = arith.constant 0 : index
    %c0_6 = arith.constant 0 : index
    %5 = vector.load %arg3[%c0_5, %c0_6] : memref<1x128xf32, #tpu.memory_space<vmem>>, vector<1x128xf32>
    %6 = vector.broadcast %5 : vector<1x128xf32> to vector<64x128xf32>
    %7 = arith.addf %4, %6 : vector<64x128xf32>
    %cst_7 = arith.constant 0.000000e+00 : f32
    %8 = vector.broadcast %cst_7 : f32 to vector<64x128xf32>
    %9 = arith.subf %8, %7 : vector<64x128xf32>
    %10 = math.exp %9 : vector<64x128xf32>
    %cst_8 = arith.constant 1.000000e+00 : f32
    %11 = vector.broadcast %cst_8 : f32 to vector<64x128xf32>
    %12 = arith.addf %11, %10 : vector<64x128xf32>
    %13 = tpu.reciprocal %12 {approx = true} : vector<64x128xf32> -> vector<64x128xf32>
    %14 = arith.mulf %7, %13 : vector<64x128xf32>
    %cst_9 = arith.constant dense<0.000000e+00> : vector<128xf32>
    %15 = vector.multi_reduction <add>, %14, %cst_9 [0] : vector<64x128xf32> to vector<128xf32>
    %16 = vector.shape_cast %15 : vector<128xf32> to vector<1x128xf32>
    %cst_10 = arith.constant 6.400000e+01 : f32
    %17 = vector.broadcast %cst_10 : f32 to vector<1x128xf32>
    %18 = arith.divf %16, %17 : vector<1x128xf32>
    %19 = arith.truncf %18 : vector<1x128xf32> to vector<1x128xbf16>
    %c0_11 = arith.constant 0 : index
    %c0_12 = arith.constant 0 : index
    %20 = vector.load %arg4[%c0_11, %c0_12] : memref<128x128xbf16, #tpu.memory_space<vmem>>, vector<128x128xbf16>
    %cst_13 = arith.constant dense<0.000000e+00> : vector<1x128xf32>
    %21 = tpu.matmul %19, %20, %cst_13 {dimension_numbers = #tpu.dot_dimension_numbers<[1], [0], [0], [1], [0, 0, 1, 1], [], []>} : vector<1x128xbf16>, vector<128x128xbf16>, vector<1x128xf32> -> vector<1x128xf32>
    %c0_14 = arith.constant 0 : index
    %c0_15 = arith.constant 0 : index
    %22 = vector.load %arg5[%c0_14, %c0_15] : memref<1x128xf32, #tpu.memory_space<vmem>>, vector<1x128xf32>
    %23 = arith.addf %21, %22 : vector<1x128xf32>
    %cst_16 = arith.constant 0.000000e+00 : f32
    %24 = vector.broadcast %cst_16 : f32 to vector<1x128xf32>
    %25 = arith.maximumf %23, %24 : vector<1x128xf32>
    %26 = arith.truncf %25 : vector<1x128xf32> to vector<1x128xbf16>
    %c0_17 = arith.constant 0 : index
    %c0_18 = arith.constant 0 : index
    %27 = vector.load %arg6[%c0_17, %c0_18] : memref<128x128xbf16, #tpu.memory_space<vmem>>, vector<128x128xbf16>
    %cst_19 = arith.constant dense<0.000000e+00> : vector<1x128xf32>
    %28 = tpu.matmul %26, %27, %cst_19 {dimension_numbers = #tpu.dot_dimension_numbers<[1], [0], [0], [1], [0, 0, 1, 1], [], []>} : vector<1x128xbf16>, vector<128x128xbf16>, vector<1x128xf32> -> vector<1x128xf32>
    %c0_20 = arith.constant 0 : index
    %c0_21 = arith.constant 0 : index
    %29 = vector.load %arg7[%c0_20, %c0_21] : memref<1x128xf32, #tpu.memory_space<vmem>>, vector<1x128xf32>
    %30 = arith.addf %28, %29 : vector<1x128xf32>
    %31 = vector.shape_cast %30 : vector<1x128xf32> to vector<1x128xf32>
    %32 = vector.broadcast %31 : vector<1x128xf32> to vector<8x128xf32>
    %c0_22 = arith.constant 0 : index
    %c0_23 = arith.constant 0 : index
    %c0_24 = arith.constant 0 : index
    %33 = vector.load %arg8[%c0_22, %c0_23, %c0_24] : memref<1x8x128xf32, #tpu.memory_space<vmem>>, vector<1x8x128xf32>
    %34 = vector.shape_cast %33 : vector<1x8x128xf32> to vector<8x128xf32>
    %35 = vector.shape_cast %32 : vector<8x128xf32> to vector<1x8x128xf32>
    tpu.vector_store %arg8[%c0_22, %c0_23, %c0_24], %35 {strides = array<i32>} : memref<1x8x128xf32, #tpu.memory_space<vmem>>, vector<1x8x128xf32>,
    return
  }
  func.func @transform_0(%arg0: i32) -> (i32, i32, i32, i32) {
    %c0_i32 = arith.constant 0 : i32
    %c0_i32_0 = arith.constant 0 : i32
    %c0_i32_1 = arith.constant 0 : i32
    %c0_i32_2 = arith.constant 0 : i32
    return %arg0, %c0_i32, %c0_i32_0, %c0_i32_1 : i32, i32, i32, i32
  }
  func.func @transform_1(%arg0: i32) -> (i32, i32) {
    %c0_i32 = arith.constant 0 : i32
    %c0_i32_0 = arith.constant 0 : i32
    %c0_i32_1 = arith.constant 0 : i32
    return %c0_i32, %c0_i32_0 : i32, i32
  }
  func.func @transform_2(%arg0: i32) -> (i32, i32) {
    %c0_i32 = arith.constant 0 : i32
    %c0_i32_0 = arith.constant 0 : i32
    %c0_i32_1 = arith.constant 0 : i32
    return %c0_i32, %c0_i32_0 : i32, i32
  }
  func.func @transform_3(%arg0: i32) -> (i32, i32) {
    %c0_i32 = arith.constant 0 : i32
    %c0_i32_0 = arith.constant 0 : i32
    %c0_i32_1 = arith.constant 0 : i32
    return %c0_i32, %c0_i32_0 : i32, i32
  }
  func.func @transform_4(%arg0: i32) -> (i32, i32) {
    %c0_i32 = arith.constant 0 : i32
    %c0_i32_0 = arith.constant 0 : i32
    %c0_i32_1 = arith.constant 0 : i32
    return %c0_i32, %c0_i32_0 : i32, i32
  }
  func.func @transform_5(%arg0: i32) -> (i32, i32) {
    %c0_i32 = arith.constant 0 : i32
    %c0_i32_0 = arith.constant 0 : i32
    %c0_i32_1 = arith.constant 0 : i32
    return %c0_i32, %c0_i32_0 : i32, i32
  }
  func.func @transform_6(%arg0: i32) -> (i32, i32) {
    %c0_i32 = arith.constant 0 : i32
    %c0_i32_0 = arith.constant 0 : i32
    %c0_i32_1 = arith.constant 0 : i32
    return %c0_i32, %c0_i32_0 : i32, i32
  }
  func.func @transform_7(%arg0: i32) -> (i32, i32, i32) {
    %c0_i32 = arith.constant 0 : i32
    %c0_i32_0 = arith.constant 0 : i32
    %c0_i32_1 = arith.constant 0 : i32
    return %arg0, %c0_i32, %c0_i32_0 : i32, i32, i32
  }
}

</mosaic_0001>

<bundles_post_ra>
// kernel: _lambda_.4
= control target key start
LH: loop header
LB: loop body
LE: loop exit
PB: predicated region body
PF: predicated region fallthrough
CT: control target
= control target key end

     0   :  { %vm91_vm0 = vcmask 261120   ;;  %s640_s1 = inlined_call_operand.vmem [shape: bf16[32,128], index: 1, kind: input, shape index: {}]   ;;  %s641_s0 = inlined_call_operand.vmem [shape: bf16[128,32], index: 0, kind: input, shape index: {}]   ;;  %s642_s2 = inlined_call_operand.vmem [shape: f32[1,128], index: 2, kind: input, shape index: {}]   ;;  %s643_s3 = inlined_call_operand.vmem [shape: bf16[128,128], index: 3, kind: output, shape index: {}]  }
   0x1   :  { %v354_v0 = vld [vmem:[%s640_s1 + $0x8] sm:$0xff]  ;;  %v353_v1 = vld [vmem:[%s640_s1] sm:$0xff]  ;;  %v347_v3 = vld [vmem:[%s641_s0 + $0x10] sm:$0xff] }
   0x2   :  { %122 = vmatpush.bf16.msra.mxu0 %v354_v0  ;;  %402 = vmatpush.bf16.msra.mxu1 %v354_v0  ;;  %v345_v2 = vld [vmem:[%s641_s0] sm:$0xff]  ;;  %v351_v5 = vld [vmem:[%s641_s0 + $0x30] sm:$0xff]  ;;  %v346_v6 = vld [vmem:[%s641_s0 + $0x8] sm:$0xff] }
   0x3   :  { %403 = vmatpush.bf16.msra.mxu2 %v354_v0  ;;  %404 = vmatpush.bf16.msra.mxu3 %v354_v0  ;;  %v349_v4 = vld [vmem:[%s641_s0 + $0x20] sm:$0xff]  ;;  %v348_v7 = vld [vmem:[%s641_s0 + $0x18] sm:$0xff]  ;;  %v350_v8 = vld [vmem:[%s641_s0 + $0x28] sm:$0xff] }
   0x4   :  { %v352_v9 = vld [vmem:[%s641_s0 + $0x38] sm:$0xff]  ;;  %v534_v10 = vld [vmem:[%s642_s2] ss:$0 sm:$0xff] }
   0x6   :  { %123 = vmatpush.bf16.msra.mxu0 %v353_v1  ;;  %405 = vmatpush.bf16.msra.mxu1 %v353_v1 }
   0x7   :  { %406 = vmatpush.bf16.msra.mxu2 %v353_v1  ;;  %407 = vmatpush.bf16.msra.mxu3 %v353_v1 }
   0x9   :  { %337 = vmatmul.msk.bf16.vlgmr.msra.gmra.mxu0 %vm91_vm0, %v345_v2  ;;  %339 = vmatmul.msk.bf16.vlgmr.msra.gmra.mxu1 %vm91_vm0, %v347_v3 }
   0xa   :  { %341 = vmatmul.msk.bf16.vlgmr.msra.gmra.mxu2 %vm91_vm0, %v349_v4  ;;  %343 = vmatmul.msk.bf16.vlgmr.msra.gmra.mxu3 %vm91_vm0, %v351_v5 }
  0x19   :  { %338 = vmatmul.msk.bf16.gmra.mxu0 %vm91_vm0, %v346_v6  ;;  %340 = vmatmul.msk.bf16.gmra.mxu1 %vm91_vm0, %v348_v7 }
  0x1a   :  { %342 = vmatmul.msk.bf16.gmra.mxu2 %vm91_vm0, %v350_v8  ;;  %344 = vmatmul.msk.bf16.gmra.mxu3 %vm91_vm0, %v352_v9 }
  0x86   :  { %v125_v11 = vpop.f32.mrf.mxu0  ;;  %v135_v12 = vpop.f32.mrf.mxu1 }
  0x87   :  { %v537_v13 = vadd.f32 %v534_v10, %v125_v11  ;;  %v540_v14 = vadd.f32 %v534_v10, %v135_v12 }
  0x89   :  { %v165_v15 = vsub.f32 0.0, %v537_v13  ;;  %v169_v16 = vsub.f32 0.0, %v540_v14 }
  0x8b   :  { %v181_v17 = vmul.f32 1.442695, %v165_v15  ;;  %v189_v18 = vmul.f32 1.442695, %v169_v16 }
  0x8d   :  { %v145_v19 = vpop.f32.mrf.mxu2  ;;  %v155_v20 = vpop.f32.mrf.mxu3  ;;  %409 = vpow2.f32 %v181_v17 }
  0x8e   :  { %v545_v21 = vadd.f32 %v534_v10, %v145_v19  ;;  %v548_v22 = vadd.f32 %v534_v10, %v155_v20  ;;  %v127_v23 = vpop.f32.mrf.mxu0  ;;  %v137_v24 = vpop.f32.mrf.mxu1  ;;  %411 = vpow2.f32 %v189_v18 }
  0x8f   :  { %v551_v25 = vadd.f32 %v534_v10, %v127_v23  ;;  %v554_v26 = vadd.f32 %v534_v10, %v137_v24 }
  0x90   :  { %v173_v27 = vsub.f32 0.0, %v545_v21  ;;  %v177_v28 = vsub.f32 0.0, %v548_v22 }
  0x91   :  { %v166_v29 = vsub.f32 0.0, %v551_v25  ;;  %v170_v30 = vsub.f32 0.0, %v554_v26 }
  0x92   :  { %v197_v31 = vmul.f32 1.442695, %v173_v27  ;;  %v205_v32 = vmul.f32 1.442695, %v177_v28 }
  0x93   :  { %v410_v33 = vpop.eup %409  ;;  %v183_v34 = vmul.f32 1.442695, %v166_v29  ;;  %v191_v35 = vmul.f32 1.442695, %v170_v30 }
  0x94   :  { %413 = vpow2.f32 %v197_v31  ;;  %v412_v38 = vpop.eup %411  ;;  %v213_v43 = vadd.f32 1.0, %v410_v33 }
  0x95   :  { %v147_v36 = vpop.f32.mrf.mxu2  ;;  %v157_v37 = vpop.f32.mrf.mxu3  ;;  %415 = vpow2.f32 %v205_v32  ;;  %v217_v48 = vadd.f32 1.0, %v412_v38 }
  0x96   :  { %v561_v39 = vadd.f32 %v534_v10, %v147_v36  ;;  %v564_v40 = vadd.f32 %v534_v10, %v157_v37  ;;  %v130_v41 = vpop.f32.mrf.mxu0  ;;  %v140_v42 = vpop.f32.mrf.mxu1  ;;  %417 = vpow2.f32 %v183_v34 }
  0x97   :  { %v567_v44 = vadd.f32 %v534_v10, %v130_v41  ;;  %v570_v45 = vadd.f32 %v534_v10, %v140_v42  ;;  %419 = vpow2.f32 %v191_v35 }
  0x98   :  { %v174_v46 = vsub.f32 0.0, %v561_v39  ;;  %v178_v47 = vsub.f32 0.0, %v564_v40  ;;  %421 = vrcp.f32 %v213_v43 }
  0x99   :  { %v167_v49 = vsub.f32 0.0, %v567_v44  ;;  %v171_v52 = vsub.f32 0.0, %v570_v45 }
  0x9a   :  { %v414_v50 = vpop.eup %413  ;;  %v199_v51 = vmul.f32 1.442695, %v174_v46  ;;  %v207_v54 = vmul.f32 1.442695, %v178_v47 }
  0x9b   :  { %v221_v53 = vadd.f32 1.0, %v414_v50  ;;  %v185_v55 = vmul.f32 1.442695, %v167_v49  ;;  %v416_v56 = vpop.eup %415  ;;  %v193_v60 = vmul.f32 1.442695, %v171_v52 }
  0x9c   :  { %423 = vpow2.f32 %v199_v51  ;;  %v418_v59 = vpop.eup %417  ;;  %v225_v5 = vadd.f32 1.0, %v416_v56 }
  0x9d   :  { %425 = vrcp.f32 %v217_v48  ;;  %v150_v57 = vpop.f32.mrf.mxu2  ;;  %v160_v58 = vpop.f32.mrf.mxu3  ;;  %v214_v2 = vadd.f32 1.0, %v418_v59 }
  0x9e   :  { %427 = vrcp.f32 %v221_v53  ;;  %v577_v61 = vadd.f32 %v534_v10, %v150_v57  ;;  %v580_v62 = vadd.f32 %v534_v10, %v160_v58  ;;  %v132_v63 = vpop.f32.mrf.mxu0  ;;  %v142_v0 = vpop.f32.mrf.mxu1 }
  0x9f   :  { %v420_v1 = vpop.eup %419  ;;  %429 = vpow2.f32 %v207_v54  ;;  %v583_v3 = vadd.f32 %v534_v10, %v132_v63  ;;  %v586_v4 = vadd.f32 %v534_v10, %v142_v0 }
  0xa0   :  { %v218_v6 = vadd.f32 1.0, %v420_v1  ;;  %431 = vpow2.f32 %v185_v55  ;;  %v175_v7 = vsub.f32 0.0, %v577_v61  ;;  %v422_v8 = vpop.eup %421  ;;  %v179_v18 = vsub.f32 0.0, %v580_v62 }
  0xa1   :  { %433 = vrcp.f32 %v214_v2  ;;  %v168_v9 = vsub.f32 0.0, %v583_v3  ;;  %v172_v11 = vsub.f32 0.0, %v586_v4  ;;  %v245_v36 = vmul.f32 %v422_v8, %v537_v13 }
  0xa2   :  { %v424_v12 = vpop.eup %423  ;;  %435 = vrcp.f32 %v218_v6  ;;  %v201_v15 = vmul.f32 1.442695, %v175_v7  ;;  %v209_v34 = vmul.f32 1.442695, %v179_v18 }
  0xa3   :  { %v426_v16 = vpop.eup %425  ;;  %v222_v17 = vadd.f32 1.0, %v424_v12  ;;  %437 = vpow2.f32 %v193_v60  ;;  %v187_v19 = vmul.f32 1.442695, %v168_v9  ;;  %v195_v24 = vmul.f32 1.442695, %v172_v11 }
  0xa4   :  { %v428_v20 = vpop.eup %427  ;;  %439 = vrcp.f32 %v225_v5  ;;  %v249_v42 = vmul.f32 %v426_v16, %v540_v14 }
  0xa5   :  { %v430_v23 = vpop.eup %429  ;;  %441 = vrcp.f32 %v222_v17  ;;  %v152_v27 = vpop.f32.mrf.mxu2  ;;  %v253_v52 = vmul.f32 %v428_v20, %v545_v21 }
  0xa6   :  { %v162_v28 = vpop.f32.mrf.mxu3  ;;  %v432_v29 = vpop.eup %431  ;;  %v226_v30 = vadd.f32 1.0, %v430_v23  ;;  %443 = vpow2.f32 %v201_v15  ;;  %v593_v31 = vadd.f32 %v534_v10, %v152_v27 }
  0xa7   :  { %v596_v32 = vadd.f32 %v534_v10, %v162_v28  ;;  %v434_v33 = vpop.eup %433  ;;  %445 = vpow2.f32 %v187_v19  ;;  %v215_v46 = vadd.f32 1.0, %v432_v29 }
  0xa8   :  { %v436_v35 = vpop.eup %435  ;;  %v246_v37 = vmul.f32 %v434_v33, %v551_v25  ;;  %447 = vrcp.f32 %v226_v30  ;;  %v176_v38 = vsub.f32 0.0, %v593_v31 }
  0xa9   :  { %v438_v41 = vpop.eup %437  ;;  %v250_v43 = vmul.f32 %v436_v35, %v554_v26  ;;  %v180_v10 = vsub.f32 0.0, %v596_v32  ;;  %449 = vpow2.f32 %v195_v24 }
  0xaa   :  { %v440_v47 = vpop.eup %439  ;;  %v358_v48 = vpack.c.bf16 %v246_v37, %v245_v36  ;;  %v203_v49 = vmul.f32 1.442695, %v176_v38  ;;  %v219_v13 = vadd.f32 1.0, %v438_v41  ;;  %451 = vpow2.f32 %v209_v34 }
  0xab   :  { %v442_v50 = vpop.eup %441  ;;  %v368_v51 = vpack.c.bf16 %v250_v43, %v249_v42  ;;  %453 = vrcp.f32 %v215_v46  ;;  %v211_v53 = vmul.f32 1.442695, %v180_v10  ;;  %v257_v57 = vmul.f32 %v440_v47, %v548_v22 }
  0xac   :  { %v444_v25 = vpop.eup %443  ;;  %359 = vst [vmem:[%s643_s3] sm:$0xff] %v358_v48   ;;  %v254_v14 = vmul.f32 %v442_v50, %v561_v39  ;;  %455 = vpow2.f32 %v203_v49 }
  0xad   :  { %v446_v26 = vpop.eup %445  ;;  %396 = vst [vmem:[%s643_s3 + $0x10] sm:$0xff] %v368_v51   ;;  %457 = vrcp.f32 %v219_v13  ;;  %v223_v60 = vadd.f32 1.0, %v444_v25 }
  0xae   :  { %v448_v54 = vpop.eup %447  ;;  %v378_v55 = vpack.c.bf16 %v254_v14, %v253_v52  ;;  %v216_v56 = vadd.f32 1.0, %v446_v26 }
  0xaf   :  { %v258_v21 = vmul.f32 %v448_v54, %v564_v40  ;;  %v450_v58 = vpop.eup %449 }
  0xb0   :  { %398 = vst [vmem:[%s643_s3 + $0x20] sm:$0xff] %v378_v55   ;;  %459 = vrcp.f32 %v216_v56  ;;  %v452_v39 = vpop.eup %451  ;;  %v220_v63 = vadd.f32 1.0, %v450_v58 }
  0xb1   :  { %v388_v59 = vpack.c.bf16 %v258_v21, %v257_v57  ;;  %461 = vpow2.f32 %v211_v53  ;;  %v454_v0 = vpop.eup %453  ;;  %v227_v40 = vadd.f32 1.0, %v452_v39 }
  0xb2   :  { %463 = vrcp.f32 %v220_v63  ;;  %v456_v22 = vpop.eup %455  ;;  %v247_v7 = vmul.f32 %v454_v0, %v567_v44 }
  0xb3   :  { %400 = vst [vmem:[%s643_s3 + $0x30] sm:$0xff] %v388_v59   ;;  %v458_v1 = vpop.eup %457  ;;  %465 = vrcp.f32 %v223_v60  ;;  %v224_v2 = vadd.f32 1.0, %v456_v22 }
  0xb4   :  { %v251_v15 = vmul.f32 %v458_v1, %v570_v45 }
  0xb5   :  { %467 = vrcp.f32 %v224_v2 }
  0xb6   :  { %v460_v5 = vpop.eup %459  ;;  %469 = vrcp.f32 %v227_v40 }
  0xb7   :  { %v462_v6 = vpop.eup %461  ;;  %v248_v8 = vmul.f32 %v460_v5, %v583_v3 }
  0xb8   :  { %v228_v9 = vadd.f32 1.0, %v462_v6  ;;  %v464_v11 = vpop.eup %463 }
  0xb9   :  { %v363_v12 = vpack.c.bf16 %v248_v8, %v247_v7  ;;  %v252_v16 = vmul.f32 %v464_v11, %v586_v4  ;;  %v466_v17 = vpop.eup %465 }
  0xba   :  { %471 = vrcp.f32 %v228_v9  ;;  %v255_v3 = vmul.f32 %v466_v17, %v577_v61 }
  0xbb   :  { %395 = vst [vmem:[%s643_s3 + $0x8] sm:$0xff] %v363_v12   ;;  %v373_v18 = vpack.c.bf16 %v252_v16, %v251_v15  ;;  %v468_v19 = vpop.eup %467 }
  0xbc   :  { %v470_v44 = vpop.eup %469  ;;  %v256_v20 = vmul.f32 %v468_v19, %v593_v31 }
  0xbd   :  { %397 = vst [vmem:[%s643_s3 + $0x18] sm:$0xff] %v373_v18   ;;  %v259_v4 = vmul.f32 %v470_v44, %v580_v62 }
  0xbe   :  { %v383_v23 = vpack.c.bf16 %v256_v20, %v255_v3 }
  0xc0   :  { %v472_v45 = vpop.eup %471  ;;  %399 = vst [vmem:[%s643_s3 + $0x28] sm:$0xff] %v383_v23  }
  0xc1   :  { %v260_v24 = vmul.f32 %v472_v45, %v596_v32 }
  0xc3   :  { %v393_v27 = vpack.c.bf16 %v260_v24, %v259_v4 }
  0xc5   :  { %401 = vst [vmem:[%s643_s3 + $0x38] sm:$0xff] %v393_v27  }

// kernel: _lambda_.5
= control target key start
LH: loop header
LB: loop body
LE: loop exit
PB: predicated region body
PF: predicated region fallthrough
CT: control target
= control target key end

     0   :  { %vm118_vm0 = vcmask 1040384   ;;  %vm360_vm1 = vcmask 1046528   ;;  %vm671_vm3 = vcmask 1041409   ;;  %s2117_s4 = inlined_call_operand.vmem [shape: bf16[128,128], index: 4, kind: input, shape index: {}]   ;;  %s2118_s0 = inlined_call_operand.vmem [shape: bf16[2,8,8,128], index: 0, kind: input, shape index: {}]   ;;  %s2119_s2 = inlined_call_operand.vmem [shape: f32[1,128], index: 2, kind: input, shape index: {}]   ;;  %s2120_s3 = inlined_call_operand.vmem [shape: f32[1,128], index: 3, kind: input, shape index: {}]   ;;  %s2121_s1 = inlined_call_operand.vmem [shape: f32[3,3,128], index: 1, kind: input, shape index: {}]   ;;  %s2122_s5 = inlined_call_operand.vmem [shape: f32[1,128], index: 5, kind: input, shape index: {}]   ;;  %s2123_s6 = inlined_call_operand.vmem [shape: bf16[128,128], index: 6, kind: input, shape index: {}]   ;;  %s2124_s7 = inlined_call_operand.vmem [shape: f32[1,128], index: 7, kind: input, shape index: {}]   ;;  %s2125_s8 = inlined_call_operand.vmem [shape: bf16[128,128], index: 8, kind: input, shape index: {}]   ;;  %s2126_s9 = inlined_call_operand.vmem [shape: f32[1,128], index: 9, kind: input, shape index: {}]   ;;  %s2127_s10 = inlined_call_operand.vmem [shape: bf16[2,8,8,128], index: 10, kind: output, shape index: {}]  }
   0x1   :  { %v1131_v0 = vld [vmem:[%s2117_s4 + $0x38] sm:$0xff]  ;;  %v1130_v1 = vld [vmem:[%s2117_s4 + $0x30] sm:$0xff]  ;;  %v1149_v2 = vld [vmem:[%s2118_s0] sm:$0xff]  }
   0x2   :  { %723 = vmatpush.bf16.msra.mxu1 %v1131_v0  ;;  %v1395_v3 = vunpack.c.l.bf16 %v1149_v2  ;;  %v1397_v4 = vunpack.c.h.bf16 %v1149_v2  ;;  %v1220_v5 = vld [vmem:[%s2118_s0 + $0x8] sm:$0xff]   ;;  %v1221_v6 = vld [vmem:[%s2118_s0 + $0x10] sm:$0xff]   ;;  %v1222_v7 = vld [vmem:[%s2118_s0 + $0x18] sm:$0xff]  }
   0x3   :  { %v1408_v8 = vunpack.c.l.bf16 %v1220_v5  ;;  %v1410_v9 = vunpack.c.h.bf16 %v1220_v5  ;;  %v1412_v10 = vunpack.c.l.bf16 %v1221_v6  ;;  %v1414_v11 = vunpack.c.h.bf16 %v1221_v6  ;;  %v1223_v12 = vld [vmem:[%s2118_s0 + $0x20] sm:$0xff]   ;;  %v1224_v13 = vld [vmem:[%s2118_s0 + $0x28] sm:$0xff]   ;;  %v1225_v14 = vld [vmem:[%s2118_s0 + $0x30] sm:$0xff]  }
   0x4   :  { %2183 = vst [vmem:[#allocation2_spill] sm:$0xff] %v1395_v3  ;;  %v1425_v15 = vunpack.c.l.bf16 %v1222_v7  ;;  %v1427_v16 = vunpack.c.h.bf16 %v1222_v7  ;;  %v1429_v17 = vunpack.c.l.bf16 %v1223_v12  ;;  %v1431_v18 = vunpack.c.h.bf16 %v1223_v12  ;;  %v1226_v19 = vld [vmem:[%s2118_s0 + $0x38] sm:$0xff]   ;;  %v1129_v20 = vld [vmem:[%s2117_s4 + $0x28] sm:$0xff]  ;;  %v1128_v37 = vld [vmem:[%s2117_s4 + $0x20] sm:$0xff] }
   0x5   :  { %2184 = vst [vmem:[#allocation3_spill] sm:$0xff] %v1397_v4  ;;  %v1439_v21 = vunpack.c.l.bf16 %v1224_v13  ;;  %v1441_v22 = vunpack.c.h.bf16 %v1224_v13  ;;  %v1443_v23 = vunpack.c.l.bf16 %v1225_v14  ;;  %v1445_v24 = vunpack.c.h.bf16 %v1225_v14  ;;  %v1471_v42 = vld [vmem:[%s2121_s1] sm:$0x7]  ;;  %v1482_v47 = vld [vmem:[%s2121_s1 + $0x4] sm:$0x7]  ;;  %v1127_v57 = vld [vmem:[%s2117_s4 + $0x18] sm:$0xff] }
   0x6   :  { %2185 = vst [vmem:[#allocation4_spill] sm:$0xff] %v1408_v8  ;;  %724 = vmatpush.bf16.msra.mxu1 %v1130_v1  ;;  %v1447_v25 = vunpack.c.l.bf16 %v1226_v19  ;;  %v1449_v26 = vunpack.c.h.bf16 %v1226_v19  ;;  %v86_v27 = vrot.slane %v1395_v3, 7  ;;  %v87_v28 = vrot.slane %v1397_v4, 7  ;;  %v1499_v52 = vld [vmem:[%s2121_s1 + $0x8] sm:$0x7] }
   0x7   :  { %2186 = vst [vmem:[#allocation5_spill] sm:$0xff] %v1410_v9  ;;  %v88_v29 = vrot.slane %v1408_v8, 7  ;;  %v89_v30 = vrot.slane %v1410_v9, 7  ;;  %v90_v31 = vrot.slane %v1412_v10, 7  ;;  %v91_v32 = vrot.slane %v1414_v11, 7 }
   0x8   :  { %2187 = vst [vmem:[#allocation6_spill] sm:$0xff] %v1412_v10  ;;  %v92_v33 = vrot.slane %v1425_v15, 7  ;;  %v93_v34 = vrot.slane %v1427_v16, 7  ;;  %v94_v35 = vrot.slane %v1429_v17, 7  ;;  %v95_v36 = vrot.slane %v1431_v18, 7 }
   0x9   :  { %2188 = vst [vmem:[#allocation7_spill] sm:$0xff] %v1414_v11  ;;  %v96_v38 = vrot.slane %v1439_v21, 7  ;;  %v97_v39 = vrot.slane %v1441_v22, 7  ;;  %v98_v40 = vrot.slane %v1443_v23, 7  ;;  %v99_v41 = vrot.slane %v1445_v24, 7 }
   0xa   :  { %2189 = vst [vmem:[#allocation8_spill] sm:$0xff] %v1425_v15  ;;  %725 = vmatpush.bf16.msra.mxu1 %v1129_v20  ;;  %v100_v43 = vrot.slane %v1447_v25, 7  ;;  %v101_v44 = vrot.slane %v1449_v26, 7  ;;  %v119_v45 = vsel %vm118_vm0, 0.0, %v86_v27  ;;  %v1477_v46 = vsel %vm118_vm0, 0.0, %v87_v28  ;;  %v1126_v20 = vld [vmem:[%s2117_s4 + $0x10] sm:$0xff] }
   0xb   :  { %2190 = vst [vmem:[#allocation9_spill] sm:$0xff] %v1427_v16  ;;  %v1485_v48 = vsel %vm118_vm0, 0.0, %v88_v29  ;;  %v1488_v49 = vsel %vm118_vm0, 0.0, %v89_v30  ;;  %v1491_v50 = vsel %vm118_vm0, 0.0, %v90_v31  ;;  %v1494_v51 = vsel %vm118_vm0, 0.0, %v91_v32 }
   0xc   :  { %2191 = vst [vmem:[#allocation10_spill] sm:$0xff] %v1429_v17  ;;  %v1502_v53 = vsel %vm118_vm0, 0.0, %v92_v33  ;;  %v1505_v54 = vsel %vm118_vm0, 0.0, %v93_v34  ;;  %v127_v55 = vsel %vm118_vm0, 0.0, %v94_v35  ;;  %v1509_v56 = vsel %vm118_vm0, 0.0, %v95_v36 }
   0xd   :  { %2192 = vst [vmem:[#allocation11_spill] sm:$0xff] %v1431_v18  ;;  %v1515_v58 = vsel %vm118_vm0, 0.0, %v96_v38  ;;  %v1518_v59 = vsel %vm118_vm0, 0.0, %v97_v39  ;;  %v1521_v60 = vsel %vm118_vm0, 0.0, %v98_v40  ;;  %v1524_v61 = vsel %vm118_vm0, 0.0, %v99_v41 }
   0xe   :  { %2193 = vst [vmem:[#allocation12_spill] sm:$0xff] %v1439_v21  ;;  %726 = vmatpush.bf16.msra.mxu1 %v1128_v37  ;;  %v1527_v62 = vsel %vm118_vm0, 0.0, %v100_v43  ;;  %v1530_v63 = vsel %vm118_vm0, 0.0, %v101_v44  ;;  %v135_v0 = vperm.slane %v1471_v42, 0  ;;  %v166_v1 = vperm.slane %v1482_v47, 0  ;;  %v1125_v44 = vld [vmem:[%s2117_s4 + $0x8] sm:$0xff] }
   0xf   :  { %2194 = vst [vmem:[#allocation13_spill] sm:$0xff] %v1441_v22  ;;  %v1535_v2 = vperm.slane %v1499_v52, 0  ;;  %v1538_v5 = vperm.slane %v1471_v42, 1  ;;  %v1541_v6 = vperm.slane %v1482_v47, 1  ;;  %v1544_v7 = vperm.slane %v1499_v52, 1 }
  0x10   :  { %2195 = vst [vmem:[#allocation14_spill] sm:$0xff] %v1443_v23  ;;  %v136_v12 = vmul.f32 0.0, %v135_v0  ;;  %v137_v13 = vmul.f32 %v135_v0, %v119_v45  ;;  %v138_v14 = vmul.f32 %v135_v0, %v1477_v46  ;;  %v139_v19 = vmul.f32 %v135_v0, %v1485_v48 }
  0x11   :  { %2196 = vst [vmem:[#allocation15_spill] sm:$0xff] %v1445_v24  ;;  %v140_v27 = vmul.f32 %v135_v0, %v1488_v49  ;;  %v141_v28 = vmul.f32 %v135_v0, %v1491_v50  ;;  %v142_v29 = vmul.f32 %v135_v0, %v1494_v51  ;;  %v143_v30 = vmul.f32 %v135_v0, %v1502_v53 }
  0x12   :  { %2197 = vst [vmem:[#allocation16_spill] sm:$0xff] %v1447_v25  ;;  %727 = vmatpush.bf16.msra.mxu1 %v1127_v57  ;;  %v144_v31 = vmul.f32 %v135_v0, %v127_v55  ;;  %v145_v32 = vmul.f32 %v135_v0, %v1509_v56  ;;  %v146_v33 = vmul.f32 %v135_v0, %v1515_v58 }
  0x13   :  { %2198 = vst [vmem:[#allocation17_spill] sm:$0xff] %v1449_v26  ;;  %v147_v34 = vmul.f32 %v135_v0, %v1518_v59  ;;  %v148_v35 = vmul.f32 %v135_v0, %v1521_v60  ;;  %v149_v36 = vmul.f32 %v135_v0, %v1524_v61  ;;  %v150_v37 = vmul.f32 %v135_v0, %v1527_v62 }
  0x14   :  { %2199 = vst [vmem:[#allocation18_spill] sm:$0xff] %v1471_v42  ;;  %v167_v38 = vmul.f32 %v166_v1, %v119_v45  ;;  %v168_v39 = vmul.f32 %v166_v1, %v1477_v46  ;;  %v169_v40 = vmul.f32 %v166_v1, %v1485_v48  ;;  %v170_v41 = vmul.f32 %v166_v1, %v1488_v49 }
  0x15   :  { %2200 = vst [vmem:[#allocation19_spill] sm:$0xff] %v1482_v47  ;;  %v171_v43 = vmul.f32 %v166_v1, %v1491_v50  ;;  %v172_v57 = vmul.f32 %v166_v1, %v1494_v51  ;;  %v174_v0 = vmul.f32 %v166_v1, %v1505_v54  ;;  %v175_v45 = vmul.f32 %v166_v1, %v127_v55  ;;  %v1124_v55 = vld [vmem:[%s2117_s4] sm:$0xff] }
  0x16   :  { %2201 = vst [vmem:[#allocation20_spill] sm:$0xff] %v1499_v52  ;;  %728 = vmatpush.bf16.msra.mxu1 %v1126_v20  ;;  %v173_v52 = vmul.f32 %v166_v1, %v1502_v53  ;;  %v176_v47 = vmul.f32 %v166_v1, %v1509_v56  ;;  %v177_v42 = vmul.f32 %v166_v1, %v1515_v58 }
  0x17   :  { %2202 = vst [vmem:[#allocation21_spill] sm:$0xff] %v1541_v6  ;;  %v179_v26 = vmul.f32 %v166_v1, %v1521_v60  ;;  %v180_v20 = vmul.f32 %v166_v1, %v1524_v61  ;;  %v181_v16 = vmul.f32 %v166_v1, %v1527_v62  ;;  %v182_v6 = vmul.f32 %v166_v1, %v1530_v63 }
  0x18   :  { %2203 = vst [vmem:[#allocation22_spill] sm:$0xff] %v1544_v7  ;;  %v178_v7 = vmul.f32 %v166_v1, %v1518_v59  ;;  %v183_v25 = vadd.f32 %v167_v38, %v136_v12  ;;  %v184_v24 = vadd.f32 %v168_v39, %v137_v13  ;;  %v185_v23 = vadd.f32 %v169_v40, %v138_v14  ;;  %v2214_v40 = vld [vmem:[#allocation13_spill] sm:$0xff] }
  0x19   :  { %v186_v22 = vadd.f32 %v170_v41, %v139_v19  ;;  %v187_v21 = vadd.f32 %v171_v43, %v140_v27  ;;  %v188_v18 = vadd.f32 %v172_v57, %v141_v28  ;;  %v189_v17 = vadd.f32 %v173_v52, %v142_v29  ;;  %v2215_v43 = vld [vmem:[#allocation14_spill] sm:$0xff]  ;;  %v2216_v57 = vld [vmem:[#allocation15_spill] sm:$0xff] }
  0x1a   :  { %729 = vmatpush.bf16.msra.mxu1 %v1125_v44  ;;  %v190_v15 = vadd.f32 %v174_v0, %v143_v30  ;;  %v191_v11 = vadd.f32 %v175_v45, %v136_v12  ;;  %v192_v10 = vadd.f32 %v176_v47, %v144_v31  ;;  %v193_v9 = vadd.f32 %v177_v42, %v145_v32  ;;  %v2217_v45 = vld [vmem:[#allocation16_spill] sm:$0xff] }
  0x1b   :  { %v194_v8 = vadd.f32 %v178_v7, %v146_v33  ;;  %v195_v4 = vadd.f32 %v179_v26, %v147_v34  ;;  %v196_v3 = vadd.f32 %v180_v20, %v148_v35  ;;  %v197_v1 = vadd.f32 %v181_v16, %v149_v36  ;;  %v2212_v35 = vld [vmem:[#allocation11_spill] sm:$0xff] }
  0x1c   :  { %v198_v38 = vadd.f32 %v182_v6, %v150_v37  ;;  %v200_v13 = vmul.f32 %v1535_v2, %v1477_v46  ;;  %v201_v14 = vmul.f32 %v1535_v2, %v1485_v48  ;;  %v202_v19 = vmul.f32 %v1535_v2, %v1488_v49  ;;  %v2213_v37 = vld [vmem:[#allocation12_spill] sm:$0xff] }
  0x1d   :  { %v203_v52 = vmul.f32 %v1535_v2, %v1491_v50  ;;  %v204_v42 = vmul.f32 %v1535_v2, %v1494_v51  ;;  %v205_v16 = vmul.f32 %v1535_v2, %v1502_v53  ;;  %v206_v26 = vmul.f32 %v1535_v2, %v1505_v54 }
  0x1e   :  { %730 = vmatpush.bf16.msra.mxu1 %v1124_v55  ;;  %v207_v46 = vmul.f32 0.0, %v1535_v2  ;;  %v208_v47 = vmul.f32 %v1535_v2, %v1509_v56  ;;  %v209_v48 = vmul.f32 %v1535_v2, %v1515_v58  ;;  %v210_v49 = vmul.f32 %v1535_v2, %v1518_v59 }
  0x1f   :  { %v211_v50 = vmul.f32 %v1535_v2, %v1521_v60  ;;  %v212_v51 = vmul.f32 %v1535_v2, %v1524_v61  ;;  %v213_v53 = vmul.f32 %v1535_v2, %v1527_v62  ;;  %v214_v54 = vmul.f32 %v1535_v2, %v1530_v63  ;;  %v2204_v63 = vld [vmem:[#allocation2_spill] sm:$0xff] }
  0x20   :  { %v215_v6 = vadd.f32 %v200_v13, %v183_v25  ;;  %v216_v56 = vadd.f32 %v201_v14, %v184_v24  ;;  %v217_v7 = vadd.f32 %v202_v19, %v185_v23  ;;  %v218_v12 = vadd.f32 %v203_v52, %v186_v22  ;;  %v2205_v23 = vld [vmem:[#allocation3_spill] sm:$0xff]  ;;  %v2211_v24 = vld [vmem:[#allocation10_spill] sm:$0xff] }
  0x21   :  { %v219_v58 = vadd.f32 %v204_v42, %v187_v21  ;;  %v220_v27 = vadd.f32 %v205_v16, %v188_v18  ;;  %v221_v28 = vadd.f32 %v206_v26, %v189_v17  ;;  %v222_v59 = vadd.f32 %v207_v46, %v190_v15  ;;  %v2206_v18 = vld [vmem:[#allocation4_spill] sm:$0xff] }
  0x22   :  { %v223_v29 = vadd.f32 %v208_v47, %v191_v11  ;;  %v224_v30 = vadd.f32 %v209_v48, %v192_v10  ;;  %v225_v60 = vadd.f32 %v210_v49, %v193_v9  ;;  %v226_v31 = vadd.f32 %v211_v50, %v194_v8  ;;  %v2207_v11 = vld [vmem:[#allocation5_spill] sm:$0xff]  ;;  %v2208_v8 = vld [vmem:[#allocation6_spill] sm:$0xff]  ;;  %v2210_v15 = vld [vmem:[#allocation8_spill] sm:$0xff] }
  0x23   :  { %v227_v32 = vadd.f32 %v212_v51, %v195_v4  ;;  %v228_v61 = vadd.f32 %v213_v53, %v196_v3  ;;  %v229_v33 = vadd.f32 %v214_v54, %v197_v1  ;;  %v230_v34 = vadd.f32 %v207_v46, %v198_v38  ;;  %v2209_v3 = vld [vmem:[#allocation7_spill] sm:$0xff]  ;;  %v2218_v53 = vld [vmem:[#allocation21_spill] sm:$0xff] }
  0x24   :  { %v232_v62 = vmul.f32 0.0, %v1538_v5  ;;  %v233_v25 = vmul.f32 %v2204_v63, %v1538_v5  ;;  %v234_v22 = vmul.f32 %v2205_v23, %v1538_v5  ;;  %v235_v17 = vmul.f32 %v2206_v18, %v1538_v5 }
  0x25   :  { %v236_v10 = vmul.f32 %v2207_v11, %v1538_v5  ;;  %v237_v4 = vmul.f32 %v2208_v8, %v1538_v5  ;;  %v238_v9 = vmul.f32 %v2209_v3, %v1538_v5  ;;  %v239_v21 = vmul.f32 %v2210_v15, %v1538_v5 }
  0x26   :  { %v240_v2 = vmul.f32 %v2211_v24, %v1538_v5  ;;  %v241_v36 = vmul.f32 %v2212_v35, %v1538_v5  ;;  %v242_v39 = vmul.f32 %v2213_v37, %v1538_v5  ;;  %v243_v41 = vmul.f32 %v2214_v40, %v1538_v5 }
  0x27   :  { %v244_v44 = vmul.f32 %v2215_v43, %v1538_v5  ;;  %v245_v0 = vmul.f32 %v2216_v57, %v1538_v5  ;;  %v246_v20 = vmul.f32 %v2217_v45, %v1538_v5  ;;  %v247_v55 = vadd.f32 %v232_v62, %v215_v6 }
  0x28   :  { %v248_v1 = vadd.f32 %v233_v25, %v216_v56  ;;  %v249_v38 = vadd.f32 %v234_v22, %v217_v7  ;;  %v250_v13 = vadd.f32 %v235_v17, %v218_v12  ;;  %v251_v14 = vadd.f32 %v236_v10, %v219_v58 }
  0x29   :  { %v252_v19 = vadd.f32 %v237_v4, %v220_v27  ;;  %v253_v52 = vadd.f32 %v238_v9, %v221_v28  ;;  %v254_v42 = vadd.f32 %v239_v21, %v222_v59  ;;  %v255_v16 = vadd.f32 %v232_v62, %v223_v29  ;;  %v2219_v27 = vld [vmem:[#allocation9_spill] sm:$0xff] }
  0x2a   :  { %v256_v26 = vadd.f32 %v240_v2, %v224_v30  ;;  %v257_v46 = vadd.f32 %v241_v36, %v225_v60  ;;  %v258_v47 = vadd.f32 %v242_v39, %v226_v31  ;;  %v259_v48 = vadd.f32 %v243_v41, %v227_v32 }
  0x2b   :  { %v260_v49 = vadd.f32 %v244_v44, %v228_v61  ;;  %v261_v50 = vadd.f32 %v245_v0, %v229_v33  ;;  %v262_v51 = vadd.f32 %v246_v20, %v230_v34  ;;  %v264_v54 = vmul.f32 %v2204_v63, %v2218_v53  ;;  %v2220_v33 = vld [vmem:[#allocation17_spill] sm:$0xff]  ;;  %v2221_v63 = vld [vmem:[#allocation22_spill] sm:$0xff] }
  0x2c   :  { %v265_v5 = vmul.f32 %v2205_v23, %v2218_v53  ;;  %v266_v6 = vmul.f32 %v2206_v18, %v2218_v53  ;;  %v267_v56 = vmul.f32 %v2207_v11, %v2218_v53  ;;  %v268_v7 = vmul.f32 %v2208_v8, %v2218_v53 }
  0x2d   :  { %v269_v12 = vmul.f32 %v2209_v3, %v2218_v53  ;;  %v270_v58 = vmul.f32 %v2210_v15, %v2218_v53  ;;  %v271_v28 = vmul.f32 %v2219_v27, %v2218_v53  ;;  %v272_v59 = vmul.f32 %v2211_v24, %v2218_v53 }
  0x2e   :  { %v273_v29 = vmul.f32 %v2212_v35, %v2218_v53  ;;  %v274_v30 = vmul.f32 %v2213_v37, %v2218_v53  ;;  %v275_v60 = vmul.f32 %v2214_v40, %v2218_v53  ;;  %v276_v31 = vmul.f32 %v2215_v43, %v2218_v53 }
  0x2f   :  { %v277_v32 = vmul.f32 %v2216_v57, %v2218_v53  ;;  %v278_v61 = vmul.f32 %v2217_v45, %v2218_v53  ;;  %v279_v34 = vmul.f32 %v2220_v33, %v2218_v53  ;;  %v280_v62 = vadd.f32 %v264_v54, %v247_v55 }
  0x30   :  { %v281_v25 = vadd.f32 %v265_v5, %v248_v1  ;;  %v282_v22 = vadd.f32 %v266_v6, %v249_v38  ;;  %v283_v17 = vadd.f32 %v267_v56, %v250_v13  ;;  %v284_v10 = vadd.f32 %v268_v7, %v251_v14 }
  0x31   :  { %v285_v4 = vadd.f32 %v269_v12, %v252_v19  ;;  %v286_v9 = vadd.f32 %v270_v58, %v253_v52  ;;  %v287_v21 = vadd.f32 %v271_v28, %v254_v42  ;;  %v288_v2 = vadd.f32 %v272_v59, %v255_v16 }
  0x32   :  { %v289_v36 = vadd.f32 %v273_v29, %v256_v26  ;;  %v290_v39 = vadd.f32 %v274_v30, %v257_v46  ;;  %v291_v41 = vadd.f32 %v275_v60, %v258_v47  ;;  %v292_v44 = vadd.f32 %v276_v31, %v259_v48  ;;  %v2222_v48 = vld [vmem:[#allocation16_spill] sm:$0xff]  ;;  %v2223_v31 = vld [vmem:[#allocation2_spill] sm:$0xff] }
  0x33   :  { %v293_v0 = vadd.f32 %v277_v32, %v260_v49  ;;  %v294_v20 = vadd.f32 %v278_v61, %v261_v50  ;;  %v295_v24 = vadd.f32 %v279_v34, %v262_v51  ;;  %v297_v45 = vmul.f32 %v2205_v23, %v2221_v63 }
  0x34   :  { %v298_v55 = vmul.f32 %v2206_v18, %v2221_v63  ;;  %v299_v1 = vmul.f32 %v2207_v11, %v2221_v63  ;;  %v300_v38 = vmul.f32 %v2208_v8, %v2221_v63  ;;  %v301_v13 = vmul.f32 %v2209_v3, %v2221_v63 }
  0x35   :  { %v302_v14 = vmul.f32 %v2210_v15, %v2221_v63  ;;  %v303_v19 = vmul.f32 %v2219_v27, %v2221_v63  ;;  %v304_v52 = vmul.f32 0.0, %v2221_v63  ;;  %v305_v42 = vmul.f32 %v2212_v35, %v2221_v63 }
  0x36   :  { %v306_v16 = vmul.f32 %v2213_v37, %v2221_v63  ;;  %v307_v26 = vmul.f32 %v2214_v40, %v2221_v63  ;;  %v308_v46 = vmul.f32 %v2215_v43, %v2221_v63  ;;  %v309_v47 = vmul.f32 %v2216_v57, %v2221_v63 }
  0x37   :  { %v310_v49 = vmul.f32 %v2222_v48, %v2221_v63  ;;  %v311_v50 = vmul.f32 %v2220_v33, %v2221_v63  ;;  %v1700_v51 = vadd.f32 %v297_v45, %v280_v62  ;;  %v1702_v53 = vadd.f32 %v298_v55, %v281_v25  ;;  %v2226_v55 = vld [vmem:[#allocation19_spill] sm:$0xff] }
  0x38   :  { %v1704_v54 = vadd.f32 %v299_v1, %v282_v22  ;;  %v1706_v5 = vadd.f32 %v300_v38, %v283_v17  ;;  %v1708_v6 = vadd.f32 %v301_v13, %v284_v10  ;;  %v1710_v56 = vadd.f32 %v302_v14, %v285_v4  ;;  %v2224_v4 = vld [vmem:[#allocation10_spill] sm:$0xff]  ;;  %v2227_v38 = vld [vmem:[#allocation20_spill] sm:$0xff] }
  0x39   :  { %v1712_v7 = vadd.f32 %v303_v19, %v286_v9  ;;  %v1714_v12 = vadd.f32 %v304_v52, %v287_v21  ;;  %v1716_v58 = vadd.f32 %v305_v42, %v288_v2  ;;  %v1718_v28 = vadd.f32 %v306_v16, %v289_v36 }
  0x3a   :  { %v1720_v63 = vadd.f32 %v307_v26, %v290_v39  ;;  %v1722_v45 = vadd.f32 %v308_v46, %v291_v41  ;;  %v1724_v59 = vadd.f32 %v309_v47, %v292_v44  ;;  %v1726_v29 = vadd.f32 %v310_v49, %v293_v0  ;;  %v2225_v0 = vld [vmem:[#allocation18_spill] sm:$0xff] }
  0x3b   :  { %v1728_v30 = vadd.f32 %v311_v50, %v294_v20  ;;  %v1730_v60 = vadd.f32 %v304_v52, %v295_v24  ;;  %v328_v32 = vrot.slane %v2223_v31, 1  ;;  %v329_v61 = vrot.slane %v2205_v23, 1 }
  0x3c   :  { %v330_v34 = vrot.slane %v2206_v18, 1  ;;  %v331_v62 = vrot.slane %v2207_v11, 1  ;;  %v332_v25 = vrot.slane %v2208_v8, 1  ;;  %v333_v22 = vrot.slane %v2209_v3, 1 }
  0x3d   :  { %v334_v17 = vrot.slane %v2210_v15, 1  ;;  %v335_v10 = vrot.slane %v2219_v27, 1  ;;  %v336_v9 = vrot.slane %v2224_v4, 1  ;;  %v337_v24 = vrot.slane %v2212_v35, 1 }
  0x3e   :  { %v338_v21 = vrot.slane %v2213_v37, 1  ;;  %v339_v2 = vrot.slane %v2214_v40, 1  ;;  %v340_v36 = vrot.slane %v2215_v43, 1  ;;  %v341_v39 = vrot.slane %v2216_v57, 1 }
  0x3f   :  { %v342_v41 = vrot.slane %v2222_v48, 1  ;;  %v343_v44 = vrot.slane %v2220_v33, 1  ;;  %v377_v20 = vperm.slane %v2225_v0, 2  ;;  %v1750_v1 = vperm.slane %v2226_v55, 2 }
  0x40   :  { %v1753_v13 = vperm.slane %v2227_v38, 2  ;;  %v361_v14 = vsel %vm360_vm1, %v328_v32, 0.0  ;;  %v1757_v19 = vsel %vm360_vm1, %v329_v61, 0.0  ;;  %v1760_v52 = vsel %vm360_vm1, %v330_v34, 0.0 }
  0x41   :  { %v1763_v42 = vsel %vm360_vm1, %v331_v62, 0.0  ;;  %v1766_v16 = vsel %vm360_vm1, %v332_v25, 0.0  ;;  %v1769_v26 = vsel %vm360_vm1, %v333_v22, 0.0  ;;  %v1772_v46 = vsel %vm360_vm1, %v334_v17, 0.0 }
  0x42   :  { %v1775_v47 = vsel %vm360_vm1, %v335_v10, 0.0  ;;  %v369_v49 = vsel %vm360_vm1, %v336_v9, 0.0  ;;  %v1779_v50 = vsel %vm360_vm1, %v337_v24, 0.0  ;;  %v1782_v32 = vsel %vm360_vm1, %v338_v21, 0.0 }
  0x43   :  { %v1785_v61 = vsel %vm360_vm1, %v339_v2, 0.0  ;;  %v1788_v34 = vsel %vm360_vm1, %v340_v36, 0.0  ;;  %v1791_v62 = vsel %vm360_vm1, %v341_v39, 0.0  ;;  %v1794_v25 = vsel %vm360_vm1, %v342_v41, 0.0 }
  0x44   :  { %2228 = vst [vmem:[#allocation21_spill] sm:$0xff] %v1794_v25  ;;  %v1797_v22 = vsel %vm360_vm1, %v343_v44, 0.0  ;;  %v378_v17 = vmul.f32 0.0, %v377_v20  ;;  %v379_v10 = vmul.f32 %v377_v20, %v361_v14  ;;  %v380_v9 = vmul.f32 %v377_v20, %v1757_v19 }
  0x45   :  { %v381_v24 = vmul.f32 %v377_v20, %v1760_v52  ;;  %v382_v21 = vmul.f32 %v377_v20, %v1763_v42  ;;  %v383_v2 = vmul.f32 %v377_v20, %v1766_v16  ;;  %v384_v36 = vmul.f32 %v377_v20, %v1769_v26 }
  0x46   :  { %v385_v39 = vmul.f32 %v377_v20, %v1772_v46  ;;  %v386_v0 = vmul.f32 %v377_v20, %v369_v49  ;;  %v387_v41 = vmul.f32 %v377_v20, %v1779_v50  ;;  %v388_v44 = vmul.f32 %v377_v20, %v1782_v32 }
  0x47   :  { %v389_v55 = vmul.f32 %v377_v20, %v1785_v61  ;;  %v390_v38 = vmul.f32 %v377_v20, %v1788_v34  ;;  %v391_v33 = vmul.f32 %v377_v20, %v1791_v62  ;;  %v392_v48 = vmul.f32 %v377_v20, %v1794_v25 }
  0x48   :  { %v393_v35 = vadd.f32 %v378_v17, %v1700_v51  ;;  %v394_v4 = vadd.f32 %v379_v10, %v1702_v53  ;;  %v395_v57 = vadd.f32 %v380_v9, %v1704_v54  ;;  %v396_v43 = vadd.f32 %v381_v24, %v1706_v5 }
  0x49   :  { %v397_v27 = vadd.f32 %v382_v21, %v1708_v6  ;;  %v398_v15 = vadd.f32 %v383_v2, %v1710_v56  ;;  %v399_v11 = vadd.f32 %v384_v36, %v1712_v7  ;;  %v400_v18 = vadd.f32 %v385_v39, %v1714_v12 }
  0x4a   :  { %v401_v40 = vadd.f32 %v378_v17, %v1716_v58  ;;  %v402_v20 = vadd.f32 %v386_v0, %v1718_v28  ;;  %v403_v51 = vadd.f32 %v387_v41, %v1720_v63  ;;  %v404_v53 = vadd.f32 %v388_v44, %v1722_v45 }
  0x4b   :  { %v405_v54 = vadd.f32 %v389_v55, %v1724_v59  ;;  %v406_v5 = vadd.f32 %v390_v38, %v1726_v29  ;;  %v407_v6 = vadd.f32 %v391_v33, %v1728_v30  ;;  %v408_v56 = vadd.f32 %v392_v48, %v1730_v60 }
  0x4c   :  { %v410_v7 = vmul.f32 %v1750_v1, %v361_v14  ;;  %v411_v12 = vmul.f32 %v1750_v1, %v1757_v19  ;;  %v412_v58 = vmul.f32 %v1750_v1, %v1760_v52  ;;  %v413_v28 = vmul.f32 %v1750_v1, %v1763_v42 }
  0x4d   :  { %v414_v63 = vmul.f32 %v1750_v1, %v1766_v16  ;;  %v415_v45 = vmul.f32 %v1750_v1, %v1769_v26  ;;  %v416_v33 = vmul.f32 %v1750_v1, %v1772_v46  ;;  %v417_v48 = vmul.f32 %v1750_v1, %v1775_v47 }
  0x4e   :  { %v418_v59 = vmul.f32 %v1750_v1, %v369_v49  ;;  %v419_v29 = vmul.f32 %v1750_v1, %v1779_v50  ;;  %v420_v30 = vmul.f32 %v1750_v1, %v1782_v32  ;;  %v421_v60 = vmul.f32 %v1750_v1, %v1785_v61 }
  0x4f   :  { %v422_v14 = vmul.f32 %v1750_v1, %v1788_v34  ;;  %v423_v17 = vmul.f32 %v1750_v1, %v1791_v62  ;;  %v424_v10 = vmul.f32 %v1750_v1, %v1794_v25  ;;  %v425_v49 = vmul.f32 %v1750_v1, %v1797_v22 }
  0x50   :  { %v426_v9 = vadd.f32 %v410_v7, %v393_v35  ;;  %v427_v24 = vadd.f32 %v411_v12, %v394_v4  ;;  %v428_v21 = vadd.f32 %v412_v58, %v395_v57  ;;  %v429_v2 = vadd.f32 %v413_v28, %v396_v43  ;;  %v1252_v58 = vld [vmem:[%s2120_s3] ss:$0 sm:$0xff] }
  0x51   :  { %v430_v36 = vadd.f32 %v414_v63, %v397_v27  ;;  %v431_v39 = vadd.f32 %v415_v45, %v398_v15  ;;  %v432_v0 = vadd.f32 %v416_v33, %v399_v11  ;;  %v433_v41 = vadd.f32 %v417_v48, %v400_v18 }
  0x52   :  { %v434_v44 = vadd.f32 %v418_v59, %v401_v40  ;;  %v435_v55 = vadd.f32 %v419_v29, %v402_v20  ;;  %v436_v38 = vadd.f32 %v420_v30, %v403_v51  ;;  %v437_v37 = vadd.f32 %v421_v60, %v404_v53 }
  0x53   :  { %v438_v3 = vadd.f32 %v422_v14, %v405_v54  ;;  %v439_v8 = vadd.f32 %v423_v17, %v406_v5  ;;  %v440_v23 = vadd.f32 %v424_v10, %v407_v6  ;;  %v441_v31 = vadd.f32 %v425_v49, %v408_v56 }
  0x54   :  { %v443_v25 = vmul.f32 %v1753_v13, %v1757_v19  ;;  %v444_v35 = vmul.f32 %v1753_v13, %v1760_v52  ;;  %v445_v43 = vmul.f32 %v1753_v13, %v1763_v42  ;;  %v446_v18 = vmul.f32 %v1753_v13, %v1766_v16  ;;  %v2229_v42 = vld [vmem:[#allocation21_spill] sm:$0xff] }
  0x55   :  { %v447_v11 = vmul.f32 %v1753_v13, %v1769_v26  ;;  %v448_v15 = vmul.f32 %v1753_v13, %v1772_v46  ;;  %v449_v40 = vmul.f32 %v1753_v13, %v1775_v47  ;;  %v450_v57 = vmul.f32 0.0, %v1753_v13 }
  0x56   :  { %v451_v27 = vmul.f32 %v1753_v13, %v1779_v50  ;;  %v452_v4 = vmul.f32 %v1753_v13, %v1782_v32  ;;  %v453_v1 = vmul.f32 %v1753_v13, %v1785_v61  ;;  %v454_v19 = vmul.f32 %v1753_v13, %v1788_v34  ;;  %v1251_v50 = vld [vmem:[%s2119_s2] ss:$0 sm:$0xff] }
  0x57   :  { %v455_v52 = vmul.f32 %v1753_v13, %v1791_v62  ;;  %v456_v16 = vmul.f32 %v1753_v13, %v2229_v42  ;;  %v457_v26 = vmul.f32 %v1753_v13, %v1797_v22  ;;  %v458_v46 = vadd.f32 %v443_v25, %v426_v9 }
  0x58   :  { %v459_v47 = vadd.f32 %v444_v35, %v427_v24  ;;  %v460_v32 = vadd.f32 %v445_v43, %v428_v21  ;;  %v461_v61 = vadd.f32 %v446_v18, %v429_v2  ;;  %v462_v20 = vadd.f32 %v447_v11, %v430_v36 }
  0x59   :  { %v463_v51 = vadd.f32 %v448_v15, %v431_v39  ;;  %v464_v34 = vadd.f32 %v449_v40, %v432_v0  ;;  %v465_v53 = vadd.f32 %v450_v57, %v433_v41  ;;  %v466_v54 = vadd.f32 %v451_v27, %v434_v44 }
  0x5a   :  { %v467_v62 = vadd.f32 %v452_v4, %v435_v55  ;;  %v468_v5 = vadd.f32 %v453_v1, %v436_v38  ;;  %v469_v6 = vadd.f32 %v454_v19, %v437_v37  ;;  %v470_v56 = vadd.f32 %v455_v52, %v438_v3 }
  0x5b   :  { %v471_v7 = vadd.f32 %v456_v16, %v439_v8  ;;  %v472_v12 = vadd.f32 %v457_v26, %v440_v23  ;;  %v473_v13 = vadd.f32 %v450_v57, %v441_v31  ;;  %v478_v25 = vmul.f32 %v1251_v50, %v458_v46 }
  0x5c   :  { %v479_v22 = vmul.f32 %v1251_v50, %v459_v47  ;;  %v480_v28 = vmul.f32 %v1251_v50, %v460_v32  ;;  %v481_v63 = vmul.f32 %v1251_v50, %v461_v61  ;;  %v482_v45 = vmul.f32 %v1251_v50, %v462_v20 }
  0x5d   :  { %v483_v33 = vmul.f32 %v1251_v50, %v463_v51  ;;  %v484_v48 = vmul.f32 %v1251_v50, %v464_v34  ;;  %v485_v59 = vmul.f32 %v1251_v50, %v465_v53  ;;  %v486_v29 = vmul.f32 %v1251_v50, %v466_v54 }
  0x5e   :  { %v487_v30 = vmul.f32 %v1251_v50, %v467_v62  ;;  %v488_v60 = vmul.f32 %v1251_v50, %v468_v5  ;;  %v489_v37 = vmul.f32 %v1251_v50, %v469_v6  ;;  %v490_v3 = vmul.f32 %v1251_v50, %v470_v56 }
  0x5f   :  { %v491_v8 = vmul.f32 %v1251_v50, %v471_v7  ;;  %v492_v23 = vmul.f32 %v1251_v50, %v472_v12  ;;  %v493_v31 = vmul.f32 %v1251_v50, %v473_v13  ;;  %v1892_v14 = vadd.f32 %v1252_v58, %v478_v25 }
  0x60   :  { %v1894_v17 = vadd.f32 %v1252_v58, %v479_v22  ;;  %v1896_v10 = vadd.f32 %v1252_v58, %v480_v28  ;;  %v1898_v49 = vadd.f32 %v1252_v58, %v481_v63  ;;  %v1900_v9 = vadd.f32 %v1252_v58, %v482_v45 }
  0x61   :  { %v1902_v24 = vadd.f32 %v1252_v58, %v483_v33  ;;  %v1904_v21 = vadd.f32 %v1252_v58, %v484_v48  ;;  %v1906_v2 = vadd.f32 %v1252_v58, %v485_v59  ;;  %v1908_v36 = vadd.f32 %v1252_v58, %v486_v29 }
  0x62   :  { %v1910_v39 = vadd.f32 %v1252_v58, %v487_v30  ;;  %v1912_v0 = vadd.f32 %v1252_v58, %v488_v60  ;;  %v1914_v41 = vadd.f32 %v1252_v58, %v489_v37  ;;  %v1916_v44 = vadd.f32 %v1252_v58, %v490_v3 }
  0x63   :  { %v1918_v55 = vadd.f32 %v1252_v58, %v491_v8  ;;  %v1920_v38 = vadd.f32 %v1252_v58, %v492_v23  ;;  %v1922_v35 = vadd.f32 %v1252_v58, %v493_v31  ;;  %v514_v43 = vsub.f32 0.0, %v1892_v14 }
  0x64   :  { %v515_v18 = vsub.f32 0.0, %v1894_v17  ;;  %v516_v11 = vsub.f32 0.0, %v1896_v10  ;;  %v517_v15 = vsub.f32 0.0, %v1898_v49  ;;  %v518_v40 = vsub.f32 0.0, %v1900_v9 }
  0x65   :  { %v519_v57 = vsub.f32 0.0, %v1902_v24  ;;  %v520_v27 = vsub.f32 0.0, %v1904_v21  ;;  %v530_v4 = vmul.f32 1.442695, %v514_v43  ;;  %v521_v19 = vsub.f32 0.0, %v1906_v2 }
  0x66   :  { %v532_v1 = vmul.f32 1.442695, %v515_v18  ;;  %v534_v52 = vmul.f32 1.442695, %v516_v11  ;;  %v536_v42 = vmul.f32 1.442695, %v517_v15 }
  0x67   :  { %v522_v16 = vsub.f32 0.0, %v1908_v36  ;;  %1256 = vpow2.f32 %v530_v4  ;;  %v538_v26 = vmul.f32 1.442695, %v518_v40  ;;  %v523_v46 = vsub.f32 0.0, %v1910_v39 }
  0x68   :  { %1258 = vpow2.f32 %v532_v1  ;;  %v540_v47 = vmul.f32 1.442695, %v519_v57  ;;  %v524_v50 = vsub.f32 0.0, %v1912_v0  ;;  %v542_v32 = vmul.f32 1.442695, %v520_v27 }
  0x69   :  { %1260 = vpow2.f32 %v534_v52  ;;  %v525_v61 = vsub.f32 0.0, %v1914_v41  ;;  %v544_v20 = vmul.f32 1.442695, %v521_v19  ;;  %v526_v51 = vsub.f32 0.0, %v1916_v44 }
  0x6a   :  { %1262 = vpow2.f32 %v536_v42  ;;  %v546_v34 = vmul.f32 1.442695, %v522_v16  ;;  %v527_v53 = vsub.f32 0.0, %v1918_v55  ;;  %v548_v54 = vmul.f32 1.442695, %v523_v46 }
  0x6b   :  { %1264 = vpow2.f32 %v538_v26  ;;  %v528_v5 = vsub.f32 0.0, %v1920_v38  ;;  %v550_v6 = vmul.f32 1.442695, %v524_v50  ;;  %v529_v7 = vsub.f32 0.0, %v1922_v35 }
  0x6c   :  { %1266 = vpow2.f32 %v540_v47  ;;  %v552_v12 = vmul.f32 1.442695, %v525_v61  ;;  %v554_v25 = vmul.f32 1.442695, %v526_v51  ;;  %v556_v58 = vmul.f32 1.442695, %v527_v53 }
  0x6d   :  { %v1257_v62 = vpop.eup %1256  ;;  %1268 = vpow2.f32 %v542_v32  ;;  %v558_v63 = vmul.f32 1.442695, %v528_v5  ;;  %v560_v33 = vmul.f32 1.442695, %v529_v7 }
  0x6e   :  { %v1259_v56 = vpop.eup %1258  ;;  %1270 = vpow2.f32 %v544_v20  ;;  %v562_v59 = vadd.f32 1.0, %v1257_v62 }
  0x6f   :  { %v1261_v13 = vpop.eup %1260  ;;  %1272 = vpow2.f32 %v546_v34  ;;  %v563_v30 = vadd.f32 1.0, %v1259_v56 }
  0x70   :  { %v1263_v22 = vpop.eup %1262  ;;  %1274 = vpow2.f32 %v548_v54  ;;  %v564_v37 = vadd.f32 1.0, %v1261_v13 }
  0x71   :  { %v1265_v28 = vpop.eup %1264  ;;  %1276 = vpow2.f32 %v550_v6  ;;  %v565_v8 = vadd.f32 1.0, %v1263_v22 }
  0x72   :  { %v1267_v45 = vpop.eup %1266  ;;  %1278 = vpow2.f32 %v552_v12  ;;  %v566_v31 = vadd.f32 1.0, %v1265_v28 }
  0x73   :  { %v1269_v48 = vpop.eup %1268  ;;  %1280 = vpow2.f32 %v554_v25  ;;  %v567_v18 = vadd.f32 1.0, %v1267_v45 }
  0x74   :  { %v1271_v29 = vpop.eup %1270  ;;  %1282 = vpow2.f32 %v556_v58  ;;  %v568_v15 = vadd.f32 1.0, %v1269_v48 }
  0x75   :  { %v1273_v60 = vpop.eup %1272  ;;  %1284 = vpow2.f32 %v558_v63  ;;  %v569_v57 = vadd.f32 1.0, %v1271_v29  ;;  %v1330_v63 = vmov 64.0  }
  0x76   :  { %v1275_v3 = vpop.eup %1274  ;;  %1286 = vpow2.f32 %v560_v33  ;;  %v570_v4 = vadd.f32 1.0, %v1273_v60 }
  0x77   :  { %v1277_v23 = vpop.eup %1276  ;;  %1288 = vrcp.f32 %v562_v59  ;;  %v571_v19 = vadd.f32 1.0, %v1275_v3 }
  0x78   :  { %v1279_v43 = vpop.eup %1278  ;;  %1290 = vrcp.f32 %v563_v30  ;;  %v572_v42 = vadd.f32 1.0, %v1277_v23 }
  0x79   :  { %v1281_v11 = vpop.eup %1280  ;;  %1292 = vrcp.f32 %v564_v37  ;;  %v573_v26 = vadd.f32 1.0, %v1279_v43 }
  0x7a   :  { %v1283_v40 = vpop.eup %1282  ;;  %1294 = vrcp.f32 %v565_v8  ;;  %v574_v50 = vadd.f32 1.0, %v1281_v11 }
  0x7b   :  { %v1285_v27 = vpop.eup %1284  ;;  %1296 = vrcp.f32 %v566_v31  ;;  %v575_v20 = vadd.f32 1.0, %v1283_v40 }
  0x7c   :  { %v1287_v1 = vpop.eup %1286  ;;  %1298 = vrcp.f32 %v567_v18  ;;  %v576_v62 = vadd.f32 1.0, %v1285_v27 }
  0x7d   :  { %v1289_v52 = vpop.eup %1288  ;;  %1300 = vrcp.f32 %v568_v15  ;;  %v577_v56 = vadd.f32 1.0, %v1287_v1 }
  0x7e   :  { %v1291_v16 = vpop.eup %1290  ;;  %1302 = vrcp.f32 %v569_v57  ;;  %v1941_v46 = vmul.f32 %v1289_v52, %v1892_v14 }
  0x7f   :  { %v1293_v47 = vpop.eup %1292  ;;  %1304 = vrcp.f32 %v570_v4  ;;  %v1944_v32 = vmul.f32 %v1291_v16, %v1894_v17 }
  0x80   :  { %v1295_v61 = vpop.eup %1294  ;;  %1306 = vrcp.f32 %v571_v19  ;;  %v1947_v51 = vmul.f32 %v1293_v47, %v1896_v10 }
  0x81   :  { %v1297_v34 = vpop.eup %1296  ;;  %1308 = vrcp.f32 %v572_v42  ;;  %v1950_v53 = vmul.f32 %v1295_v61, %v1898_v49  ;;  %v610_v14 = vadd.f32 %v1944_v32, %v1941_v46 }
  0x82   :  { %v1299_v54 = vpop.eup %1298  ;;  %1310 = vrcp.f32 %v573_v26  ;;  %v1955_v17 = vmul.f32 %v1297_v34, %v1900_v9 }
  0x83   :  { %v1301_v5 = vpop.eup %1300  ;;  %1312 = vrcp.f32 %v574_v50  ;;  %v611_v6 = vadd.f32 %v610_v14, %v1947_v51  ;;  %v1959_v49 = vmul.f32 %v1299_v54, %v1902_v24 }
  0x84   :  { %v1303_v10 = vpop.eup %1302  ;;  %1314 = vrcp.f32 %v575_v20  ;;  %v1966_v9 = vmul.f32 %v1301_v5, %v1904_v21 }
  0x85   :  { %v1305_v7 = vpop.eup %1304  ;;  %v612_v12 = vadd.f32 %v611_v6, %v1950_v53  ;;  %1316 = vrcp.f32 %v576_v62 }
  0x86   :  { %v1307_v13 = vpop.eup %1306  ;;  %v1963_v25 = vmul.f32 %v1305_v7, %v1908_v36  ;;  %1318 = vrcp.f32 %v1330_v63  ;;  %v1976_v36 = vmul.f32 %v1303_v10, %v1906_v2  ;;  %v1139_v2 = vld [vmem:[%s2123_s6 + $0x38] sm:$0xff]  ;;  %v1138_v7 = vld [vmem:[%s2123_s6 + $0x30] sm:$0xff]  ;;  %v1133_v63 = vld [vmem:[%s2123_s6 + $0x8] sm:$0xff] }
  0x87   :  { %v1309_v22 = vpop.eup %1308  ;;  %v1969_v58 = vmul.f32 %v1307_v13, %v1910_v39  ;;  %v613_v28 = vadd.f32 %v612_v12, %v1955_v17  ;;  %1320 = vrcp.f32 %v577_v56  ;;  %811 = vmatpush.bf16.msrb.mxu1 %v1139_v2  ;;  %v1137_v12 = vld [vmem:[%s2123_s6 + $0x28] sm:$0xff]  ;;  %v1136_v13 = vld [vmem:[%s2123_s6 + $0x20] sm:$0xff] }
  0x88   :  { %v1311_v24 = vpop.eup %1310  ;;  %v1973_v45 = vmul.f32 %v1309_v22, %v1912_v0  ;;  %v1135_v22 = vld [vmem:[%s2123_s6 + $0x18] sm:$0xff] }
  0x89   :  { %v1313_v33 = vpop.eup %1312  ;;  %v1979_v48 = vmul.f32 %v1311_v24, %v1914_v41  ;;  %v614_v21 = vadd.f32 %v613_v28, %v1959_v49  ;;  %v623_v39 = vadd.f32 %v1969_v58, %v1963_v25  ;;  %v1134_v28 = vld [vmem:[%s2123_s6 + $0x10] sm:$0xff]  ;;  %v1132_v24 = vld [vmem:[%s2123_s6] sm:$0xff] }
  0x8a   :  { %v1315_v59 = vpop.eup %1314  ;;  %v1985_v29 = vmul.f32 %v1313_v33, %v1916_v44  ;;  %v1147_v33 = vld [vmem:[%s2125_s8 + $0x38] sm:$0xff] }
  0x8b   :  { %v615_v30 = vadd.f32 %v614_v21, %v1966_v9  ;;  %v624_v0 = vadd.f32 %v623_v39, %v1973_v45  ;;  %v1317_v60 = vpop.eup %1316  ;;  %v1993_v37 = vmul.f32 %v1315_v59, %v1918_v55  ;;  %812 = vmatpush.bf16.msrb.mxu1 %v1138_v7  ;;  %v1253_v21 = vld [vmem:[%s2122_s5] ss:$0 sm:$0xff]  ;;  %927 = vmatpush.bf16.msra.mxu0 %v1147_v33 }
  0x8c   :  { %v1319_v41 = vpop.eup %1318  ;;  %v1998_v31 = vmul.f32 %v1317_v60, %v1920_v38  ;;  %1234 = vmatpush.bf16.msra.mxu2 %v1147_v33  ;;  %1235 = vmatpush.bf16.msra.mxu3 %v1147_v33 }
  0x8d   :  { %v616_v3 = vadd.f32 %v615_v30, %v1976_v36  ;;  %v625_v8 = vadd.f32 %v624_v0, %v1979_v48  ;;  %v1321_v23 = vpop.eup %1320  ;;  %v637_v44 = vmul.f32 64.0, %v1319_v41  ;;  %vm641_vm2 = vweird.f32 %v1319_v41 }
  0x8e   :  { %v2002_v15 = vmul.f32 %v1321_v23, %v1922_v35 }
  0x8f   :  { %v617_v43 = vrot.slane %v616_v3, 4  ;;  %v626_v18 = vadd.f32 %v625_v8, %v1985_v29  ;;  %v638_v11 = vsub.f32 1.0, %v637_v44  ;;  %813 = vmatpush.bf16.msrb.mxu1 %v1137_v12  ;;  %v1146_v44 = vld [vmem:[%s2125_s8 + $0x30] sm:$0xff] }
  0x90   :  { %928 = vmatpush.bf16.msra.mxu0 %v1146_v44  ;;  %1236 = vmatpush.bf16.msra.mxu2 %v1146_v44 }
  0x91   :  { %v618_v40 = vadd.f32 %v617_v43, %v616_v3  ;;  %v627_v55 = vadd.f32 %v626_v18, %v1993_v37  ;;  %v639_v57 = vmul.f32 %v1319_v41, %v638_v11  ;;  %1237 = vmatpush.bf16.msra.mxu3 %v1146_v44  ;;  %v1145_v43 = vld [vmem:[%s2125_s8 + $0x28] sm:$0xff]  ;;  %v1144_v18 = vld [vmem:[%s2125_s8 + $0x20] sm:$0xff]  ;;  %v1143_v11 = vld [vmem:[%s2125_s8 + $0x18] sm:$0xff] }
  0x92   :  { %v2233_v44 = vld [vmem:[#allocation7_spill] sm:$0xff] }
  0x93   :  { %v619_v27 = vrot.slane %v618_v40, 2  ;;  %v628_v4 = vadd.f32 %v627_v55, %v1998_v31  ;;  %v640_v52 = vadd.f32 %v1319_v41, %v639_v57  ;;  %814 = vmatpush.bf16.msrb.mxu1 %v1136_v13  ;;  %v1141_v55 = vld [vmem:[%s2125_s8 + $0x8] sm:$0xff]  ;;  %v1140_v57 = vld [vmem:[%s2125_s8] sm:$0xff] }
  0x94   :  { %929 = vmatpush.bf16.msra.mxu0 %v1145_v43  ;;  %1238 = vmatpush.bf16.msra.mxu2 %v1145_v43 }
  0x95   :  { %v620_v1 = vadd.f32 %v619_v27, %v618_v40  ;;  %v629_v19 = vadd.f32 %v628_v4, %v2002_v15  ;;  %v642_v47 = vsel %vm641_vm2, %v1319_v41, %v640_v52  ;;  %1239 = vmatpush.bf16.msra.mxu3 %v1145_v43  ;;  %v1142_v40 = vld [vmem:[%s2125_s8 + $0x10] sm:$0xff]  ;;  %v1254_v27 = vld [vmem:[%s2124_s7] ss:$0 sm:$0xff] }
  0x97   :  { %v621_v38 = vrot.slane %v620_v1, 1  ;;  %v630_v42 = vrot.slane %v629_v19, 4  ;;  %815 = vmatpush.bf16.msrb.mxu1 %v1135_v22 }
  0x98   :  { %930 = vmatpush.bf16.msra.mxu0 %v1144_v18  ;;  %1240 = vmatpush.bf16.msra.mxu2 %v1144_v18 }
  0x99   :  { %v622_v16 = vadd.f32 %v621_v38, %v620_v1  ;;  %v631_v26 = vadd.f32 %v630_v42, %v629_v19  ;;  %1241 = vmatpush.bf16.msra.mxu3 %v1144_v18  ;;  %v2234_v18 = vld [vmem:[#allocation12_spill] sm:$0xff] }
  0x9b   :  { %v632_v50 = vrot.slane %v631_v26, 2  ;;  %v643_v61 = vmul.f32 %v642_v47, %v622_v16  ;;  %816 = vmatpush.bf16.msrb.mxu1 %v1134_v28 }
  0x9c   :  { %931 = vmatpush.bf16.msra.mxu0 %v1143_v11  ;;  %1242 = vmatpush.bf16.msra.mxu2 %v1143_v11 }
  0x9d   :  { %v633_v35 = vadd.f32 %v632_v50, %v631_v26  ;;  %v645_v14 = vpack.c.bf16 %v643_v61, %v643_v61  ;;  %1243 = vmatpush.bf16.msra.mxu3 %v1143_v11 }
  0x9f   :  { %v634_v20 = vrot.slane %v633_v35, 1  ;;  %v669_v5 = vunpack.c.l.b16 %v645_v14  ;;  %817 = vmatpush.bf16.msrb.mxu1 %v1133_v63 }
  0xa0   :  { %932 = vmatpush.bf16.msra.mxu0 %v1142_v40  ;;  %1244 = vmatpush.bf16.msra.mxu2 %v1142_v40 }
  0xa1   :  { %v635_v34 = vadd.f32 %v634_v20, %v633_v35  ;;  %1245 = vmatpush.bf16.msra.mxu3 %v1142_v40  ;;  %v2235_v40 = vld [vmem:[#allocation13_spill] sm:$0xff] }
  0xa3   :  { %v644_v54 = vmul.f32 %v642_v47, %v635_v34  ;;  %818 = vmatpush.bf16.msrb.mxu1 %v1132_v24 }
  0xa4   :  { %933 = vmatpush.bf16.msra.mxu0 %v1141_v55  ;;  %1246 = vmatpush.bf16.msra.mxu2 %v1141_v55 }
  0xa5   :  { %v646_v62 = vpack.c.bf16 %v644_v54, %v644_v54  ;;  %1247 = vmatpush.bf16.msra.mxu3 %v1141_v55 }
  0xa7   :  { %v670_v6 = vunpack.c.l.b16 %v646_v62 }
  0xa8   :  { %934 = vmatpush.bf16.msra.mxu0 %v1140_v57  ;;  %1248 = vmatpush.bf16.msra.mxu2 %v1140_v57 }
  0xa9   :  { %v672_v10 = vsel %vm671_vm3, %v670_v6, %v669_v5  ;;  %1249 = vmatpush.bf16.msra.mxu3 %v1140_v57 }
  0xaa   :  { %v673_v56 = vpack.c.b16 %v672_v10, %v672_v10 }
  0xac   :  { %731 = vmatmul.bf16.vlgmr.msra.gmra.mxu1 %v673_v56 }
 0x129   :  { %v732_v39 = vpop.f32.mrf.mxu1 }
 0x12a   :  { %v733_v59 = vadd.f32 %v1253_v21, %v732_v39  ;;  %v2230_v21 = vld [vmem:[#allocation2_spill] sm:$0xff]  ;;  %v2231_v39 = vld [vmem:[#allocation3_spill] sm:$0xff] }
 0x12c   :  { %v736_v30 = vsub.f32 0.0, %v733_v59 }
 0x12e   :  { %v737_v0 = vmul.f32 1.442695, %v736_v30 }
 0x130   :  { %1322 = vpow2.f32 %v737_v0 }
 0x131   :  { %v734_v60 = vpop.f32.mrf.mxu1 }
 0x136   :  { %v1323_v2 = vpop.eup %1322 }
 0x137   :  { %v739_v41 = vadd.f32 1.0, %v1323_v2 }
 0x139   :  { %1324 = vrcp.f32 %v739_v41 }
 0x13f   :  { %v1325_v3 = vpop.eup %1324 }
 0x140   :  { %v741_v8 = vmul.f32 %v1325_v3, %v733_v59 }
 0x142   :  { %v742_v23 = vpack.c.bf16 %v741_v8, %v741_v8  ;;  %v2232_v8 = vld [vmem:[#allocation6_spill] sm:$0xff] }
 0x144   :  { %819 = vmatmul.bf16.vlgmr.msrb.gmra.mxu1 %v742_v23 }
 0x1c1   :  { %v820_v4 = vpop.f32.mrf.mxu1 }
 0x1c2   :  { %v821_v1 = vadd.f32 %v1254_v27, %v820_v4 }
 0x1c4   :  { %v824_v19 = vsub.f32 0.0, %v821_v1 }
 0x1c6   :  { %v825_v52 = vmul.f32 1.442695, %v824_v19 }
 0x1c8   :  { %1326 = vpow2.f32 %v825_v52 }
 0x1c9   :  { %v822_v38 = vpop.f32.mrf.mxu1 }
 0x1ce   :  { %v1327_v42 = vpop.eup %1326 }
 0x1cf   :  { %v827_v16 = vadd.f32 1.0, %v1327_v42  ;;  %v2236_v42 = vld [vmem:[#allocation4_spill] sm:$0xff] }
 0x1d1   :  { %1328 = vrcp.f32 %v827_v16 }
 0x1d7   :  { %v1329_v26 = vpop.eup %1328 }
 0x1d8   :  { %v830_v47 = vrot.slane %v1329_v26, 1  ;;  %v831_v50 = vperm.slane %v1329_v26, 0  ;;  %v2237_v26 = vld [vmem:[#allocation5_spill] sm:$0xff] }
 0x1da   :  { %v832_v35 = vperm.slane %v830_v47, 0  ;;  %v835_v61 = vmul.f32 %v831_v50, %v1941_v46  ;;  %v836_v20 = vmul.f32 %v831_v50, %v1944_v32  ;;  %v839_v34 = vmul.f32 %v831_v50, %v1955_v17 }
 0x1db   :  { %v840_v14 = vmul.f32 %v831_v50, %v1959_v49  ;;  %v837_v56 = vmul.f32 %v831_v50, %v1947_v51  ;;  %v838_v46 = vmul.f32 %v831_v50, %v1950_v53  ;;  %v841_v32 = vmul.f32 %v831_v50, %v1966_v9 }
 0x1dc   :  { %v851_v54 = vpack.c.bf16 %v836_v20, %v835_v61  ;;  %v845_v62 = vmul.f32 %v832_v35, %v1973_v45  ;;  %v846_v5 = vmul.f32 %v832_v35, %v1979_v48  ;;  %v842_v17 = vmul.f32 %v831_v50, %v1976_v36 }
 0x1dd   :  { %v853_v6 = vpack.c.bf16 %v840_v14, %v839_v34  ;;  %v847_v49 = vmul.f32 %v832_v35, %v1985_v29  ;;  %v848_v7 = vmul.f32 %v832_v35, %v1993_v37  ;;  %v852_v45 = vpack.c.bf16 %v838_v46, %v837_v56  ;;  %v1255_v37 = vld [vmem:[%s2126_s9] ss:$0 sm:$0xff] }
 0x1de   :  { %935 = vmatmul.bf16.vlgmr.msra.gmra.mxu0 %v851_v54  ;;  %v856_v10 = vpack.c.bf16 %v846_v5, %v845_v62  ;;  %v854_v12 = vpack.c.bf16 %v842_v17, %v841_v32  ;;  %v843_v13 = vmul.f32 %v832_v35, %v1963_v25  ;;  %v844_v51 = vmul.f32 %v832_v35, %v1969_v58  ;;  %v2238_v62 = vld [vmem:[#allocation8_spill] sm:$0xff]  ;;  %v2240_v56 = vld [vmem:[#allocation14_spill] sm:$0xff]  ;;  %v2241_v32 = vld [vmem:[#allocation15_spill] sm:$0xff] }
 0x1df   :  { %945 = vmatmul.bf16.vlgmr.msra.gmra.mxu2 %v853_v6  ;;  %v857_v48 = vpack.c.bf16 %v848_v7, %v847_v49  ;;  %v849_v53 = vmul.f32 %v832_v35, %v1998_v31  ;;  %v850_v9 = vmul.f32 %v832_v35, %v2002_v15  ;;  %v2239_v6 = vld [vmem:[#allocation9_spill] sm:$0xff] }
 0x1e0   :  { %960 = vmatmul.bf16.vlgmr.msra.gmra.mxu3 %v856_v10  ;;  %v855_v22 = vpack.c.bf16 %v844_v51, %v843_v13 }
 0x1e1   :  { %v858_v36 = vpack.c.bf16 %v850_v9, %v849_v53 }
 0x1ee   :  { %940 = vmatmul.bf16.gmra.mxu0 %v852_v45 }
 0x1ef   :  { %950 = vmatmul.bf16.gmra.mxu2 %v854_v12 }
 0x1f0   :  { %965 = vmatmul.bf16.gmra.mxu3 %v857_v48 }
 0x1ff   :  { %955 = vmatmul.bf16.gmra.mxu2 %v855_v22 }
 0x200   :  { %970 = vmatmul.bf16.gmra.mxu3 %v858_v36  ;;  %v2242_v36 = vld [vmem:[#allocation10_spill] sm:$0xff] }
 0x25b   :  { %v936_v29 = vpop.f32.mrf.mxu0 }
 0x25c   :  { %v937_v28 = vadd.f32 %v1255_v37, %v936_v29 }
 0x25e   :  { %v976_v58 = vadd.f32 %v2230_v21, %v937_v28  ;;  %v2243_v28 = vld [vmem:[#allocation11_spill] sm:$0xff] }
 0x262   :  { %v946_v63 = vpop.f32.mrf.mxu2 }
 0x263   :  { %v938_v24 = vpop.f32.mrf.mxu0  ;;  %v961_v33 = vpop.f32.mrf.mxu3  ;;  %v947_v15 = vadd.f32 %v1255_v37, %v946_v63 }
 0x264   :  { %v939_v25 = vadd.f32 %v1255_v37, %v938_v24  ;;  %v962_v30 = vadd.f32 %v1255_v37, %v961_v33  ;;  %v2244_v24 = vld [vmem:[#allocation16_spill] sm:$0xff] }
 0x265   :  { %v980_v23 = vadd.f32 %v2232_v8, %v947_v15 }
 0x266   :  { %v977_v31 = vadd.f32 %v2231_v39, %v939_v25  ;;  %v986_v11 = vadd.f32 %v2234_v18, %v962_v30  ;;  %v2245_v25 = vld [vmem:[#allocation17_spill] sm:$0xff] }
 0x268   :  { %v1183_v59 = vpack.c.bf16 %v977_v31, %v976_v58 }
 0x26a   :  { %1184 = vst [vmem:[%s2127_s10] sm:$0xff] %v1183_v59   ;;  %v948_v0 = vpop.f32.mrf.mxu2 }
 0x26b   :  { %v949_v60 = vadd.f32 %v1255_v37, %v948_v0  ;;  %v941_v2 = vpop.f32.mrf.mxu0  ;;  %v963_v41 = vpop.f32.mrf.mxu3 }
 0x26c   :  { %v964_v3 = vadd.f32 %v1255_v37, %v963_v41  ;;  %v942_v4 = vadd.f32 %v1255_v37, %v941_v2 }
 0x26d   :  { %v981_v43 = vadd.f32 %v2233_v44, %v949_v60 }
 0x26e   :  { %v987_v55 = vadd.f32 %v2235_v40, %v964_v3  ;;  %v978_v16 = vadd.f32 %v2236_v42, %v942_v4 }
 0x26f   :  { %v1193_v57 = vpack.c.bf16 %v981_v43, %v980_v23 }
 0x270   :  { %v1208_v27 = vpack.c.bf16 %v987_v55, %v986_v11 }
 0x271   :  { %1228 = vst [vmem:[%s2127_s10 + $0x10] sm:$0xff] %v1193_v57  }
 0x272   :  { %1231 = vst [vmem:[%s2127_s10 + $0x28] sm:$0xff] %v1208_v27   ;;  %v951_v1 = vpop.f32.mrf.mxu2 }
 0x273   :  { %v943_v19 = vpop.f32.mrf.mxu0  ;;  %v966_v52 = vpop.f32.mrf.mxu3  ;;  %v952_v35 = vadd.f32 %v1255_v37, %v951_v1 }
 0x274   :  { %v944_v38 = vadd.f32 %v1255_v37, %v943_v19  ;;  %v967_v61 = vadd.f32 %v1255_v37, %v966_v52 }
 0x275   :  { %v982_v5 = vadd.f32 %v2238_v62, %v952_v35 }
 0x276   :  { %v979_v47 = vadd.f32 %v2237_v26, %v944_v38  ;;  %v988_v46 = vadd.f32 %v2240_v56, %v967_v61 }
 0x278   :  { %v1188_v50 = vpack.c.bf16 %v979_v47, %v978_v16 }
 0x27a   :  { %1227 = vst [vmem:[%s2127_s10 + $0x8] sm:$0xff] %v1188_v50   ;;  %v953_v20 = vpop.f32.mrf.mxu2 }
 0x27b   :  { %v954_v34 = vadd.f32 %v1255_v37, %v953_v20  ;;  %v968_v14 = vpop.f32.mrf.mxu3 }
 0x27c   :  { %v969_v54 = vadd.f32 %v1255_v37, %v968_v14 }
 0x27d   :  { %v983_v10 = vadd.f32 %v2239_v6, %v954_v34 }
 0x27e   :  { %v989_v17 = vadd.f32 %v2241_v32, %v969_v54 }
 0x27f   :  { %v1198_v49 = vpack.c.bf16 %v983_v10, %v982_v5 }
 0x280   :  { %v1213_v7 = vpack.c.bf16 %v989_v17, %v988_v46 }
 0x281   :  { %1229 = vst [vmem:[%s2127_s10 + $0x18] sm:$0xff] %v1198_v49  }
 0x282   :  { %1232 = vst [vmem:[%s2127_s10 + $0x30] sm:$0xff] %v1213_v7   ;;  %v956_v45 = vpop.f32.mrf.mxu2 }
 0x283   :  { %v971_v12 = vpop.f32.mrf.mxu3  ;;  %v957_v48 = vadd.f32 %v1255_v37, %v956_v45 }
 0x284   :  { %v972_v13 = vadd.f32 %v1255_v37, %v971_v12 }
 0x285   :  { %v984_v29 = vadd.f32 %v2242_v36, %v957_v48 }
 0x286   :  { %v990_v33 = vadd.f32 %v2244_v24, %v972_v13 }
 0x28a   :  { %v958_v51 = vpop.f32.mrf.mxu2 }
 0x28b   :  { %v959_v53 = vadd.f32 %v1255_v37, %v958_v51  ;;  %v973_v9 = vpop.f32.mrf.mxu3 }
 0x28c   :  { %v974_v22 = vadd.f32 %v1255_v37, %v973_v9 }
 0x28d   :  { %v985_v63 = vadd.f32 %v2243_v28, %v959_v53 }
 0x28e   :  { %v991_v21 = vadd.f32 %v2245_v25, %v974_v22 }
 0x28f   :  { %v1203_v58 = vpack.c.bf16 %v985_v63, %v984_v29 }
 0x290   :  { %v1218_v39 = vpack.c.bf16 %v991_v21, %v990_v33 }
 0x291   :  { %1230 = vst [vmem:[%s2127_s10 + $0x20] sm:$0xff] %v1203_v58  }
 0x292   :  { %1233 = vst [vmem:[%s2127_s10 + $0x38] sm:$0xff] %v1218_v39  }

// kernel: _lambda_.6
= control target key start
LH: loop header
LB: loop body
LE: loop exit
PB: predicated region body
PF: predicated region fallthrough
CT: control target
= control target key end

     0   :  { %vm369_vm0 = vcmask 1040384   ;;  %vm611_vm1 = vcmask 1046528   ;;  %vm922_vm3 = vcmask 1041409   ;;  %s2618_s1 = inlined_call_operand.vmem [shape: bf16[128,128], index: 1, kind: input, shape index: {}]   ;;  %s2619_s2 = inlined_call_operand.vmem [shape: f32[1,128], index: 2, kind: input, shape index: {}]   ;;  %s2620_s0 = inlined_call_operand.vmem [shape: bf16[2,8,8,128], index: 0, kind: input, shape index: {}]   ;;  %s2621_s4 = inlined_call_operand.vmem [shape: f32[1,128], index: 4, kind: input, shape index: {}]   ;;  %s2622_s5 = inlined_call_operand.vmem [shape: f32[1,128], index: 5, kind: input, shape index: {}]   ;;  %s2623_s3 = inlined_call_operand.vmem [shape: f32[3,3,128], index: 3, kind: input, shape index: {}]   ;;  %s2624_s7 = inlined_call_operand.vmem [shape: f32[1,128], index: 7, kind: input, shape index: {}]   ;;  %s2625_s6 = inlined_call_operand.vmem [shape: bf16[128,128], index: 6, kind: input, shape index: {}]   ;;  %s2626_s8 = inlined_call_operand.vmem [shape: bf16[128,128], index: 8, kind: input, shape index: {}]   ;;  %s2627_s9 = inlined_call_operand.vmem [shape: f32[1,128], index: 9, kind: input, shape index: {}]   ;;  %s2628_s10 = inlined_call_operand.vmem [shape: bf16[128,128], index: 10, kind: input, shape index: {}]   ;;  %s2629_s11 = inlined_call_operand.vmem [shape: f32[1,128], index: 11, kind: input, shape index: {}]   ;;  %s2630_s12 = inlined_call_operand.vmem [shape: bf16[2,8,8,128], index: 12, kind: output, shape index: {}]  }
   0x1   :  { %v1438_v0 = vld [vmem:[%s2618_s1 + $0x38] sm:$0xff]  ;;  %v1437_v1 = vld [vmem:[%s2618_s1 + $0x30] sm:$0xff]  ;;  %v1436_v2 = vld [vmem:[%s2618_s1 + $0x28] sm:$0xff] }
   0x2   :  { %173 = vmatpush.bf16.msra.mxu0 %v1438_v0  ;;  %1510 = vmatpush.bf16.msra.mxu1 %v1438_v0  ;;  %v1435_v3 = vld [vmem:[%s2618_s1 + $0x20] sm:$0xff]  ;;  %v1434_v4 = vld [vmem:[%s2618_s1 + $0x18] sm:$0xff]  ;;  %v1433_v5 = vld [vmem:[%s2618_s1 + $0x10] sm:$0xff] }
   0x3   :  { %v1432_v6 = vld [vmem:[%s2618_s1 + $0x8] sm:$0xff]  ;;  %v1431_v7 = vld [vmem:[%s2618_s1] sm:$0xff]  ;;  %v1429_v11 = vld [vmem:[%s2620_s0 + $0x30] sm:$0xff] }
   0x4   :  { %v1423_v8 = vld [vmem:[%s2620_s0] sm:$0xff]  ;;  %v1428_v9 = vld [vmem:[%s2620_s0 + $0x28] sm:$0xff]  ;;  %v1425_v12 = vld [vmem:[%s2620_s0 + $0x10] sm:$0xff] }
   0x5   :  { %v1424_v10 = vld [vmem:[%s2620_s0 + $0x8] sm:$0xff]  ;;  %v1430_v13 = vld [vmem:[%s2620_s0 + $0x38] sm:$0xff]  ;;  %v1427_v15 = vld [vmem:[%s2620_s0 + $0x20] sm:$0xff] }
   0x6   :  { %174 = vmatpush.bf16.msra.mxu0 %v1437_v1  ;;  %1511 = vmatpush.bf16.msra.mxu1 %v1437_v1  ;;  %v1426_v14 = vld [vmem:[%s2620_s0 + $0x18] sm:$0xff]  ;;  %v1788_v16 = vld [vmem:[%s2619_s2] ss:$0 sm:$0xff]  ;;  %v319_v40 = vld [vmem:[%s2623_s3 + $0x4] sm:$0x7] }
   0x7   :  { %v318_v38 = vld [vmem:[%s2623_s3] sm:$0x7]  ;;  %v1813_v44 = vperm.slane %v319_v40, 0  ;;  %v320_v52 = vld [vmem:[%s2623_s3 + $0x8] sm:$0x7]  ;;  %v1839_v62 = vperm.slane %v319_v40, 1 }
   0x8   :  { %v1805_v41 = vperm.slane %v318_v38, 0  ;;  %v1830_v56 = vperm.slane %v320_v52, 0  ;;  %v1833_v59 = vperm.slane %v318_v38, 1 }
   0xa   :  { %175 = vmatpush.bf16.msra.mxu0 %v1436_v2  ;;  %1512 = vmatpush.bf16.msra.mxu1 %v1436_v2  ;;  %v1820_v50 = vmul.f32 0.0, %v1805_v41  ;;  %v1843_v2 = vmul.f32 0.0, %v1833_v59 }
   0xc   :  { %2638 = vst [vmem:[#allocation2_spill] sm:$0xff] %v1843_v2 }
   0xe   :  { %176 = vmatpush.bf16.msra.mxu0 %v1435_v3  ;;  %1513 = vmatpush.bf16.msra.mxu1 %v1435_v3 }
  0x12   :  { %177 = vmatpush.bf16.msra.mxu0 %v1434_v4  ;;  %1514 = vmatpush.bf16.msra.mxu1 %v1434_v4 }
  0x16   :  { %178 = vmatpush.bf16.msra.mxu0 %v1433_v5  ;;  %1515 = vmatpush.bf16.msra.mxu1 %v1433_v5 }
  0x1a   :  { %179 = vmatpush.bf16.msra.mxu0 %v1432_v6  ;;  %1516 = vmatpush.bf16.msra.mxu1 %v1432_v6 }
  0x1e   :  { %180 = vmatpush.bf16.msra.mxu0 %v1431_v7  ;;  %1517 = vmatpush.bf16.msra.mxu1 %v1431_v7 }
  0x21   :  { %181 = vmatmul.bf16.vlgmr.msra.gmra.mxu0 %v1423_v8  ;;  %206 = vmatmul.bf16.vlgmr.msra.gmra.mxu1 %v1428_v9 }
  0x31   :  { %186 = vmatmul.bf16.gmra.mxu0 %v1424_v10  ;;  %211 = vmatmul.bf16.gmra.mxu1 %v1429_v11  ;;  %v1851_v10 = vperm.slane %v320_v52, 1 }
  0x41   :  { %191 = vmatmul.bf16.gmra.mxu0 %v1425_v12  ;;  %216 = vmatmul.bf16.gmra.mxu1 %v1430_v13  ;;  %v1853_v13 = vperm.slane %v318_v38, 2 }
  0x51   :  { %196 = vmatmul.bf16.gmra.mxu0 %v1426_v14 }
  0x61   :  { %201 = vmatmul.bf16.gmra.mxu0 %v1427_v15 }
  0x9e   :  { %v182_v17 = vpop.f32.mrf.mxu0  ;;  %v207_v23 = vpop.f32.mrf.mxu1 }
  0x9f   :  { %v183_v18 = vadd.f32 %v1788_v16, %v182_v17  ;;  %v1808_v42 = vadd.f32 %v1788_v16, %v207_v23  ;;  %v1857_v17 = vperm.slane %v319_v40, 2 }
  0xa1   :  { %v222_v19 = vsub.f32 0.0, %v183_v18  ;;  %v232_v51 = vsub.f32 0.0, %v1808_v42 }
  0xa3   :  { %v238_v20 = vmul.f32 1.442695, %v222_v19  ;;  %v258_v0 = vmul.f32 1.442695, %v232_v51 }
  0xa5   :  { %1533 = vpow2.f32 %v238_v20 }
  0xa6   :  { %v184_v21 = vpop.f32.mrf.mxu0  ;;  %v209_v31 = vpop.f32.mrf.mxu1 }
  0xa7   :  { %v185_v22 = vadd.f32 %v1788_v16, %v184_v21  ;;  %v1811_v43 = vadd.f32 %v1788_v16, %v209_v31  ;;  %v1872_v31 = vperm.slane %v320_v52, 2 }
  0xa9   :  { %v223_v24 = vsub.f32 0.0, %v185_v22  ;;  %v233_v54 = vsub.f32 0.0, %v1811_v43 }
  0xab   :  { %v1534_v25 = vpop.eup %1533  ;;  %v240_v26 = vmul.f32 1.442695, %v223_v24  ;;  %v260_v3 = vmul.f32 1.442695, %v233_v54 }
  0xac   :  { %v270_v27 = vadd.f32 1.0, %v1534_v25  ;;  %v1868_v25 = vmul.f32 0.0, %v1853_v13 }
  0xad   :  { %1535 = vpow2.f32 %v240_v26 }
  0xae   :  { %1537 = vrcp.f32 %v270_v27  ;;  %v187_v28 = vpop.f32.mrf.mxu0  ;;  %v212_v49 = vpop.f32.mrf.mxu1  ;;  %2639 = vst [vmem:[#allocation3_spill] sm:$0xff] %v1868_v25 }
  0xaf   :  { %v1793_v29 = vadd.f32 %v1788_v16, %v187_v28  ;;  %v1837_v61 = vadd.f32 %v1788_v16, %v212_v49 }
  0xb1   :  { %v224_v30 = vsub.f32 0.0, %v1793_v29  ;;  %v234_v9 = vsub.f32 0.0, %v1837_v61 }
  0xb3   :  { %v1536_v32 = vpop.eup %1535  ;;  %v242_v33 = vmul.f32 1.442695, %v224_v30 }
  0xb4   :  { %v1538_v34 = vpop.eup %1537  ;;  %v271_v35 = vadd.f32 1.0, %v1536_v32 }
  0xb5   :  { %v1796_v36 = vmul.f32 %v1538_v34, %v183_v18  ;;  %1539 = vpow2.f32 %v242_v33 }
  0xb6   :  { %1541 = vrcp.f32 %v271_v35  ;;  %v189_v39 = vpop.f32.mrf.mxu0  ;;  %v214_v26 = vpop.f32.mrf.mxu1 }
  0xb7   :  { %v337_v37 = vrot.slane %v1796_v36, 7  ;;  %v1817_v47 = vadd.f32 %v1788_v16, %v189_v39  ;;  %v579_v8 = vrot.slane %v1796_v36, 1  ;;  %v515_v15 = vmul.f32 %v1839_v62, %v1796_v36 }
  0xb8   :  { %v1881_v35 = vadd.f32 %v1788_v16, %v214_v26 }
  0xb9   :  { %v370_v46 = vsel %vm369_vm0, 0.0, %v337_v37  ;;  %v225_v58 = vsub.f32 0.0, %v1817_v47  ;;  %v612_v19 = vsel %vm611_vm1, %v579_v8, 0.0 }
  0xba   :  { %v418_v55 = vmul.f32 %v1813_v44, %v370_v46  ;;  %v388_v4 = vmul.f32 %v1805_v41, %v370_v46  ;;  %v661_v30 = vmul.f32 %v1857_v17, %v612_v19  ;;  %v484_v46 = vmul.f32 %v1833_v59, %v1796_v36 }
  0xbb   :  { %v1540_v45 = vpop.eup %1539  ;;  %v244_v63 = vmul.f32 1.442695, %v225_v58 }
  0xbc   :  { %v1542_v48 = vpop.eup %1541  ;;  %v272_v57 = vadd.f32 1.0, %v1540_v45  ;;  %v434_v5 = vadd.f32 %v418_v55, %v1820_v50 }
  0xbd   :  { %v1826_v53 = vmul.f32 %v1542_v48, %v185_v22  ;;  %v262_v22 = vmul.f32 1.442695, %v234_v9 }
  0xbe   :  { %1543 = vrcp.f32 %v272_v57  ;;  %v192_v58 = vpop.f32.mrf.mxu0 }
  0xbf   :  { %v338_v60 = vrot.slane %v1826_v53, 7  ;;  %1545 = vpow2.f32 %v244_v63  ;;  %v580_v20 = vrot.slane %v1826_v53, 1  ;;  %v548_v24 = vmul.f32 %v1851_v10, %v1826_v53 }
  0xc0   :  { %1547 = vpow2.f32 %v258_v0 }
  0xc1   :  { %v371_v1 = vsel %vm369_vm0, 0.0, %v338_v60  ;;  %1549 = vpow2.f32 %v260_v3  ;;  %v516_v60 = vmul.f32 %v1839_v62, %v1826_v53 }
  0xc2   :  { %v419_v6 = vmul.f32 %v1813_v44, %v371_v1  ;;  %v451_v7 = vmul.f32 %v1830_v56, %v371_v1  ;;  %1551 = vpow2.f32 %v262_v22  ;;  %v389_v38 = vmul.f32 %v1805_v41, %v371_v1 }
  0xc3   :  { %v235_v1 = vsub.f32 0.0, %v1881_v35 }
  0xc4   :  { %v435_v11 = vadd.f32 %v419_v6, %v388_v4  ;;  %v466_v12 = vadd.f32 %v451_v7, %v434_v5  ;;  %v1544_v14 = vpop.eup %1543  ;;  %v630_v6 = vmul.f32 %v1853_v13, %v612_v19 }
  0xc5   :  { %v1863_v21 = vmul.f32 %v1544_v14, %v1793_v29  ;;  %v1546_v28 = vpop.eup %1545  ;;  %v1875_v29 = vsel %vm611_vm1, %v580_v20, 0.0  ;;  %v264_v8 = vmul.f32 1.442695, %v235_v1 }
  0xc6   :  { %v498_v18 = vadd.f32 %v1843_v2, %v466_v12  ;;  %v1548_v33 = vpop.eup %1547  ;;  %v273_v48 = vadd.f32 1.0, %v1546_v28  ;;  %v694_v51 = vmul.f32 %v1872_v31, %v1875_v29  ;;  %v662_v14 = vmul.f32 %v1857_v17, %v1875_v29 }
  0xc7   :  { %v339_v27 = vrot.slane %v1863_v21, 7  ;;  %v1550_v37 = vpop.eup %1549  ;;  %v280_v55 = vadd.f32 1.0, %v1548_v33  ;;  %v581_v3 = vrot.slane %v1863_v21, 1  ;;  %v549_v5 = vmul.f32 %v1851_v10, %v1863_v21 }
  0xc8   :  { %v531_v23 = vadd.f32 %v515_v15, %v498_v18  ;;  %v281_v57 = vadd.f32 1.0, %v1550_v37  ;;  %1553 = vrcp.f32 %v273_v48  ;;  %v1552_v36 = vpop.eup %1551  ;;  %v1908_v18 = vadd.f32 %v1788_v16, %v192_v58 }
  0xc9   :  { %v1878_v34 = vsel %vm369_vm0, 0.0, %v339_v27  ;;  %1555 = vrcp.f32 %v280_v55  ;;  %v282_v12 = vadd.f32 1.0, %v1552_v36 }
  0xca   :  { %v563_v32 = vadd.f32 %v548_v24, %v531_v23  ;;  %v420_v40 = vmul.f32 %v1813_v44, %v1878_v34  ;;  %v452_v45 = vmul.f32 %v1830_v56, %v1878_v34  ;;  %1557 = vrcp.f32 %v281_v57  ;;  %v194_v24 = vpop.f32.mrf.mxu0 }
  0xcb   :  { %1559 = vpow2.f32 %v264_v8  ;;  %v226_v28 = vsub.f32 0.0, %v1908_v18 }
  0xcc   :  { %v644_v39 = vadd.f32 %v1868_v25, %v563_v32  ;;  %v436_v52 = vadd.f32 %v420_v40, %v389_v38  ;;  %v467_v54 = vadd.f32 %v452_v45, %v435_v11  ;;  %v1903_v11 = vsel %vm611_vm1, %v581_v3, 0.0 }
  0xcd   :  { %v695_v19 = vmul.f32 %v1872_v31, %v1903_v11  ;;  %1561 = vrcp.f32 %v282_v12  ;;  %v1920_v32 = vadd.f32 %v1788_v16, %v194_v24  ;;  %v246_v40 = vmul.f32 1.442695, %v226_v28 }
  0xce   :  { %v677_v49 = vadd.f32 %v661_v30, %v644_v39  ;;  %v499_v0 = vadd.f32 %v484_v46, %v467_v54  ;;  %v1554_v9 = vpop.eup %1553  ;;  %v485_v46 = vmul.f32 %v1833_v59, %v1826_v53  ;;  %v217_v54 = vpop.f32.mrf.mxu1  ;;  %v631_v3 = vmul.f32 %v1853_v13, %v1875_v29 }
  0xcf   :  { %v1911_v20 = vmul.f32 %v1554_v9, %v1817_v47  ;;  %v1556_v23 = vpop.eup %1555  ;;  %1563 = vpow2.f32 %v246_v40  ;;  %v663_v9 = vmul.f32 %v1857_v17, %v1903_v11 }
  0xd0   :  { %v1895_v63 = vadd.f32 %v694_v51, %v677_v49  ;;  %v532_v4 = vadd.f32 %v516_v60, %v499_v0  ;;  %v1558_v26 = vpop.eup %1557  ;;  %v1923_v47 = vmul.f32 %v1556_v23, %v1808_v42  ;;  %v227_v49 = vsub.f32 0.0, %v1920_v32 }
  0xd1   :  { %v340_v30 = vrot.slane %v1911_v20, 7  ;;  %v1926_v33 = vmul.f32 %v1558_v26, %v1811_v43  ;;  %v1560_v38 = vpop.eup %1559  ;;  %v517_v51 = vmul.f32 %v1839_v62, %v1863_v21  ;;  %v582_v60 = vrot.slane %v1911_v20, 1 }
  0xd2   :  { %v564_v7 = vadd.f32 %v549_v5, %v532_v4  ;;  %v347_v42 = vrot.slane %v1923_v47, 7  ;;  %v283_v58 = vadd.f32 1.0, %v1560_v38  ;;  %v1947_v0 = vadd.f32 %v1788_v16, %v217_v54  ;;  %v197_v40 = vpop.f32.mrf.mxu0 }
  0xd3   :  { %v1929_v37 = vsel %vm369_vm0, 0.0, %v340_v30  ;;  %v1562_v45 = vpop.eup %1561  ;;  %v348_v43 = vrot.slane %v1926_v33, 7  ;;  %v248_v1 = vmul.f32 1.442695, %v227_v49 }
  0xd4   :  { %v645_v15 = vadd.f32 %v630_v6, %v564_v7  ;;  %v453_v39 = vmul.f32 %v1830_v56, %v1929_v37  ;;  %v1941_v55 = vmul.f32 %v1562_v45, %v1837_v61  ;;  %v380_v36 = vsel %vm369_vm0, 0.0, %v347_v42  ;;  %v1955_v61 = vld [vmem:[%s2621_s4] ss:$0 sm:$0xff] }
  0xd5   :  { %v1958_v4 = vsel %vm369_vm0, 0.0, %v348_v43  ;;  %1565 = vrcp.f32 %v283_v58  ;;  %v1962_v7 = vsel %vm611_vm1, %v582_v60, 0.0  ;;  %v1564_v8 = vpop.eup %1563  ;;  %v236_v12 = vsub.f32 0.0, %v1947_v0 }
  0xd6   :  { %v678_v22 = vadd.f32 %v662_v14, %v645_v15  ;;  %v468_v48 = vadd.f32 %v453_v39, %v436_v52  ;;  %v550_v52 = vmul.f32 %v1851_v10, %v1911_v20  ;;  %v349_v5 = vrot.slane %v1941_v55, 7 }
  0xd7   :  { %1567 = vpow2.f32 %v248_v1  ;;  %v397_v14 = vmul.f32 %v1805_v41, %v380_v36  ;;  %v429_v15 = vmul.f32 %v1813_v44, %v1958_v4  ;;  %v696_v26 = vmul.f32 %v1872_v31, %v1962_v7 }
  0xd8   :  { %v1915_v27 = vadd.f32 %v695_v19, %v678_v22  ;;  %v500_v57 = vadd.f32 %v485_v46, %v468_v48  ;;  %v729_v22 = vmul.f32 %v1955_v61, %v1895_v63  ;;  %v1975_v19 = vld [vmem:[%s2622_s5] ss:$0 sm:$0xff]  ;;  %v1978_v23 = vsel %vm369_vm0, 0.0, %v349_v5  ;;  %v219_v46 = vpop.f32.mrf.mxu1 }
  0xd9   :  { %v274_v28 = vadd.f32 1.0, %v1564_v8  ;;  %v266_v39 = vmul.f32 1.442695, %v236_v12  ;;  %v445_v45 = vadd.f32 %v429_v15, %v397_v14  ;;  %v462_v63 = vmul.f32 %v1830_v56, %v1978_v23 }
  0xda   :  { %v533_v53 = vadd.f32 %v517_v51, %v500_v57  ;;  %v1987_v49 = vadd.f32 %v1975_v19, %v729_v22  ;;  %v589_v42 = vrot.slane %v1923_v47, 1  ;;  %v1994_v51 = vadd.f32 %v1788_v16, %v197_v40 }
  0xdb   :  { %v1566_v30 = vpop.eup %1565  ;;  %1569 = vrcp.f32 %v274_v28  ;;  %v1997_v54 = vadd.f32 %v1788_v16, %v219_v46  ;;  %v493_v57 = vmul.f32 %v1833_v59, %v1923_v47  ;;  %v477_v58 = vadd.f32 %v462_v63, %v445_v45 }
  0xdc   :  { %v565_v6 = vadd.f32 %v550_v52, %v533_v53  ;;  %2640 = vst [vmem:[#allocation4_spill] sm:$0xff] %v1987_v49  ;;  %v1991_v43 = vmul.f32 %v1566_v30, %v1881_v35  ;;  %1571 = vpow2.f32 %v266_v39  ;;  %v2003_v53 = vmul.f32 %v1839_v62, %v1923_v47  ;;  %v199_v30 = vpop.f32.mrf.mxu0 }
  0xdd   :  { %v1568_v48 = vpop.eup %1567  ;;  %v765_v35 = vsub.f32 0.0, %v1987_v49  ;;  %v2008_v52 = vmul.f32 %v1851_v10, %v1923_v47  ;;  %v2011_v1 = vsel %vm611_vm1, %v589_v42, 0.0  ;;  %v228_v5 = vsub.f32 0.0, %v1994_v51 }
  0xde   :  { %v646_v29 = vadd.f32 %v631_v3, %v565_v6  ;;  %v275_v60 = vadd.f32 1.0, %v1568_v48  ;;  %2641 = vst [vmem:[#allocation5_spill] sm:$0xff] %v2003_v53  ;;  %v350_v3 = vrot.slane %v1991_v43, 7  ;;  %v2016_v6 = vmul.f32 %v1813_v44, %v380_v36 }
  0xdf   :  { %2642 = vst [vmem:[#allocation6_spill] sm:$0xff] %v2008_v52  ;;  %v590_v8 = vrot.slane %v1926_v33, 1  ;;  %v2023_v47 = vmul.f32 %v1830_v56, %v380_v36  ;;  %v526_v14 = vmul.f32 %v1839_v62, %v1926_v33  ;;  %v509_v15 = vadd.f32 %v493_v57, %v477_v58 }
  0xe0   :  { %v679_v24 = vadd.f32 %v663_v9, %v646_v29  ;;  %2643 = vst [vmem:[#allocation7_spill] sm:$0xff] %v2011_v1  ;;  %v730_v9 = vmul.f32 %v1955_v61, %v1915_v27  ;;  %v237_v29 = vsub.f32 0.0, %v1997_v54  ;;  %1573 = vrcp.f32 %v275_v60 }
  0xe1   :  { %v1570_v12 = vpop.eup %1569  ;;  %2644 = vst [vmem:[#allocation8_spill] sm:$0xff] %v2023_v47  ;;  %v398_v28 = vmul.f32 %v1805_v41, %v1958_v4  ;;  %v430_v27 = vmul.f32 %v1813_v44, %v1978_v23  ;;  %v2035_v36 = vmul.f32 %v1857_v17, %v2011_v1  ;;  %v494_v39 = vmul.f32 %v1833_v59, %v1926_v33 }
  0xe2   :  { %v1982_v38 = vadd.f32 %v696_v26, %v679_v24  ;;  %v1572_v22 = vpop.eup %1571  ;;  %v639_v24 = vmul.f32 %v1853_v13, %v2011_v1  ;;  %v781_v26 = vmul.f32 1.442695, %v765_v35  ;;  %v2040_v40 = vsel %vm369_vm0, 0.0, %v350_v3 }
  0xe3   :  { %2645 = vst [vmem:[#allocation9_spill] sm:$0xff] %v2035_v36  ;;  %v250_v45 = vmul.f32 1.442695, %v228_v5  ;;  %v2043_v63 = vsel %vm611_vm1, %v590_v8, 0.0  ;;  %v2046_v46 = vadd.f32 %v1975_v19, %v730_v9  ;;  %v2049_v48 = vmul.f32 %v1570_v12, %v1908_v18 }
  0xe4   :  { %2646 = vst [vmem:[#allocation10_spill] sm:$0xff] %v2043_v63  ;;  %v268_v42 = vmul.f32 1.442695, %v237_v29  ;;  %v542_v57 = vadd.f32 %v526_v14, %v509_v15  ;;  %v559_v58 = vmul.f32 %v1851_v10, %v1941_v55  ;;  %v284_v60 = vadd.f32 1.0, %v1572_v22 }
  0xe5   :  { %2647 = vst [vmem:[#allocation11_spill] sm:$0xff] %v2046_v46  ;;  %v2054_v35 = vadd.f32 %v1788_v16, %v199_v30  ;;  %1575 = vpow2.f32 %v781_v26  ;;  %v446_v3 = vadd.f32 %v430_v27, %v398_v28  ;;  %v591_v5 = vrot.slane %v1941_v55, 1 }
  0xe6   :  { %v463_v8 = vmul.f32 %v1830_v56, %v2040_v40  ;;  %v1574_v9 = vpop.eup %1573  ;;  %v2061_v18 = vmul.f32 %v1830_v56, %v1958_v4  ;;  %v2065_v29 = vmul.f32 %v1851_v10, %v1926_v33  ;;  %v2069_v12 = vmul.f32 %v1833_v59, %v1863_v21 }
  0xe7   :  { %1577 = vpow2.f32 %v250_v45  ;;  %v2073_v14 = vmul.f32 %v1853_v13, %v2043_v63  ;;  %v672_v15 = vmul.f32 %v1857_v17, %v2043_v63  ;;  %v766_v22 = vsub.f32 0.0, %v2046_v46 }
  0xe8   :  { %2648 = vst [vmem:[#allocation12_spill] sm:$0xff] %v2061_v18  ;;  %v341_v4 = vrot.slane %v2049_v48, 7  ;;  %v390_v33 = vmul.f32 %v1805_v41, %v1878_v34  ;;  %v574_v26 = vadd.f32 %v559_v58, %v542_v57  ;;  %1579 = vrcp.f32 %v284_v60 }
  0xe9   :  { %2649 = vst [vmem:[#allocation13_spill] sm:$0xff] %v2065_v29  ;;  %v229_v21 = vsub.f32 0.0, %v2054_v35  ;;  %v624_v28 = vsel %vm611_vm1, %v591_v5, 0.0  ;;  %v478_v27 = vadd.f32 %v463_v8, %v446_v3  ;;  %v2084_v30 = vmul.f32 %v1574_v9, %v1920_v32 }
  0xea   :  { %1581 = vpow2.f32 %v268_v42  ;;  %v2088_v45 = vmul.f32 %v1853_v13, %v1903_v11  ;;  %v2092_v49 = vmul.f32 %v1833_v59, %v1941_v55  ;;  %v527_v34 = vmul.f32 %v1839_v62, %v1941_v55 }
  0xeb   :  { %v421_v57 = vmul.f32 %v1813_v44, %v1929_v37  ;;  %v1576_v58 = vpop.eup %1575  ;;  %v783_v60 = vmul.f32 1.442695, %v766_v22  ;;  %v399_v32 = vmul.f32 %v1805_v41, %v1978_v23  ;;  %v2101_v42 = vmul.f32 %v1853_v13, %v624_v28 }
  0xec   :  { %v2104_v11 = vsel %vm369_vm0, 0.0, %v341_v4  ;;  %v655_v5 = vadd.f32 %v639_v24, %v574_v26  ;;  %v2107_v8 = vmul.f32 %v1857_v17, %v624_v28  ;;  %v705_v55 = vmul.f32 %v1872_v31, %v624_v28 }
  0xed   :  { %v1578_v3 = vpop.eup %1577  ;;  %v252_v9 = vmul.f32 1.442695, %v229_v21  ;;  %v2112_v22 = vmul.f32 %v1833_v59, %v1911_v20  ;;  %v518_v23 = vmul.f32 %v1839_v62, %v1911_v20  ;;  %v510_v46 = vadd.f32 %v494_v39, %v478_v27 }
  0xee   :  { %v342_v36 = vrot.slane %v2084_v30, 7  ;;  %v1580_v4 = vpop.eup %1579  ;;  %v391_v24 = vmul.f32 %v1805_v41, %v1929_v37  ;;  %v437_v26 = vadd.f32 %v421_v57, %v390_v33  ;;  %v2121_v63 = vmul.f32 %v1833_v59, %v1991_v43  ;;  %v202_v33 = vpop.f32.mrf.mxu0 }
  0xef   :  { %v454_v21 = vmul.f32 %v1830_v56, %v2104_v11  ;;  %v813_v1 = vadd.f32 1.0, %v1576_v58  ;;  %1583 = vpow2.f32 %v783_v60  ;;  %v431_v20 = vmul.f32 %v1813_v44, %v2040_v40 }
  0xf0   :  { %v1582_v28 = vpop.eup %1581  ;;  %v276_v39 = vadd.f32 1.0, %v1578_v3  ;;  %v688_v27 = vadd.f32 %v672_v15, %v655_v5  ;;  %v560_v25 = vmul.f32 %v1851_v10, %v1991_v43  ;;  %v592_v37 = vrot.slane %v1991_v43, 1 }
  0xf1   :  { %1585 = vpow2.f32 %v252_v9  ;;  %v731_v57 = vmul.f32 %v1955_v61, %v1982_v38  ;;  %v543_v29 = vadd.f32 %v527_v34, %v510_v46  ;;  %v2133_v52 = vsel %vm369_vm0, 0.0, %v342_v36 }
  0xf2   :  { %1587 = vrcp.f32 %v276_v39  ;;  %v422_v58 = vmul.f32 %v1813_v44, %v2104_v11  ;;  %v469_v60 = vadd.f32 %v454_v21, %v437_v26  ;;  %v2138_v15 = vmul.f32 %v1580_v4, %v1947_v0 }
  0xf3   :  { %v285_v3 = vadd.f32 1.0, %v1582_v28  ;;  %v2142_v5 = vmul.f32 %v1853_v13, %v1962_v7  ;;  %v2146_v38 = vmul.f32 %v1857_v17, %v1962_v7  ;;  %v2150_v36 = vmul.f32 %v1805_v41, %v2040_v40 }
  0xf4   :  { %v2153_v46 = vadd.f32 %v1788_v16, %v202_v33  ;;  %1589 = vrcp.f32 %v813_v1  ;;  %v720_v34 = vadd.f32 %v705_v55, %v688_v27  ;;  %v625_v0 = vsel %vm611_vm1, %v592_v37, 0.0 }
  0xf5   :  { %v455_v9 = vmul.f32 %v1830_v56, %v2133_v52  ;;  %v1584_v4 = vpop.eup %1583  ;;  %v2159_v26 = vadd.f32 %v1975_v19, %v731_v57  ;;  %v447_v7 = vadd.f32 %v431_v20, %v399_v32  ;;  %v2163_v21 = vmul.f32 %v1839_v62, %v1991_v43 }
  0xf6   :  { %v575_v40 = vadd.f32 %v560_v25, %v543_v29  ;;  %v438_v39 = vadd.f32 %v422_v58, %v391_v24  ;;  %v501_v1 = vadd.f32 %v2069_v12, %v469_v60  ;;  %v351_v55 = vrot.slane %v2138_v15, 7 }
  0xf7   :  { %2650 = vst [vmem:[#allocation14_spill] sm:$0xff] %v2159_v26  ;;  %v1586_v28 = vpop.eup %1585  ;;  %1591 = vrcp.f32 %v285_v3  ;;  %v2168_v37 = vmul.f32 %v1857_v17, %v625_v0  ;;  %v2171_v33 = vmul.f32 %v1872_v31, %v625_v0  ;;  %v230_v20 = vsub.f32 0.0, %v2153_v46 }
  0xf8   :  { %v1588_v27 = vpop.eup %1587  ;;  %v277_v32 = vadd.f32 1.0, %v1586_v28  ;;  %v2175_v43 = vmul.f32 %v1955_v61, %v720_v34  ;;  %v583_v25 = vrot.slane %v2049_v48, 1  ;;  %v470_v29 = vadd.f32 %v455_v9, %v438_v39 }
  0xf9   :  { %v2179_v12 = vmul.f32 %v1588_v27, %v1994_v51  ;;  %v767_v24 = vsub.f32 0.0, %v2159_v26  ;;  %v656_v57 = vadd.f32 %v2073_v14, %v575_v40  ;;  %v2184_v58 = vmul.f32 %v1853_v13, %v625_v0 }
  0xfa   :  { %1593 = vrcp.f32 %v277_v32  ;;  %v2186_v60 = vpop.eup %1589  ;;  %v534_v3 = vadd.f32 %v518_v23, %v501_v1  ;;  %v384_v34 = vsel %vm369_vm0, 0.0, %v351_v55  ;;  %v423_v28 = vmul.f32 %v1813_v44, %v2133_v52 }
  0xfb   :  { %2651 = vst [vmem:[#allocation15_spill] sm:$0xff] %v2186_v60  ;;  %v343_v9 = vrot.slane %v2179_v12, 7  ;;  %v2192_v51 = vadd.f32 1.0, %v1584_v4  ;;  %v551_v39 = vmul.f32 %v1851_v10, %v2049_v48  ;;  %v2197_v14 = vmul.f32 0.0, %v1830_v56  ;;  %v204_v60 = vpop.f32.mrf.mxu0 }
  0xfc   :  { %v254_v0 = vmul.f32 1.442695, %v230_v20  ;;  %v392_v23 = vmul.f32 %v1805_v41, %v2104_v11  ;;  %v616_v1 = vsel %vm611_vm1, %v583_v25, 0.0  ;;  %v502_v55 = vadd.f32 %v2112_v22, %v470_v29 }
  0xfd   :  { %v1592_v40 = vpop.eup %1591  ;;  %v376_v27 = vsel %vm369_vm0, 0.0, %v343_v9  ;;  %v2205_v4 = vadd.f32 %v2107_v8, %v656_v57  ;;  %v488_v32 = vmul.f32 %v1833_v59, %v2049_v48  ;;  %v519_v26 = vmul.f32 %v1839_v62, %v2049_v48 }
  0xfe   :  { %v464_v20 = vmul.f32 %v1830_v56, %v384_v34  ;;  %v2212_v53 = vmul.f32 1.442695, %v767_v24  ;;  %v566_v11 = vadd.f32 %v551_v39, %v534_v3  ;;  %v439_v25 = vadd.f32 %v423_v28, %v392_v23 }
  0xff   :  { %v456_v22 = vmul.f32 %v1830_v56, %v376_v27  ;;  %v634_v9 = vmul.f32 %v1853_v13, %v616_v1  ;;  %v665_v8 = vmul.f32 %v1857_v17, %v616_v1  ;;  %v2218_v57 = vmul.f32 %v1592_v40, %v1997_v54 }
 0x100   :  { %v1594_v29 = vpop.eup %1593  ;;  %1595 = vpow2.f32 %v254_v0  ;;  %v535_v2 = vadd.f32 %v519_v26, %v502_v55  ;;  %v2224_v24 = vadd.f32 %v1788_v16, %v204_v60  ;;  %v697_v3 = vmul.f32 %v1872_v31, %v616_v1 }
 0x101   :  { %v471_v48 = vadd.f32 %v456_v22, %v439_v25  ;;  %v2221_v18 = vmul.f32 %v1594_v29, %v2054_v35  ;;  %v432_v28 = vmul.f32 %v1813_v44, %v384_v34  ;;  %v479_v39 = vadd.f32 %v464_v20, %v447_v7 }
 0x102   :  { %v424_v23 = vmul.f32 %v1813_v44, %v376_v27  ;;  %v647_v47 = vadd.f32 %v2088_v45, %v566_v11  ;;  %v552_v54 = vmul.f32 %v1851_v10, %v2084_v30  ;;  %v393_v35 = vmul.f32 %v1805_v41, %v2133_v52 }
 0x103   :  { %v503_v26 = vadd.f32 %v488_v32, %v471_v48  ;;  %v344_v0 = vrot.slane %v2221_v18, 7  ;;  %v520_v16 = vmul.f32 %v1839_v62, %v2084_v30  ;;  %v352_v60 = vrot.slane %v2218_v57, 7 }
 0x104   :  { %v401_v7 = vmul.f32 %v1805_v41, %v384_v34  ;;  %v567_v40 = vadd.f32 %v552_v54, %v535_v2  ;;  %v394_v45 = vmul.f32 %v1805_v41, %v376_v27  ;;  %v231_v55 = vsub.f32 0.0, %v2224_v24 }
 0x105   :  { %v377_v1 = vsel %vm369_vm0, 0.0, %v344_v0  ;;  %v536_v20 = vadd.f32 %v520_v16, %v503_v26  ;;  %v440_v25 = vadd.f32 %v424_v23, %v393_v35  ;;  %v680_v22 = vadd.f32 %v2146_v38, %v647_v47 }
 0x106   :  { %v1596_v32 = vpop.eup %1595  ;;  %v425_v11 = vmul.f32 %v1813_v44, %v377_v1  ;;  %v457_v52 = vmul.f32 %v1830_v56, %v377_v1  ;;  %v489_v29 = vmul.f32 %v1833_v59, %v2084_v30  ;;  %v584_v2 = vrot.slane %v2084_v30, 1 }
 0x107   :  { %v448_v34 = vadd.f32 %v432_v28, %v2150_v36  ;;  %v2250_v27 = vmul.f32 0.0, %v1851_v10  ;;  %v553_v48 = vmul.f32 %v1851_v10, %v2179_v12  ;;  %v648_v23 = vadd.f32 %v2142_v5, %v567_v40 }
 0x108   :  { %v441_v54 = vadd.f32 %v425_v11, %v394_v45  ;;  %v472_v26 = vadd.f32 %v457_v52, %v440_v25  ;;  %v385_v0 = vsel %vm369_vm0, 0.0, %v352_v60  ;;  %v278_v47 = vadd.f32 1.0, %v1596_v32 }
 0x109   :  { %v256_v38 = vmul.f32 1.442695, %v231_v55  ;;  %v490_v35 = vmul.f32 %v1833_v59, %v2179_v12  ;;  %v568_v30 = vadd.f32 %v553_v48, %v536_v20  ;;  %v712_v16 = vadd.f32 %v697_v3, %v680_v22 }
 0x10a   :  { %v473_v36 = vadd.f32 %v2197_v14, %v441_v54  ;;  %v504_v28 = vadd.f32 %v489_v29, %v472_v26  ;;  %v617_v1 = vsel %vm611_vm1, %v584_v2, 0.0  ;;  %v521_v45 = vmul.f32 %v1839_v62, %v2179_v12 }
 0x10b   :  { %v585_v11 = vrot.slane %v2179_v12, 1  ;;  %v433_v5 = vmul.f32 %v1813_v44, %v385_v0  ;;  %v522_v40 = vmul.f32 %v1839_v62, %v2221_v18  ;;  %1597 = vrcp.f32 %v278_v47 }
 0x10c   :  { %v505_v60 = vadd.f32 %v490_v35, %v473_v36  ;;  %v681_v55 = vadd.f32 %v665_v8, %v648_v23  ;;  %v537_v32 = vadd.f32 %v521_v45, %v504_v28  ;;  %v554_v20 = vmul.f32 %v1851_v10, %v2221_v18 }
 0x10d   :  { %1599 = vpow2.f32 %v256_v38  ;;  %v698_v3 = vmul.f32 %v1872_v31, %v617_v1  ;;  %v649_v25 = vadd.f32 %v634_v9, %v568_v30  ;;  %v635_v22 = vmul.f32 %v1853_v13, %v617_v1 }
 0x10e   :  { %v538_v52 = vadd.f32 %v522_v40, %v505_v60  ;;  %v465_v12 = vmul.f32 %v1830_v56, %v385_v0  ;;  %v618_v29 = vsel %vm611_vm1, %v585_v11, 0.0  ;;  %v569_v2 = vadd.f32 %v554_v20, %v537_v32 }
 0x10f   :  { %v586_v48 = vrot.slane %v2221_v18, 1  ;;  %v2275_v8 = vadd.f32 %v1975_v19, %v2175_v43  ;;  %v721_v54 = vadd.f32 %v2171_v33, %v2205_v4  ;;  %v666_v26 = vmul.f32 %v1857_v17, %v617_v1 }
 0x110   :  { %v570_v9 = vadd.f32 %v2250_v27, %v538_v52  ;;  %v511_v23 = vadd.f32 %v2092_v49, %v479_v39  ;;  %v713_v47 = vadd.f32 %v698_v3, %v681_v55  ;;  %v449_v0 = vadd.f32 %v433_v5, %v401_v7 }
 0x111   :  { %v650_v38 = vadd.f32 %v635_v22, %v569_v2  ;;  %v1598_v35 = vpop.eup %1597  ;;  %1601 = vpow2.f32 %v2212_v53  ;;  %v682_v18 = vadd.f32 %v666_v26, %v649_v25  ;;  %v636_v30 = vmul.f32 %v1853_v13, %v618_v29 }
 0x112   :  { %v667_v43 = vmul.f32 %v1857_v17, %v618_v29  ;;  %v732_v33 = vmul.f32 %v1955_v61, %v712_v16  ;;  %v497_v4 = vmul.f32 %v1833_v59, %v2138_v15  ;;  %v480_v28 = vadd.f32 %v465_v12, %v448_v34 }
 0x113   :  { %v1600_v36 = vpop.eup %1599  ;;  %v619_v49 = vsel %vm611_vm1, %v586_v48, 0.0  ;;  %v561_v39 = vmul.f32 %v1851_v10, %v2138_v15  ;;  %v699_v7 = vmul.f32 %v1872_v31, %v618_v29  ;;  %v651_v53 = vadd.f32 %v636_v30, %v570_v9 }
 0x114   :  { %v683_v1 = vadd.f32 %v667_v43, %v650_v38  ;;  %v544_v45 = vadd.f32 %v2163_v21, %v511_v23  ;;  %v733_v11 = vmul.f32 %v1955_v61, %v713_v47  ;;  %v481_v5 = vadd.f32 %v2197_v14, %v449_v0 }
 0x115   :  { %v279_v16 = vadd.f32 1.0, %v1600_v36  ;;  %v714_v60 = vadd.f32 %v699_v7, %v682_v18  ;;  %v668_v40 = vmul.f32 %v1857_v17, %v619_v49  ;;  %v700_v34 = vmul.f32 %v1872_v31, %v619_v49 }
 0x116   :  { %v2298_v55 = vmul.f32 %v1598_v35, %v2153_v46  ;;  %v776_v32 = vsub.f32 0.0, %v2275_v8  ;;  %v2302_v20 = vadd.f32 %v1975_v19, %v732_v33  ;;  %v529_v21 = vmul.f32 %v1839_v62, %v2138_v15 }
 0x117   :  { %v512_v3 = vadd.f32 %v2121_v63, %v480_v28  ;;  %v1602_v14 = vpop.eup %1601  ;;  %v741_v25 = vmul.f32 %v1955_v61, %v721_v54  ;;  %v593_v52 = vrot.slane %v2138_v15, 1  ;;  %v684_v22 = vadd.f32 %v668_v40, %v651_v53 }
 0x118   :  { %v715_v12 = vadd.f32 %v700_v34, %v683_v1  ;;  %v576_v29 = vadd.f32 %v561_v39, %v544_v45  ;;  %v530_v46 = vmul.f32 %v1839_v62, %v2218_v57  ;;  %v2312_v2 = vmul.f32 0.0, %v1872_v31 }
 0x119   :  { %1603 = vrcp.f32 %v279_v16  ;;  %v2315_v48 = vadd.f32 %v1975_v19, %v733_v11  ;;  %v513_v26 = vadd.f32 %v497_v4, %v481_v5  ;;  %v734_v63 = vmul.f32 %v1955_v61, %v714_v60 }
 0x11a   :  { %v345_v54 = vrot.slane %v2298_v55, 7  ;;  %v815_v9 = vadd.f32 1.0, %v1602_v14  ;;  %v768_v15 = vsub.f32 0.0, %v2302_v20  ;;  %v545_v23 = vadd.f32 %v529_v21, %v512_v3 }
 0x11b   :  { %v562_v47 = vmul.f32 %v1851_v10, %v2218_v57  ;;  %v626_v0 = vsel %vm611_vm1, %v593_v52, 0.0  ;;  %v594_v38 = vrot.slane %v2218_v57, 1  ;;  %v716_v35 = vadd.f32 %v2312_v2, %v684_v22 }
 0x11c   :  { %v735_v18 = vmul.f32 %v1955_v61, %v715_v12  ;;  %1605 = vrcp.f32 %v2192_v51  ;;  %v2327_v30 = vmul.f32 1.442695, %v776_v32  ;;  %v2330_v43 = vadd.f32 %v1975_v19, %v741_v25 }
 0x11d   :  { %v657_v36 = vadd.f32 %v2101_v42, %v576_v29  ;;  %v769_v33 = vsub.f32 0.0, %v2315_v48  ;;  %v546_v4 = vadd.f32 %v530_v46, %v513_v26  ;;  %v2335_v28 = vadd.f32 %v1975_v19, %v734_v63 }
 0x11e   :  { %v378_v57 = vsel %vm369_vm0, 0.0, %v345_v54  ;;  %1607 = vrcp.f32 %v815_v9  ;;  %v787_v39 = vmul.f32 1.442695, %v768_v15  ;;  %v707_v51 = vmul.f32 %v1872_v31, %v626_v0 }
 0x11f   :  { %v1604_v49 = vpop.eup %1603  ;;  %v577_v7 = vadd.f32 %v562_v47, %v545_v23  ;;  %v627_v53 = vsel %vm611_vm1, %v594_v38, 0.0  ;;  %v736_v1 = vmul.f32 %v1955_v61, %v716_v35  ;;  %v2342_v42 = vadd.f32 %v1975_v19, %v735_v18  ;;  %v2652_v35 = vld [vmem:[#allocation8_spill] sm:$0xff] }
 0x120   :  { %v311_v45 = vmul.f32 %v1604_v49, %v2224_v24  ;;  %v690_v11 = vadd.f32 %v2168_v37, %v657_v36  ;;  %v643_v5 = vmul.f32 %v1853_v13, %v626_v0  ;;  %v675_v16 = vmul.f32 %v1857_v17, %v626_v0  ;;  %v2653_v36 = vld [vmem:[#allocation12_spill] sm:$0xff] }
 0x121   :  { %v426_v60 = vmul.f32 %v1813_v44, %v378_v57  ;;  %v789_v40 = vmul.f32 1.442695, %v769_v33  ;;  %v578_v34 = vadd.f32 %v2250_v27, %v546_v4  ;;  %v770_v32 = vsub.f32 0.0, %v2335_v28 }
 0x122   :  { %v346_v21 = vrot.slane %v311_v45, 7  ;;  %v2351_v3 = vpop.eup %1605  ;;  %1609 = vpow2.f32 %v787_v39  ;;  %v658_v14 = vadd.f32 %v2184_v58, %v577_v7  ;;  %v676_v24 = vmul.f32 %v1857_v17, %v627_v53 }
 0x123   :  { %v708_v37 = vmul.f32 %v1872_v31, %v627_v53  ;;  %v2357_v25 = vadd.f32 %v1975_v19, %v736_v1  ;;  %v771_v52 = vsub.f32 0.0, %v2342_v42  ;;  %v395_v22 = vmul.f32 %v1805_v41, %v378_v57  ;;  %v2654_v57 = vld [vmem:[#allocation2_spill] sm:$0xff] }
 0x124   :  { %v379_v27 = vsel %vm369_vm0, 0.0, %v346_v21  ;;  %v2362_v12 = vpop.eup %1607  ;;  %v442_v29 = vadd.f32 %v426_v60, %v1820_v50  ;;  %1611 = vpow2.f32 %v789_v40  ;;  %v659_v63 = vadd.f32 %v643_v5, %v578_v34 }
 0x125   :  { %v396_v46 = vmul.f32 %v1805_v41, %v379_v27  ;;  %v427_v58 = vmul.f32 %v1813_v44, %v379_v27  ;;  %v459_v26 = vmul.f32 %v1830_v56, %v379_v27  ;;  %v791_v54 = vmul.f32 1.442695, %v770_v32 }
 0x126   :  { %v587_v9 = vrot.slane %v2298_v55, 1  ;;  %v491_v15 = vmul.f32 %v1833_v59, %v2298_v55  ;;  %v772_v50 = vsub.f32 0.0, %v2357_v25  ;;  %v793_v38 = vmul.f32 1.442695, %v771_v52  ;;  %v2655_v52 = vld [vmem:[#allocation5_spill] sm:$0xff] }
 0x127   :  { %v443_v23 = vadd.f32 %v427_v58, %v395_v22  ;;  %v444_v47 = vadd.f32 %v2016_v6, %v396_v46  ;;  %v474_v0 = vadd.f32 %v459_v26, %v442_v29  ;;  %v523_v41 = vmul.f32 %v1839_v62, %v2298_v55  ;;  %v2656_v46 = vld [vmem:[#allocation6_spill] sm:$0xff] }
 0x128   :  { %v588_v44 = vrot.slane %v311_v45, 1  ;;  %v1610_v56 = vpop.eup %1609  ;;  %v492_v4 = vmul.f32 %v1833_v59, %v311_v45  ;;  %v691_v39 = vadd.f32 %v675_v16, %v658_v14  ;;  %1613 = vpow2.f32 %v791_v54 }
 0x129   :  { %v475_v18 = vadd.f32 %v2652_v35, %v443_v23  ;;  %v476_v33 = vadd.f32 %v2653_v36, %v444_v47  ;;  %v506_v49 = vadd.f32 %v2654_v57, %v474_v0  ;;  %v620_v6 = vsel %vm611_vm1, %v587_v9, 0.0  ;;  %v1446_v0 = vld [vmem:[%s2625_s6 + $0x38] sm:$0xff] }
 0x12a   :  { %v524_v7 = vmul.f32 %v1839_v62, %v311_v45  ;;  %v556_v55 = vmul.f32 %v1851_v10, %v311_v45  ;;  %v1612_v60 = vpop.eup %1611  ;;  %v722_v40 = vadd.f32 %v707_v51, %v690_v11  ;;  %v692_v34 = vadd.f32 %v676_v24, %v659_v63  ;;  %v2657_v10 = vld [vmem:[#allocation13_spill] sm:$0xff]  ;;  %v2658_v11 = vld [vmem:[#allocation3_spill] sm:$0xff]  ;;  %974 = vmatpush.bf16.msrb.mxu1 %v1446_v0 }
 0x12b   :  { %v507_v53 = vadd.f32 %v491_v15, %v475_v18  ;;  %v508_v1 = vadd.f32 %v492_v4, %v476_v33  ;;  %v539_v5 = vadd.f32 %v523_v41, %v506_v49  ;;  %v795_v32 = vmul.f32 1.442695, %v772_v50  ;;  %v2661_v35 = vld [vmem:[#allocation9_spill] sm:$0xff]  ;;  %v1445_v33 = vld [vmem:[%s2625_s6 + $0x30] sm:$0xff] }
 0x12c   :  { %v621_v21 = vsel %vm611_vm1, %v588_v44, 0.0  ;;  %1615 = vpow2.f32 %v793_v38  ;;  %v816_v22 = vadd.f32 1.0, %v1610_v56  ;;  %v723_v27 = vadd.f32 %v708_v37, %v691_v39  ;;  %v2660_v38 = vld [vmem:[#allocation10_spill] sm:$0xff]  ;;  %v1442_v0 = vld [vmem:[%s2625_s6 + $0x18] sm:$0xff] }
 0x12d   :  { %v540_v59 = vadd.f32 %v524_v7, %v507_v53  ;;  %v541_v16 = vadd.f32 %v2655_v52, %v508_v1  ;;  %v571_v14 = vadd.f32 %v556_v55, %v539_v5  ;;  %v637_v62 = vmul.f32 %v1853_v13, %v620_v6 }
 0x12e   :  { %v669_v29 = vmul.f32 %v1857_v17, %v620_v6  ;;  %v638_v51 = vmul.f32 %v1853_v13, %v621_v21  ;;  %v1614_v26 = vpop.eup %1613  ;;  %v742_v63 = vmul.f32 %v1955_v61, %v722_v40  ;;  %v724_v54 = vadd.f32 %v2312_v2, %v692_v34  ;;  %v2659_v13 = vld [vmem:[#allocation7_spill] sm:$0xff]  ;;  %975 = vmatpush.bf16.msrb.mxu1 %v1445_v33 }
 0x12f   :  { %v572_v58 = vadd.f32 %v2656_v46, %v540_v59  ;;  %v573_v45 = vadd.f32 %v2657_v10, %v541_v16  ;;  %v652_v24 = vadd.f32 %v2658_v11, %v571_v14  ;;  %1617 = vpow2.f32 %v795_v32  ;;  %v1444_v40 = vld [vmem:[%s2625_s6 + $0x28] sm:$0xff]  ;;  %v2665_v46 = vld [vmem:[#allocation14_spill] sm:$0xff] }
 0x130   :  { %v670_v37 = vmul.f32 %v1857_v17, %v621_v21  ;;  %v702_v47 = vmul.f32 %v1872_v31, %v621_v21  ;;  %v703_v50 = vmul.f32 %v1872_v31, %v2659_v13  ;;  %v704_v41 = vmul.f32 %v1872_v31, %v2660_v38  ;;  %v2662_v32 = vld [vmem:[#allocation11_spill] sm:$0xff] }
 0x131   :  { %v653_v9 = vadd.f32 %v637_v62, %v572_v58  ;;  %v654_v15 = vadd.f32 %v638_v51, %v573_v45  ;;  %v685_v23 = vadd.f32 %v669_v29, %v652_v24  ;;  %1619 = vrcp.f32 %v816_v22  ;;  %v2663_v62 = vld [vmem:[#allocation4_spill] sm:$0xff]  ;;  %v2664_v29 = vld [vmem:[#allocation15_spill] sm:$0xff]  ;;  %v1443_v24 = vld [vmem:[%s2625_s6 + $0x20] sm:$0xff] }
 0x132   :  { %v817_v2 = vadd.f32 1.0, %v1612_v60  ;;  %v1616_v44 = vpop.eup %1615  ;;  %v743_v17 = vmul.f32 %v1955_v61, %v723_v27  ;;  %1621 = vpow2.f32 %v2327_v30  ;;  %v777_v4 = vsub.f32 0.0, %v2330_v43  ;;  %976 = vmatpush.bf16.msrb.mxu1 %v1444_v40 }
 0x133   :  { %v686_v56 = vadd.f32 %v670_v37, %v653_v9  ;;  %v687_v18 = vadd.f32 %v2661_v35, %v654_v15  ;;  %v717_v36 = vadd.f32 %v702_v47, %v685_v23  ;;  %v2409_v31 = vadd.f32 %v1975_v19, %v742_v63 }
 0x134   :  { %v818_v57 = vadd.f32 1.0, %v1614_v26  ;;  %v744_v49 = vmul.f32 %v1955_v61, %v724_v54  ;;  %1623 = vrcp.f32 %v817_v2  ;;  %v819_v1 = vadd.f32 1.0, %v1616_v44 }
 0x135   :  { %v718_v39 = vadd.f32 %v703_v50, %v686_v56  ;;  %v719_v6 = vadd.f32 %v704_v41, %v687_v18  ;;  %v737_v7 = vmul.f32 %v1955_v61, %v717_v36  ;;  %v1618_v53 = vpop.eup %1617  ;;  %v2414_v5 = vadd.f32 %v1975_v19, %v743_v17 }
 0x136   :  { %v2426_v21 = vmul.f32 %v2351_v3, %v2662_v32  ;;  %v805_v59 = vmul.f32 1.442695, %v777_v4  ;;  %v778_v52 = vsub.f32 0.0, %v2409_v31  ;;  %1625 = vrcp.f32 %v818_v57  ;;  %977 = vmatpush.bf16.msrb.mxu1 %v1443_v24 }
 0x137   :  { %v738_v30 = vmul.f32 %v1955_v61, %v718_v39  ;;  %v739_v55 = vmul.f32 %v1955_v61, %v719_v6  ;;  %v2419_v60 = vadd.f32 %v1975_v19, %v737_v7  ;;  %v1620_v34 = vpop.eup %1619  ;;  %v2430_v16 = vadd.f32 %v1975_v19, %v744_v49  ;;  %v1440_v6 = vld [vmem:[%s2625_s6 + $0x8] sm:$0xff] }
 0x138   :  { %v1622_v27 = vpop.eup %1621  ;;  %v2441_v3 = vmul.f32 %v2664_v29, %v2663_v62  ;;  %v2445_v58 = vmul.f32 %v2362_v12, %v2665_v46  ;;  %v820_v10 = vadd.f32 1.0, %v1618_v53  ;;  %1627 = vrcp.f32 %v819_v1 }
 0x139   :  { %v2433_v61 = vadd.f32 %v1975_v19, %v738_v30  ;;  %v2436_v14 = vadd.f32 %v1975_v19, %v739_v55  ;;  %v773_v22 = vsub.f32 0.0, %v2419_v60  ;;  %v779_v45 = vsub.f32 0.0, %v2414_v5 }
 0x13a   :  { %v1624_v26 = vpop.eup %1623  ;;  %v861_v63 = vadd.f32 %v2426_v21, %v2441_v3  ;;  %1629 = vpow2.f32 %v805_v59  ;;  %v2456_v12 = vmul.f32 %v1620_v34, %v2302_v20  ;;  %v807_v54 = vmul.f32 1.442695, %v778_v52  ;;  %978 = vmatpush.bf16.msrb.mxu1 %v1442_v0  ;;  %v1439_v34 = vld [vmem:[%s2625_s6] sm:$0xff] }
 0x13b   :  { %v774_v51 = vsub.f32 0.0, %v2433_v61  ;;  %v775_v19 = vsub.f32 0.0, %v2436_v14  ;;  %v797_v11 = vmul.f32 1.442695, %v773_v22  ;;  %v780_v37 = vsub.f32 0.0, %v2430_v16 }
 0x13c   :  { %v1626_v23 = vpop.eup %1625  ;;  %v809_v47 = vmul.f32 1.442695, %v779_v45  ;;  %v2463_v13 = vmul.f32 %v1624_v26, %v2315_v48  ;;  %v862_v20 = vadd.f32 %v861_v63, %v2445_v58  ;;  %v1441_v48 = vld [vmem:[%s2625_s6 + $0x10] sm:$0xff]  ;;  %v824_v57 = vadd.f32 1.0, %v1622_v27 }
 0x13d   :  { %1631 = vpow2.f32 %v797_v11  ;;  %v799_v9 = vmul.f32 1.442695, %v774_v51  ;;  %v801_v15 = vmul.f32 1.442695, %v775_v19  ;;  %v811_v38 = vmul.f32 1.442695, %v780_v37 }
 0x13e   :  { %1633 = vrcp.f32 %v820_v10  ;;  %v1628_v50 = vpop.eup %1627  ;;  %v2467_v41 = vmul.f32 %v1626_v23, %v2335_v28  ;;  %v863_v2 = vadd.f32 %v862_v20, %v2456_v12  ;;  %979 = vmatpush.bf16.msrb.mxu1 %v1441_v48  ;;  %v1671_v59 = vmov 64.0   ;;  %v1454_v37 = vld [vmem:[%s2626_s8 + $0x38] sm:$0xff] }
 0x13f   :  { %1635 = vpow2.f32 %v799_v9  ;;  %v2471_v56 = vmul.f32 %v1628_v50, %v2342_v42  ;;  %1062 = vmatpush.bf16.msra.mxu2 %v1454_v37 }
 0x140   :  { %1637 = vpow2.f32 %v801_v15  ;;  %v1630_v44 = vpop.eup %1629  ;;  %v864_v35 = vadd.f32 %v863_v2, %v2463_v13 }
 0x141   :  { %1639 = vpow2.f32 %v807_v54  ;;  %v825_v1 = vadd.f32 1.0, %v1630_v44 }
 0x142   :  { %1641 = vpow2.f32 %v809_v47  ;;  %v865_v28 = vadd.f32 %v864_v35, %v2467_v41  ;;  %980 = vmatpush.bf16.msrb.mxu1 %v1440_v6 }
 0x143   :  { %v1632_v17 = vpop.eup %1631  ;;  %1643 = vpow2.f32 %v811_v38 }
 0x144   :  { %v1634_v18 = vpop.eup %1633  ;;  %v821_v36 = vadd.f32 1.0, %v1632_v17  ;;  %v866_v53 = vadd.f32 %v865_v28, %v2471_v56 }
 0x145   :  { %v1636_v33 = vpop.eup %1635  ;;  %v2482_v7 = vmul.f32 %v1634_v18, %v2357_v25 }
 0x146   :  { %v1638_v4 = vpop.eup %1637  ;;  %v822_v49 = vadd.f32 1.0, %v1636_v33  ;;  %1645 = vrcp.f32 %v821_v36  ;;  %981 = vmatpush.bf16.msrb.mxu1 %v1439_v34  ;;  %v1452_v34 = vld [vmem:[%s2626_s8 + $0x28] sm:$0xff] }
 0x147   :  { %v1640_v39 = vpop.eup %1639  ;;  %v823_v42 = vadd.f32 1.0, %v1638_v4  ;;  %v867_v32 = vadd.f32 %v866_v53, %v2482_v7 }
 0x148   :  { %1647 = vrcp.f32 %v822_v49  ;;  %v1642_v30 = vpop.eup %1641  ;;  %v826_v55 = vadd.f32 1.0, %v1640_v39 }
 0x149   :  { %1649 = vrcp.f32 %v823_v42  ;;  %v1644_v40 = vpop.eup %1643  ;;  %v827_v52 = vadd.f32 1.0, %v1642_v30  ;;  %v868_v10 = vrot.slane %v867_v32, 4 }
 0x14a   :  { %1651 = vrcp.f32 %v824_v57  ;;  %v828_v27 = vadd.f32 1.0, %v1644_v40  ;;  %v1453_v40 = vld [vmem:[%s2626_s8 + $0x30] sm:$0xff] }
 0x14b   :  { %1653 = vrcp.f32 %v1671_v59  ;;  %1063 = vmatpush.bf16.msra.mxu2 %v1453_v40  ;;  %v1450_v59 = vld [vmem:[%s2626_s8 + $0x18] sm:$0xff] }
 0x14c   :  { %v1646_v25 = vpop.eup %1645  ;;  %1655 = vrcp.f32 %v825_v1 }
 0x14d   :  { %1657 = vrcp.f32 %v826_v55  ;;  %v2490_v29 = vmul.f32 %v1646_v25, %v2419_v60  ;;  %v869_v60 = vadd.f32 %v868_v10, %v867_v32  ;;  %v1451_v32 = vld [vmem:[%s2626_s8 + $0x20] sm:$0xff]  ;;  %v1449_v25 = vld [vmem:[%s2626_s8 + $0x10] sm:$0xff] }
 0x14e   :  { %v1648_v22 = vpop.eup %1647  ;;  %1659 = vrcp.f32 %v827_v52  ;;  %v1448_v52 = vld [vmem:[%s2626_s8 + $0x8] sm:$0xff] }
 0x14f   :  { %v1650_v62 = vpop.eup %1649  ;;  %v2493_v46 = vmul.f32 %v1648_v22, %v2433_v61  ;;  %1661 = vrcp.f32 %v828_v27  ;;  %1064 = vmatpush.bf16.msra.mxu2 %v1452_v34  ;;  %v1447_v22 = vld [vmem:[%s2626_s8] sm:$0xff]  ;;  %v1462_v27 = vld [vmem:[%s2628_s10 + $0x38] sm:$0xff] }
 0x150   :  { %v1652_v45 = vpop.eup %1651  ;;  %v2498_v11 = vmul.f32 %v1650_v62, %v2436_v14  ;;  %v1530_v62 = vld [vmem:[%s2624_s7] ss:$0 sm:$0xff]  ;;  %1518 = vmatpush.bf16.msra.mxu3 %v1462_v27 }
 0x151   :  { %v1654_v51 = vpop.eup %1653  ;;  %v874_v19 = vadd.f32 %v2493_v46, %v2490_v29  ;;  %v2501_v26 = vmul.f32 %v1652_v45, %v2275_v8  ;;  %v870_v8 = vrot.slane %v869_v60, 2 }
 0x152   :  { %v1656_v24 = vpop.eup %1655  ;;  %v888_v54 = vmul.f32 64.0, %v1654_v51  ;;  %vm892_vm2 = vweird.f32 %v1654_v51 }
 0x153   :  { %v875_v61 = vadd.f32 %v874_v19, %v2498_v11  ;;  %v1658_v63 = vpop.eup %1657  ;;  %v2508_v9 = vmul.f32 %v1656_v24, %v2330_v43  ;;  %v871_v2 = vadd.f32 %v870_v8, %v869_v60  ;;  %1065 = vmatpush.bf16.msra.mxu2 %v1451_v32  ;;  %v1459_v8 = vld [vmem:[%s2628_s10 + $0x20] sm:$0xff] }
 0x154   :  { %v1660_v15 = vpop.eup %1659  ;;  %v2512_v23 = vmul.f32 %v1658_v63, %v2409_v31  ;;  %v889_v20 = vsub.f32 1.0, %v888_v54 }
 0x155   :  { %v876_v14 = vadd.f32 %v875_v61, %v2501_v26  ;;  %v1662_v0 = vpop.eup %1661  ;;  %v2516_v50 = vmul.f32 %v1660_v15, %v2414_v5  ;;  %v872_v48 = vrot.slane %v871_v2, 1  ;;  %v1460_v15 = vld [vmem:[%s2628_s10 + $0x28] sm:$0xff] }
 0x156   :  { %v2520_v43 = vmul.f32 %v1662_v0, %v2430_v16  ;;  %v890_v17 = vmul.f32 %v1654_v51, %v889_v20  ;;  %v1457_v0 = vld [vmem:[%s2628_s10 + $0x10] sm:$0xff]  ;;  %v1456_v20 = vld [vmem:[%s2628_s10 + $0x8] sm:$0xff] }
 0x157   :  { %v877_v47 = vadd.f32 %v876_v14, %v2508_v9  ;;  %v873_v33 = vadd.f32 %v872_v48, %v871_v2  ;;  %1066 = vmatpush.bf16.msra.mxu2 %v1450_v59  ;;  %v1461_v14 = vld [vmem:[%s2628_s10 + $0x30] sm:$0xff]  ;;  %v1531_v2 = vld [vmem:[%s2627_s9] ss:$0 sm:$0xff] }
 0x158   :  { %v891_v18 = vadd.f32 %v1654_v51, %v890_v17  ;;  %1519 = vmatpush.bf16.msra.mxu3 %v1461_v14 }
 0x159   :  { %v878_v38 = vadd.f32 %v877_v47, %v2512_v23  ;;  %v1458_v47 = vld [vmem:[%s2628_s10 + $0x18] sm:$0xff] }
 0x15a   :  { %v893_v5 = vsel %vm892_vm2, %v1654_v51, %v891_v18 }
 0x15b   :  { %v879_v44 = vadd.f32 %v878_v38, %v2516_v50  ;;  %v894_v49 = vmul.f32 %v893_v5, %v873_v33  ;;  %1067 = vmatpush.bf16.msra.mxu2 %v1449_v25  ;;  %v1455_v38 = vld [vmem:[%s2628_s10] sm:$0xff] }
 0x15c   :  { %1520 = vmatpush.bf16.msra.mxu3 %v1460_v15 }
 0x15d   :  { %v880_v31 = vadd.f32 %v879_v44, %v2520_v43  ;;  %v896_v42 = vpack.c.bf16 %v894_v49, %v894_v49 }
 0x15f   :  { %v881_v35 = vrot.slane %v880_v31, 4  ;;  %v920_v53 = vunpack.c.l.b16 %v896_v42  ;;  %1068 = vmatpush.bf16.msra.mxu2 %v1448_v52 }
 0x160   :  { %1521 = vmatpush.bf16.msra.mxu3 %v1459_v8 }
 0x161   :  { %v882_v36 = vadd.f32 %v881_v35, %v880_v31 }
 0x163   :  { %v883_v28 = vrot.slane %v882_v36, 2  ;;  %1069 = vmatpush.bf16.msra.mxu2 %v1447_v22 }
 0x164   :  { %1522 = vmatpush.bf16.msra.mxu3 %v1458_v47 }
 0x165   :  { %v884_v4 = vadd.f32 %v883_v28, %v882_v36 }
 0x167   :  { %v885_v57 = vrot.slane %v884_v4, 1  ;;  %1178 = vmatpush.bf16.msrb.mxu2 %v1462_v27 }
 0x168   :  { %1523 = vmatpush.bf16.msra.mxu3 %v1457_v0 }
 0x169   :  { %v886_v39 = vadd.f32 %v885_v57, %v884_v4 }
 0x16b   :  { %v895_v16 = vmul.f32 %v893_v5, %v886_v39  ;;  %1179 = vmatpush.bf16.msrb.mxu2 %v1461_v14 }
 0x16c   :  { %1524 = vmatpush.bf16.msra.mxu3 %v1456_v20 }
 0x16d   :  { %v897_v6 = vpack.c.bf16 %v895_v16, %v895_v16 }
 0x16f   :  { %v921_v1 = vunpack.c.l.b16 %v897_v6  ;;  %1180 = vmatpush.bf16.msrb.mxu2 %v1460_v15 }
 0x170   :  { %1525 = vmatpush.bf16.msra.mxu3 %v1455_v38 }
 0x171   :  { %v923_v30 = vsel %vm922_vm3, %v921_v1, %v920_v53 }
 0x172   :  { %v924_v55 = vpack.c.b16 %v923_v30, %v923_v30 }
 0x173   :  { %1181 = vmatpush.bf16.msrb.mxu2 %v1459_v8 }
 0x174   :  { %982 = vmatmul.bf16.vlgmr.msrb.gmra.mxu1 %v924_v55 }
 0x177   :  { %1182 = vmatpush.bf16.msrb.mxu2 %v1458_v47 }
 0x17b   :  { %1183 = vmatpush.bf16.msrb.mxu2 %v1457_v0 }
 0x17f   :  { %1184 = vmatpush.bf16.msrb.mxu2 %v1456_v20 }
 0x183   :  { %1185 = vmatpush.bf16.msrb.mxu2 %v1455_v38 }
 0x1f1   :  { %v983_v10 = vpop.f32.mrf.mxu1 }
 0x1f2   :  { %v984_v45 = vadd.f32 %v1530_v62, %v983_v10 }
 0x1f4   :  { %v987_v51 = vsub.f32 0.0, %v984_v45 }
 0x1f6   :  { %v988_v19 = vmul.f32 1.442695, %v987_v51 }
 0x1f8   :  { %1663 = vpow2.f32 %v988_v19 }
 0x1f9   :  { %v985_v24 = vpop.f32.mrf.mxu1 }
 0x1fe   :  { %v1664_v60 = vpop.eup %1663 }
 0x1ff   :  { %v990_v61 = vadd.f32 1.0, %v1664_v60 }
 0x201   :  { %1665 = vrcp.f32 %v990_v61 }
 0x207   :  { %v1666_v63 = vpop.eup %1665 }
 0x208   :  { %v992_v54 = vmul.f32 %v1666_v63, %v984_v45 }
 0x20a   :  { %v993_v37 = vpack.c.bf16 %v992_v54, %v992_v54 }
 0x20c   :  { %1070 = vmatmul.bf16.vlgmr.msra.gmra.mxu2 %v993_v37 }
 0x28f   :  { %v1071_v44 = vpop.f32.mrf.mxu2 }
 0x290   :  { %v1072_v17 = vadd.f32 %v1531_v2, %v1071_v44 }
 0x292   :  { %v1075_v31 = vsub.f32 0.0, %v1072_v17 }
 0x294   :  { %v1076_v48 = vmul.f32 1.442695, %v1075_v31 }
 0x296   :  { %1667 = vpow2.f32 %v1076_v48 }
 0x297   :  { %v1073_v35 = vpop.f32.mrf.mxu2 }
 0x29c   :  { %v1668_v18 = vpop.eup %1667 }
 0x29d   :  { %v1078_v36 = vadd.f32 1.0, %v1668_v18 }
 0x29f   :  { %1669 = vrcp.f32 %v1078_v36 }
 0x2a5   :  { %v1670_v33 = vpop.eup %1669 }
 0x2a6   :  { %v1082_v28 = vperm.slane %v1670_v33, 0  ;;  %v1081_v42 = vrot.slane %v1670_v33, 1 }
 0x2a8   :  { %v1086_v5 = vmul.f32 %v1082_v28, %v2441_v3  ;;  %v1087_v4 = vmul.f32 %v1082_v28, %v2426_v21  ;;  %v1092_v57 = vmul.f32 %v1082_v28, %v2471_v56  ;;  %v1093_v49 = vmul.f32 %v1082_v28, %v2482_v7 }
 0x2a9   :  { %v1083_v6 = vperm.slane %v1081_v42, 0  ;;  %v1088_v53 = vmul.f32 %v1082_v28, %v2445_v58  ;;  %v1089_v1 = vmul.f32 %v1082_v28, %v2456_v12  ;;  %v1090_v56 = vmul.f32 %v1082_v28, %v2463_v13 }
 0x2aa   :  { %v1102_v39 = vpack.c.bf16 %v1087_v4, %v1086_v5  ;;  %v1105_v16 = vpack.c.bf16 %v1093_v49, %v1092_v57  ;;  %v1091_v7 = vmul.f32 %v1082_v28, %v2467_v41 }
 0x2ab   :  { %v1094_v30 = vmul.f32 %v1083_v6, %v2490_v29  ;;  %v1095_v3 = vmul.f32 %v1083_v6, %v2493_v46  ;;  %v1103_v55 = vpack.c.bf16 %v1089_v1, %v1088_v53  ;;  %v1096_v40 = vmul.f32 %v1083_v6, %v2498_v11 }
 0x2ac   :  { %1186 = vmatmul.bf16.vlgmr.msrb.gmra.mxu2 %v1102_v39  ;;  %1201 = vmatmul.bf16.vlgmr.msra.gmra.mxu3 %v1105_v16  ;;  %v1097_v34 = vmul.f32 %v1083_v6, %v2501_v26  ;;  %v1104_v32 = vpack.c.bf16 %v1091_v7, %v1090_v56  ;;  %v1098_v12 = vmul.f32 %v1083_v6, %v2508_v9  ;;  %v1532_v26 = vld [vmem:[%s2629_s11] ss:$0 sm:$0xff] }
 0x2ad   :  { %v1106_v21 = vpack.c.bf16 %v1095_v3, %v1094_v30  ;;  %v1099_v29 = vmul.f32 %v1083_v6, %v2512_v23  ;;  %v1100_v59 = vmul.f32 %v1083_v6, %v2516_v50  ;;  %v1101_v13 = vmul.f32 %v1083_v6, %v2520_v43 }
 0x2ae   :  { %v1107_v58 = vpack.c.bf16 %v1097_v34, %v1096_v40 }
 0x2af   :  { %v1108_v46 = vpack.c.bf16 %v1099_v29, %v1098_v12  ;;  %v1109_v25 = vpack.c.bf16 %v1101_v13, %v1100_v59 }
 0x2bc   :  { %1191 = vmatmul.bf16.gmra.mxu2 %v1103_v55  ;;  %1206 = vmatmul.bf16.gmra.mxu3 %v1106_v21 }
 0x2cc   :  { %1196 = vmatmul.bf16.gmra.mxu2 %v1104_v32  ;;  %1211 = vmatmul.bf16.gmra.mxu3 %v1107_v58 }
 0x2dc   :  { %1216 = vmatmul.bf16.gmra.mxu3 %v1108_v46 }
 0x2ec   :  { %1221 = vmatmul.bf16.gmra.mxu3 %v1109_v25 }
 0x32f   :  { %v1187_v41 = vpop.f32.mrf.mxu2  ;;  %v1202_v11 = vpop.f32.mrf.mxu3 }
 0x330   :  { %v1188_v22 = vadd.f32 %v1532_v26, %v1187_v41  ;;  %v1203_v62 = vadd.f32 %v1532_v26, %v1202_v11 }
 0x337   :  { %v1189_v52 = vpop.f32.mrf.mxu2  ;;  %v1204_v9 = vpop.f32.mrf.mxu3 }
 0x338   :  { %v1190_v27 = vadd.f32 %v1532_v26, %v1189_v52  ;;  %v1205_v23 = vadd.f32 %v1532_v26, %v1204_v9 }
 0x33a   :  { %v1466_v10 = vpack.c.bf16 %v1190_v27, %v1188_v22  ;;  %v1481_v45 = vpack.c.bf16 %v1205_v23, %v1203_v62 }
 0x33c   :  { %1467 = vst [vmem:[%s2630_s12] sm:$0xff] %v1466_v10  }
 0x33d   :  { %1505 = vst [vmem:[%s2630_s12 + $0x18] sm:$0xff] %v1481_v45  }
 0x33f   :  { %v1192_v50 = vpop.f32.mrf.mxu2  ;;  %v1207_v43 = vpop.f32.mrf.mxu3 }
 0x340   :  { %v1193_v19 = vadd.f32 %v1532_v26, %v1192_v50  ;;  %v1208_v61 = vadd.f32 %v1532_v26, %v1207_v43 }
 0x347   :  { %v1194_v51 = vpop.f32.mrf.mxu2  ;;  %v1209_v60 = vpop.f32.mrf.mxu3 }
 0x348   :  { %v1195_v24 = vadd.f32 %v1532_v26, %v1194_v51  ;;  %v1210_v63 = vadd.f32 %v1532_v26, %v1209_v60 }
 0x34a   :  { %v1471_v54 = vpack.c.bf16 %v1195_v24, %v1193_v19  ;;  %v1486_v37 = vpack.c.bf16 %v1210_v63, %v1208_v61 }
 0x34c   :  { %1503 = vst [vmem:[%s2630_s12 + $0x8] sm:$0xff] %v1471_v54  }
 0x34d   :  { %1506 = vst [vmem:[%s2630_s12 + $0x20] sm:$0xff] %v1486_v37  }
 0x34f   :  { %v1197_v14 = vpop.f32.mrf.mxu2  ;;  %v1212_v15 = vpop.f32.mrf.mxu3 }
 0x350   :  { %v1198_v47 = vadd.f32 %v1532_v26, %v1197_v14  ;;  %v1213_v38 = vadd.f32 %v1532_v26, %v1212_v15 }
 0x357   :  { %v1199_v8 = vpop.f32.mrf.mxu2  ;;  %v1214_v20 = vpop.f32.mrf.mxu3 }
 0x358   :  { %v1200_v0 = vadd.f32 %v1532_v26, %v1199_v8  ;;  %v1215_v2 = vadd.f32 %v1532_v26, %v1214_v20 }
 0x35a   :  { %v1476_v44 = vpack.c.bf16 %v1200_v0, %v1198_v47  ;;  %v1491_v17 = vpack.c.bf16 %v1215_v2, %v1213_v38 }
 0x35c   :  { %1504 = vst [vmem:[%s2630_s12 + $0x10] sm:$0xff] %v1476_v44  }
 0x35d   :  { %1507 = vst [vmem:[%s2630_s12 + $0x28] sm:$0xff] %v1491_v17  }
 0x35f   :  { %v1217_v31 = vpop.f32.mrf.mxu3 }
 0x360   :  { %v1218_v35 = vadd.f32 %v1532_v26, %v1217_v31 }
 0x367   :  { %v1219_v48 = vpop.f32.mrf.mxu3 }
 0x368   :  { %v1220_v18 = vadd.f32 %v1532_v26, %v1219_v48 }
 0x36a   :  { %v1496_v36 = vpack.c.bf16 %v1220_v18, %v1218_v35 }
 0x36c   :  { %1508 = vst [vmem:[%s2630_s12 + $0x30] sm:$0xff] %v1496_v36  }
 0x36f   :  { %v1222_v33 = vpop.f32.mrf.mxu3 }
 0x370   :  { %v1223_v5 = vadd.f32 %v1532_v26, %v1222_v33 }
 0x377   :  { %v1224_v28 = vpop.f32.mrf.mxu3 }
 0x378   :  { %v1225_v4 = vadd.f32 %v1532_v26, %v1224_v28 }
 0x37a   :  { %v1501_v57 = vpack.c.bf16 %v1225_v4, %v1223_v5 }
 0x37c   :  { %1509 = vst [vmem:[%s2630_s12 + $0x38] sm:$0xff] %v1501_v57  }

// kernel: _lambda_.7
= control target key start
LH: loop header
LB: loop body
LE: loop exit
PB: predicated region body
PF: predicated region fallthrough
CT: control target
= control target key end

     0   :  { %s941_s24 = smov 0   ;;  %s1067_s0 = inlined_call_operand.vmem [shape: bf16[2,8,8,128], index: 0, kind: input, shape index: {}]   ;;  %s1068_s1 = inlined_call_operand.vmem [shape: bf16[128,128], index: 1, kind: input, shape index: {}]   ;;  %s1069_s2 = inlined_call_operand.vmem [shape: f32[1,128], index: 2, kind: input, shape index: {}]   ;;  %s1070_s3 = inlined_call_operand.vmem [shape: bf16[128,128], index: 3, kind: input, shape index: {}]   ;;  %s1071_s4 = inlined_call_operand.vmem [shape: f32[1,128], index: 4, kind: input, shape index: {}]   ;;  %s1072_s5 = inlined_call_operand.vmem [shape: bf16[128,128], index: 5, kind: input, shape index: {}]   ;;  %s1073_s6 = inlined_call_operand.vmem [shape: f32[1,128], index: 6, kind: input, shape index: {}]   ;;  %s1074_s7 = inlined_call_operand.vmem [shape: f32[2,8,128], index: 7, kind: output, shape index: {}]  }
   0x1 LB: > { %s689_s25 = sadd.s32 4294967295, %s898_s24   ;;  %p693_p0 = scmp.ge.s32.totalorder %s898_s24, 1  ;;  %s898_s24 = sphi %s941_s24, %s17_s24  }
   0x2   : > { %p237_p1 = scmp.lt.s32.totalorder %s898_s24, 3 }
   0x4   : > { %p238_p2 = pnand %p693_p0, %p237_p1 }
   0x5   : > { %p268_p3 = scmp.lt.s32.totalorder (!%p238_p2), %s689_s25, 1 }
   0x6   : > { %241 = sbr.rel (%p238_p2) target bundleno = 515 (0x203), region = 48 }
   0xb   : > { %v823_v0 = vld [vmem:[%s1068_s1 + $0x38] sm:$0xff]  ;;  %v822_v1 = vld [vmem:[%s1068_s1 + $0x30] sm:$0xff]  ;;  %v821_v2 = vld [vmem:[%s1068_s1 + $0x28] sm:$0xff]  ;;  %s1076_s25 = smov (!%p268_p3, %s689_s25), 1 }
   0xc   : > { %377 = vmatpush.bf16.msra.mxu0 %v823_v0  ;;  %840 = vmatpush.bf16.msra.mxu3 %v823_v0  ;;  %v820_v3 = vld [vmem:[%s1068_s1 + $0x20] sm:$0xff]  ;;  %v819_v4 = vld [vmem:[%s1068_s1 + $0x18] sm:$0xff]  ;;  %v818_v5 = vld [vmem:[%s1068_s1 + $0x10] sm:$0xff]  ;;  %s811_s17 = sshll.u32 %s1076_s25, 5  ;;  %s696_s19 = sshll.u32 %s1076_s25, 3 }
   0xd   : > { %v817_v6 = vld [vmem:[%s1068_s1 + $0x8] sm:$0xff]  ;;  %v816_v7 = vld [vmem:[%s1068_s1] sm:$0xff]  ;;  %s272_s22 = scalar_lea.vmem %s1067_s0, %s811_s17  ;;  %v831_v18 = vld [vmem:[%s1070_s3 + $0x38] sm:$0xff] }
   0xe   : > { %v812_v8 = vld [vmem:[%s272_s22] sm:$0xff]  ;;  %v814_v9 = vld [vmem:[%s272_s22 + $0x10] sm:$0xff]  ;;  %v813_v10 = vld [vmem:[%s272_s22 + $0x8] sm:$0xff]  ;;  %541 = vmatpush.bf16.msra.mxu1 %v831_v18 }
   0xf   : > { %v815_v11 = vld [vmem:[%s272_s22 + $0x18] sm:$0xff]  ;;  %v857_v13 = vld [vmem:[%s1069_s2] ss:$0 sm:$0xff]  ;;  %v830_v23 = vld [vmem:[%s1070_s3 + $0x30] sm:$0xff]  ;;  %s276_s22 = scalar_lea.vmem %s1074_s7, %s696_s19 }
  0x10   : > { %378 = vmatpush.bf16.msra.mxu0 %v822_v1  ;;  %841 = vmatpush.bf16.msra.mxu3 %v822_v1  ;;  %v829_v30 = vld [vmem:[%s1070_s3 + $0x28] sm:$0xff]  ;;  %v828_v36 = vld [vmem:[%s1070_s3 + $0x20] sm:$0xff]  ;;  %v827_v44 = vld [vmem:[%s1070_s3 + $0x18] sm:$0xff] }
  0x11   : > { %v826_v51 = vld [vmem:[%s1070_s3 + $0x10] sm:$0xff]  ;;  %v825_v56 = vld [vmem:[%s1070_s3 + $0x8] sm:$0xff]  ;;  %v824_v62 = vld [vmem:[%s1070_s3] sm:$0xff] }
  0x12   : > { %542 = vmatpush.bf16.msra.mxu1 %v830_v23 }
  0x14   : > { %379 = vmatpush.bf16.msra.mxu0 %v821_v2  ;;  %842 = vmatpush.bf16.msra.mxu3 %v821_v2 }
  0x16   : > { %543 = vmatpush.bf16.msra.mxu1 %v829_v30 }
  0x18   : > { %380 = vmatpush.bf16.msra.mxu0 %v820_v3  ;;  %843 = vmatpush.bf16.msra.mxu3 %v820_v3 }
  0x1a   : > { %544 = vmatpush.bf16.msra.mxu1 %v828_v36 }
  0x1c   : > { %381 = vmatpush.bf16.msra.mxu0 %v819_v4  ;;  %844 = vmatpush.bf16.msra.mxu3 %v819_v4 }
  0x1e   : > { %545 = vmatpush.bf16.msra.mxu1 %v827_v44 }
  0x20   : > { %382 = vmatpush.bf16.msra.mxu0 %v818_v5  ;;  %845 = vmatpush.bf16.msra.mxu3 %v818_v5 }
  0x22   : > { %546 = vmatpush.bf16.msra.mxu1 %v826_v51  ;;  %v492_v51 = vld [vmem:[%s1071_s4] sm:$0x1] }
  0x24   : > { %383 = vmatpush.bf16.msra.mxu0 %v817_v6  ;;  %846 = vmatpush.bf16.msra.mxu3 %v817_v6 }
  0x26   : > { %547 = vmatpush.bf16.msra.mxu1 %v825_v56 }
  0x28   : > { %384 = vmatpush.bf16.msra.mxu0 %v816_v7  ;;  %847 = vmatpush.bf16.msra.mxu3 %v816_v7 }
  0x2a   : > { %548 = vmatpush.bf16.msra.mxu1 %v824_v62 }
  0x2b   : > { %385 = vmatmul.bf16.vlgmr.msra.gmra.mxu0 %v812_v8  ;;  %395 = vmatmul.bf16.vlgmr.msra.gmra.mxu3 %v814_v9 }
  0x3b   : > { %390 = vmatmul.bf16.gmra.mxu0 %v813_v10  ;;  %400 = vmatmul.bf16.gmra.mxu3 %v815_v11  ;;  %v900_v10 = vmov 64.0   ;;  %v839_v11 = vld [vmem:[%s1072_s5 + $0x38] sm:$0xff] }
  0x3c   : > { %621 = vmatpush.bf16.msra.mxu2 %v839_v11 }
  0xa8   : > { %v386_v12 = vpop.f32.mrf.mxu0 }
  0xa9   : > { %v982_v15 = vadd.f32 %v857_v13, %v386_v12 }
  0xab   : > { %v406_v20 = vsub.f32 0.0, %v982_v15 }
  0xad   : > { %v414_v25 = vmul.f32 1.442695, %v406_v20 }
  0xae   : > { %v396_v14 = vpop.f32.mrf.mxu3 }
  0xaf   : > { %v991_v21 = vadd.f32 %v857_v13, %v396_v14 }
  0xb0   : > { %v388_v16 = vpop.f32.mrf.mxu0 }
  0xb1   : > { %v984_v17 = vadd.f32 %v857_v13, %v388_v16  ;;  %v410_v29 = vsub.f32 0.0, %v991_v21  ;;  %v838_v16 = vld [vmem:[%s1072_s5 + $0x30] sm:$0xff] }
  0xb2   : > { %622 = vmatpush.bf16.msra.mxu2 %v838_v16 }
  0xb3   : > { %v407_v19 = vsub.f32 0.0, %v984_v17  ;;  %v422_v34 = vmul.f32 1.442695, %v410_v29 }
  0xb5   : > { %v416_v24 = vmul.f32 1.442695, %v407_v19 }
  0xb6   : > { %v398_v22 = vpop.f32.mrf.mxu3 }
  0xb7   : > { %v996_v27 = vadd.f32 %v857_v13, %v398_v22  ;;  %858 = vpow2.f32 %v416_v24  ;;  %v837_v24 = vld [vmem:[%s1072_s5 + $0x28] sm:$0xff] }
  0xb8   : > { %v391_v26 = vpop.f32.mrf.mxu0  ;;  %860 = vpow2.f32 %v414_v25  ;;  %623 = vmatpush.bf16.msra.mxu2 %v837_v24 }
  0xb9   : > { %v998_v28 = vadd.f32 %v857_v13, %v391_v26  ;;  %v411_v32 = vsub.f32 0.0, %v996_v27 }
  0xbb   : > { %v408_v31 = vsub.f32 0.0, %v998_v28  ;;  %v424_v40 = vmul.f32 1.442695, %v411_v32 }
  0xbd   : > { %v418_v33 = vmul.f32 1.442695, %v408_v31  ;;  %v859_v39 = vpop.eup %858 }
  0xbe   : > { %v401_v35 = vpop.f32.mrf.mxu3  ;;  %v861_v43 = vpop.eup %860  ;;  %v431_v47 = vadd.f32 1.0, %v859_v39 }
  0xbf   : > { %862 = vpow2.f32 %v418_v33  ;;  %v1009_v37 = vadd.f32 %v857_v13, %v401_v35  ;;  %v430_v49 = vadd.f32 1.0, %v861_v43 }
  0xc0   : > { %v393_v38 = vpop.f32.mrf.mxu0  ;;  %864 = vpow2.f32 %v422_v34 }
  0xc1   : > { %v412_v41 = vsub.f32 0.0, %v1009_v37  ;;  %v394_v42 = vadd.f32 %v857_v13, %v393_v38  ;;  %866 = vpow2.f32 %v424_v40 }
  0xc3   : > { %v426_v45 = vmul.f32 1.442695, %v412_v41  ;;  %v409_v46 = vsub.f32 0.0, %v394_v42 }
  0xc5   : > { %v863_v48 = vpop.eup %862  ;;  %v420_v50 = vmul.f32 1.442695, %v409_v46  ;;  %868 = vpow2.f32 %v426_v45 }
  0xc6   : > { %v432_v52 = vadd.f32 1.0, %v863_v48  ;;  %v403_v53 = vpop.f32.mrf.mxu3  ;;  %v865_v55 = vpop.eup %864 }
  0xc7   : > { %870 = vpow2.f32 %v420_v50  ;;  %v404_v54 = vadd.f32 %v857_v13, %v403_v53  ;;  %v867_v58 = vpop.eup %866  ;;  %v434_v59 = vadd.f32 1.0, %v865_v55  ;;  %v832_v50 = vld [vmem:[%s1072_s5] sm:$0xff] }
  0xc8   : > { %872 = vrcp.f32 %v431_v47  ;;  %v435_v1 = vadd.f32 1.0, %v867_v58 }
  0xc9   : > { %874 = vrcp.f32 %v430_v49  ;;  %v413_v57 = vsub.f32 0.0, %v404_v54  ;;  %v833_v49 = vld [vmem:[%s1072_s5 + $0x8] sm:$0xff] }
  0xca   : > { %876 = vrcp.f32 %v432_v52 }
  0xcb   : > { %v428_v60 = vmul.f32 1.442695, %v413_v57  ;;  %v869_v61 = vpop.eup %868  ;;  %v572_v57 = vld [vmem:[%s1073_s6] sm:$0x1] }
  0xcc   : > { %v436_v5 = vadd.f32 1.0, %v869_v61 }
  0xcd   : > { %v871_v63 = vpop.eup %870  ;;  %878 = vpow2.f32 %v428_v60 }
  0xce   : > { %v873_v0 = vpop.eup %872  ;;  %v433_v2 = vadd.f32 1.0, %v871_v63  ;;  %880 = vrcp.f32 %v434_v59 }
  0xcf   : > { %v875_v3 = vpop.eup %874  ;;  %v447_v6 = vmul.f32 %v873_v0, %v984_v17 }
  0xd0   : > { %v877_v4 = vpop.eup %876  ;;  %882 = vrcp.f32 %v433_v2  ;;  %v446_v8 = vmul.f32 %v875_v3, %v982_v15 }
  0xd1   : > { %884 = vrcp.f32 %v435_v1  ;;  %v448_v9 = vmul.f32 %v877_v4, %v998_v28 }
  0xd2   : > { %886 = vrcp.f32 %v900_v10  ;;  %v454_v14 = vadd.f32 %v447_v6, %v446_v8 }
  0xd3   : > { %v879_v7 = vpop.eup %878  ;;  %888 = vrcp.f32 %v436_v5 }
  0xd4   : > { %v437_v12 = vadd.f32 1.0, %v879_v7  ;;  %v881_v13 = vpop.eup %880  ;;  %v455_v15 = vadd.f32 %v454_v14, %v448_v9 }
  0xd5   : > { %v450_v22 = vmul.f32 %v881_v13, %v991_v21  ;;  %v836_v21 = vld [vmem:[%s1072_s5 + $0x20] sm:$0xff] }
  0xd6   : > { %v883_v17 = vpop.eup %882  ;;  %890 = vrcp.f32 %v437_v12  ;;  %624 = vmatpush.bf16.msra.mxu2 %v836_v21 }
  0xd7   : > { %v449_v18 = vmul.f32 %v883_v17, %v394_v42  ;;  %v885_v19 = vpop.eup %884 }
  0xd8   : > { %v887_v20 = vpop.eup %886  ;;  %v451_v26 = vmul.f32 %v885_v19, %v996_v27  ;;  %v835_v27 = vld [vmem:[%s1072_s5 + $0x18] sm:$0xff] }
  0xd9   : > { %v456_v23 = vadd.f32 %v455_v15, %v449_v18  ;;  %v889_v25 = vpop.eup %888  ;;  %v468_v30 = vmul.f32 64.0, %v887_v20  ;;  %vm472_vm0 = vweird.f32 %v887_v20 }
  0xda   : > { %v452_v31 = vmul.f32 %v889_v25, %v1009_v37  ;;  %625 = vmatpush.bf16.msra.mxu2 %v835_v27  ;;  %v834_v37 = vld [vmem:[%s1072_s5 + $0x10] sm:$0xff] }
  0xdb   : > { %v457_v28 = vadd.f32 %v456_v23, %v450_v22  ;;  %v469_v35 = vsub.f32 1.0, %v468_v30 }
  0xdc   : > { %v891_v29 = vpop.eup %890 }
  0xdd   : > { %v458_v32 = vadd.f32 %v457_v28, %v451_v26  ;;  %v453_v33 = vmul.f32 %v891_v29, %v404_v54  ;;  %v470_v39 = vmul.f32 %v887_v20, %v469_v35 }
  0xde   : > { %626 = vmatpush.bf16.msra.mxu2 %v834_v37 }
  0xdf   : > { %v459_v34 = vadd.f32 %v458_v32, %v452_v31  ;;  %v471_v42 = vadd.f32 %v887_v20, %v470_v39 }
  0xe1   : > { %v460_v36 = vadd.f32 %v459_v34, %v453_v33  ;;  %v473_v45 = vsel %vm472_vm0, %v887_v20, %v471_v42 }
  0xe2   : > { %627 = vmatpush.bf16.msra.mxu2 %v833_v49 }
  0xe3   : > { %v461_v38 = vrot.slane %v460_v36, 4 }
  0xe5   : > { %v462_v40 = vadd.f32 %v461_v38, %v460_v36 }
  0xe6   : > { %628 = vmatpush.bf16.msra.mxu2 %v832_v50 }
  0xe7   : > { %v463_v41 = vrot.slane %v462_v40, 2 }
  0xe9   : > { %v464_v43 = vadd.f32 %v463_v41, %v462_v40 }
  0xeb   : > { %v465_v44 = vrot.slane %v464_v43, 1 }
  0xed   : > { %v466_v46 = vadd.f32 %v465_v44, %v464_v43 }
  0xef   : > { %v474_v47 = vmul.f32 %v473_v45, %v466_v46 }
  0xf1   : > { %v475_v48 = vpack.c.bf16 %v474_v47, %v474_v47 }
  0xf3   : > { %549 = vmatmul.bf16.vlgmr.msra.gmra.mxu1 %v475_v48 }
 0x170   : > { %v550_v52 = vpop.f32.mrf.mxu1 }
 0x171   : > { %v551_v53 = vadd.f32 %v550_v52, %v492_v51 }
 0x173   : > { %v554_v54 = vmax.f32 %v551_v53, 0.0 }
 0x175   : > { %v555_v55 = vpack.c.bf16 %v554_v54, %v554_v54 }
 0x177   : > { %629 = vmatmul.bf16.vlgmr.msra.gmra.mxu2 %v555_v55 }
 0x178   : > { %v552_v56 = vpop.f32.mrf.mxu1 }
 0x1fa   : > { %v630_v58 = vpop.f32.mrf.mxu2 }
 0x1fb   : > { %v631_v59 = vadd.f32 %v630_v58, %v572_v57 }
 0x1fd   : > { %v634_v60 = vperm.slane %v631_v59, 0 }
 0x1ff   : > { %635 = vst [vmem:[%s276_s22] sm:$0xff] %v634_v60 }
 0x202   : > { %v632_v61 = vpop.f32.mrf.mxu2 }
 0x203 PF: > { %s17_s24 = sadd.s32 1, %s898_s24  }
 0x204   : > { %p14_p4 = scmp.ge.s32.totalorder %s17_s24, 4  }
 0x206   :  { %16 = sbr.rel (!%p14_p4) target bundleno = 1 (0x1), region = 78 }

</bundles_post_ra>
